<compile_context>
chip_gen: v6e
topology: v6e:2x2x1
jax: 0.10.0
libtpu: 0.0.40
codegen_flags: <defaults>
</compile_context>

<pallas_src>
import functools
from typing import Dict, Optional

import jax
import jax.numpy as jnp
from jax.experimental import pallas as pl
from jax.experimental.pallas import tpu as pltpu

EPS = 1e-5  # nn.LayerNorm default eps


# ---------------------------------------------------------------------------
# in-kernel helpers (operate on values, not refs)
# ---------------------------------------------------------------------------
def _layernorm(x, gamma, beta):
    mu = jnp.mean(x, axis=-1, keepdims=True)
    var = jnp.mean((x - mu) ** 2, axis=-1, keepdims=True)
    return (x - mu) * jax.lax.rsqrt(var + EPS) * gamma + beta


def _gelu_exact(x):
    # PyTorch nn.GELU() default = exact erf-based GELU.
    return 0.5 * x * (1.0 + jax.lax.erf(x * 0.7071067811865476))


# ---------------------------------------------------------------------------
# fully fused forward kernel: one grid step == one batch element
# ---------------------------------------------------------------------------
def _fused_forward_kernel(*refs, num_heads, has_audio):
    it = iter(refs)
    nx = lambda: next(it)

    ph_ref = nx()                              # (1, T, P) phoneme features
    au_ref = nx() if has_audio else None       # (1, T, P) audio features
    h0_ref = nx()                              # (1, 1, H) previous GRU state
    # mapping network
    w1, b1, g1, be1 = nx(), nx(), nx(), nx()
    w2, b2, g2, be2 = nx(), nx(), nx(), nx()
    w3, b3 = nx(), nx()
    if has_audio:
        wa, ba = nx(), nx()                    # audio projection (P, H)
        wq, bq = nx(), nx()                    # (nh, H, dh), (nh, 1, dh)
        wk, bk = nx(), nx()
        wv, bv = nx(), nx()
        wo, bo = nx(), nx()                    # (nh, dh, H), (1, H)
    wvis, bvis = nx(), nx()                    # viseme head (H, Vp), (1, Vp)
    wih, bih = nx(), nx()                      # GRU input proj (H, 3H)
    whh, bhh = nx(), nx()                      # GRU hidden proj (H, 3H)
    wtc, btc = nx(), nx()                      # temporal viseme head (H, Vp)
    vis_ref = nx()                             # (1, T, Vp)
    feat_ref = nx()                            # (1, T, H)
    tvis_ref = nx()                            # (1, T, Vp)

    T = ph_ref.shape[1]
    H = whh.shape[0]

    def mm(a, w_ref, b_ref=None):
        # MXU matmul: operands follow the (possibly bf16) weight dtype,
        # accumulation stays f32, bias added post-accumulation in f32.
        w = w_ref[...]
        out = jnp.dot(a.astype(w.dtype), w, preferred_element_type=jnp.float32)
        return out if b_ref is None else out + b_ref[...]

    # ---- mapping network: Linear -> LN -> GELU (-> Dropout=id) x2 -> Linear
    x = ph_ref[0].astype(jnp.float32)                         # (T, P)
    x = _gelu_exact(_layernorm(mm(x, w1, b1), g1[...], be1[...]))
    x = _gelu_exact(_layernorm(mm(x, w2, b2), g2[...], be2[...]))
    x = mm(x, w3, b3)                                         # (T, H) f32

    # ---- audio projection + multi-head cross attention + residual ---------
    if has_audio:
        nh = num_heads
        dh = H // nh
        kv = mm(au_ref[0].astype(jnp.float32), wa, ba)        # (T, H)

        def proj_heads(a, w_ref, b_ref):
            # a: (T, H) -> (nh, T, dh) via a batched matmul with the per-head
            # weight slab (nh, H, dh); head axis is leading everywhere so all
            # einsums below are the standard batched-matmul forms.
            w = w_ref[...]
            ab = jnp.broadcast_to(a, (nh,) + a.shape).astype(w.dtype)
            return jnp.einsum("nte,ned->ntd", ab, w,
                              preferred_element_type=jnp.float32) + b_ref[...]

        qh = proj_heads(x, wq, bq)                            # (nh, T, dh)
        kh = proj_heads(kv, wk, bk)                           # (nh, T, dh)
        vh = proj_heads(kv, wv, bv)                           # (nh, T, dh)

        s = jnp.einsum("nqd,nkd->nqk", qh, kh,
                       preferred_element_type=jnp.float32) * (1.0 / (dh ** 0.5))
        s = s - jnp.max(s, axis=-1, keepdims=True)
        p = jnp.exp(s)
        attn = p * pl.reciprocal(jnp.sum(p, axis=-1, keepdims=True), approx=True)
        ctx = jnp.einsum("nqk,nkd->nqd", attn, vh,
                         preferred_element_type=jnp.float32)  # (nh, T, dh)
        # output projection folded per head: out = sum_h ctx_h @ Wo_h + bo
        wo_v = wo[...]
        out = jnp.einsum("nqd,nde->nqe", ctx.astype(wo_v.dtype), wo_v,
                         preferred_element_type=jnp.float32)  # (nh, T, H)
        x = x + jnp.sum(out, axis=0) + bo[...]                # residual add

    # ---- viseme classifier (lane-padded columns -> unmasked stores) -------
    vis_ref[0] = mm(x, wvis, bvis).astype(vis_ref.dtype)

    # ---- temporal consistency layer --------------------------------------
    # TODO(synk): TemporalConsistencyLayer source is unavailable; modeled as a
    # single-layer GRU over time plus a viseme classifier head that returns
    # {'features', 'hidden_states', 'viseme_logits'} as the forward expects.
    xg = mm(x, wih, bih)                      # (T, 3H) hoisted input proj
    whh_v = whh[...]
    bhh_v = bhh[...]
    h = h0_ref[0].astype(jnp.float32)         # (1, H)
    hs = []
    for t in range(T):  # static unroll: only h @ W_hh remains on serial chain
        hg = jnp.dot(h.astype(whh_v.dtype), whh_v,
                     preferred_element_type=jnp.float32) + bhh_v
        xt = xg[t:t + 1, :]
        r = jax.nn.sigmoid(xt[:, :H] + hg[:, :H])
        z = jax.nn.sigmoid(xt[:, H:2 * H] + hg[:, H:2 * H])
        n = jnp.tanh(xt[:, 2 * H:] + r * hg[:, 2 * H:])
        h = (1.0 - z) * n + z * h
        hs.append(h)
    feats = jnp.concatenate(hs, axis=0)       # (T, H)
    feat_ref[0] = feats.astype(feat_ref.dtype)
    tvis_ref[0] = mm(feats, wtc, btc).astype(tvis_ref.dtype)


# ---------------------------------------------------------------------------
# wrapper: weight preparation + single pallas_call
# ---------------------------------------------------------------------------
def enhanced_phoneme_mapper_forward(
    params: Dict[str, jnp.ndarray],
    phoneme_features: jnp.ndarray,                 # [B, T, phoneme_dim]
    audio_features: Optional[jnp.ndarray] = None,  # [B, T, phoneme_dim]
    prev_states: Optional[jnp.ndarray] = None,     # [B, hidden_dim]
    *,
    num_heads: int = 8,
    use_bf16_matmul: bool = True,
) -> Dict[str, jnp.ndarray]:
    B, T, P = phoneme_features.shape
    H = params["map_w1"].shape[0]
    V = params["viseme_w"].shape[0]
    Vp = ((V + 127) // 128) * 128                  # lane-dense head width
    assert H % num_heads == 0
    dh = H // num_heads
    has_audio = audio_features is not None

    f32 = jnp.float32
    wdt = jnp.bfloat16 if use_bf16_matmul else f32

    def wT(w):                      # (out, in) -> (in, out) MXU operand
        return w.T.astype(wdt)

    def row(b):                     # bias / LN param -> (1, N) f32
        return b.reshape(1, -1).astype(f32)

    def head_w(w):                  # (E, E) in-proj slice -> (nh, E, dh)
        return w.reshape(num_heads, dh, H).transpose(0, 2, 1).astype(wdt)

    def head_b(b):                  # (E,) -> (nh, 1, dh) f32
        return b.reshape(num_heads, 1, dh).astype(f32)

    pad = Vp - V
    wvis = jnp.pad(params["viseme_w"], ((0, pad), (0, 0))).T.astype(wdt)
    bvis = jnp.pad(params["viseme_b"], (0, pad)).reshape(1, Vp).astype(f32)
    wtc = jnp.pad(params["temporal_cls_w"], ((0, pad), (0, 0))).T.astype(wdt)
    btc = jnp.pad(params["temporal_cls_b"], (0, pad)).reshape(1, Vp).astype(f32)

    if prev_states is None:
        h0 = jnp.zeros((B, 1, H), f32)
    else:
        h0 = prev_states.reshape(B, 1, H).astype(f32)

    # --- inputs gridded over batch -----------------------------------------
    args = [phoneme_features]
    in_specs = [pl.BlockSpec((1, T, P), lambda b: (b, 0, 0))]
    if has_audio:
        args.append(audio_features)
        in_specs.append(pl.BlockSpec((1, T, P), lambda b: (b, 0, 0)))
    args.append(h0)
    in_specs.append(pl.BlockSpec((1, 1, H), lambda b: (b, 0, 0)))

    # --- weights: full-array constant-index blocks --------------------------
    weights = [
        wT(params["map_w1"]), row(params["map_b1"]),
        row(params["map_g1"]), row(params["map_beta1"]),
        wT(params["map_w2"]), row(params["map_b2"]),
        row(params["map_g2"]), row(params["map_beta2"]),
        wT(params["map_w3"]), row(params["map_b3"]),
    ]
    if has_audio:
        w_in, b_in = params["attn_in_w"], params["attn_in_b"]
        weights += [
            wT(params["audio_proj_w"]), row(params["audio_proj_b"]),
            head_w(w_in[:H]), head_b(b_in[:H]),
            head_w(w_in[H:2 * H]), head_b(b_in[H:2 * H]),
            head_w(w_in[2 * H:]), head_b(b_in[2 * H:]),
            params["attn_out_w"].T.reshape(num_heads, dh, H).astype(wdt),
            row(params["attn_out_b"]),
        ]
    weights += [
        wvis, bvis,
        wT(params["gru_w_ih"]), row(params["gru_b_ih"]),
        wT(params["gru_w_hh"]), row(params["gru_b_hh"]),
        wtc, btc,
    ]

    def const_spec(a):
        return pl.BlockSpec(a.shape, lambda b: (0,) * a.ndim)

    args += weights
    in_specs += [const_spec(a) for a in weights]

    dt = phoneme_features.dtype
    out_shape = (
        jax.ShapeDtypeStruct((B, T, Vp), dt),   # viseme logits (lane padded)
        jax.ShapeDtypeStruct((B, T, H), dt),    # temporal features
        jax.ShapeDtypeStruct((B, T, Vp), dt),   # temporal viseme logits (padded)
    )
    out_specs = (
        pl.BlockSpec((1, T, Vp), lambda b: (b, 0, 0)),
        pl.BlockSpec((1, T, H), lambda b: (b, 0, 0)),
        pl.BlockSpec((1, T, Vp), lambda b: (b, 0, 0)),
    )

    kernel = functools.partial(_fused_forward_kernel,
                               num_heads=num_heads, has_audio=has_audio)
    vis_pad, feats, tvis_pad = pl.pallas_call(
        kernel,
        out_shape=out_shape,
        grid=(B,),
        in_specs=in_specs,
        out_specs=out_specs,
        compiler_params=pltpu.CompilerParams(
            dimension_semantics=("parallel",),
            vmem_limit_bytes=32 * 1024 * 1024,
        ),
    )(*args)

    return {
        "visual_features": feats,
        "viseme_logits": vis_pad[..., :V],
        "hidden_states": feats[:, -1, :],
        "temporal_viseme_logits": tvis_pad[..., :V],
    }


# ---------------------------------------------------------------------------
# deterministic parameter init (shapes follow the PyTorch module's __init__)
# ---------------------------------------------------------------------------
def init_params(key, phoneme_dim, hidden_dim, num_visemes=20):
    def nrm(k, shape, scale=0.02):
        return scale * jax.random.normal(k, shape, jnp.float32)

    ks = jax.random.split(key, 10)
    H, P, V = hidden_dim, phoneme_dim, num_visemes
    zeros = lambda s: jnp.zeros(s, jnp.float32)
    ones = lambda s: jnp.ones(s, jnp.float32)
    return {
        # mapping_network
        "map_w1": nrm(ks[0], (H, P)), "map_b1": zeros((H,)),
        "map_g1": ones((H,)), "map_beta1": zeros((H,)),
        "map_w2": nrm(ks[1], (H, H)), "map_b2": zeros((H,)),
        "map_g2": ones((H,)), "map_beta2": zeros((H,)),
        "map_w3": nrm(ks[2], (H, H)), "map_b3": zeros((H,)),
        # audio projection
        "audio_proj_w": nrm(ks[3], (H, P)), "audio_proj_b": zeros((H,)),
        # nn.MultiheadAttention packed in-proj (3H, H) + out-proj (H, H)
        "attn_in_w": nrm(ks[4], (3 * H, H)), "attn_in_b": zeros((3 * H,)),
        "attn_out_w": nrm(ks[5], (H, H)), "attn_out_b": zeros((H,)),
        # viseme classifier
        "viseme_w": nrm(ks[6], (V, H)), "viseme_b": zeros((V,)),
        # temporal layer (GRU-style) + its viseme head
        "gru_w_ih": nrm(ks[7], (3 * H, H)), "gru_b_ih": zeros((3 * H,)),
        "gru_w_hh": nrm(ks[8], (3 * H, H)), "gru_b_hh": zeros((3 * H,)),
        "temporal_cls_w": nrm(ks[9], (V, H)), "temporal_cls_b": zeros((V,)),
    }


if __name__ == "__main__":
    B, T = 2, 8
    phoneme_dim, hidden_dim, num_visemes = 24, 32, 20

    key = jax.random.PRNGKey(0)
    kp, kx, ka = jax.random.split(key, 3)
    params = init_params(kp, phoneme_dim, hidden_dim, num_visemes)
    phonemes = jax.random.normal(kx, (B, T, phoneme_dim), jnp.float32)
    audio = jax.random.normal(ka, (B, T, phoneme_dim), jnp.float32)

    fwd = jax.jit(enhanced_phoneme_mapper_forward)
    out = jax.block_until_ready(fwd(params, phonemes, audio))

    assert out["visual_features"].shape == (B, T, hidden_dim)
    assert out["viseme_logits"].shape == (B, T, num_visemes)
    assert out["temporal_viseme_logits"].shape == (B, T, num_visemes)
    assert out["hidden_states"].shape == (B, hidden_dim)
    assert all(bool(jnp.all(jnp.isfinite(v))) for v in out.values())
    print("KERNEL_OK")
</pallas_src>

<mosaic_0001>
module attributes {stable_mosaic.version = 11 : i64} {
  func.func @_fused_forward_kernel(%arg0: i32, %arg1: memref<1x8x24xf32, #tpu.memory_space<vmem>>, %arg2: memref<1x8x24xf32, #tpu.memory_space<vmem>>, %arg3: memref<1x1x32xf32, #tpu.memory_space<vmem>>, %arg4: memref<24x32xbf16, #tpu.memory_space<vmem>>, %arg5: memref<1x32xf32, #tpu.memory_space<vmem>>, %arg6: memref<1x32xf32, #tpu.memory_space<vmem>>, %arg7: memref<1x32xf32, #tpu.memory_space<vmem>>, %arg8: memref<32x32xbf16, #tpu.memory_space<vmem>>, %arg9: memref<1x32xf32, #tpu.memory_space<vmem>>, %arg10: memref<1x32xf32, #tpu.memory_space<vmem>>, %arg11: memref<1x32xf32, #tpu.memory_space<vmem>>, %arg12: memref<32x32xbf16, #tpu.memory_space<vmem>>, %arg13: memref<1x32xf32, #tpu.memory_space<vmem>>, %arg14: memref<24x32xbf16, #tpu.memory_space<vmem>>, %arg15: memref<1x32xf32, #tpu.memory_space<vmem>>, %arg16: memref<8x32x4xbf16, #tpu.memory_space<vmem>>, %arg17: memref<8x1x4xf32, #tpu.memory_space<vmem>>, %arg18: memref<8x32x4xbf16, #tpu.memory_space<vmem>>, %arg19: memref<8x1x4xf32, #tpu.memory_space<vmem>>, %arg20: memref<8x32x4xbf16, #tpu.memory_space<vmem>>, %arg21: memref<8x1x4xf32, #tpu.memory_space<vmem>>, %arg22: memref<8x4x32xbf16, #tpu.memory_space<vmem>>, %arg23: memref<1x32xf32, #tpu.memory_space<vmem>>, %arg24: memref<32x128xbf16, #tpu.memory_space<vmem>>, %arg25: memref<1x128xf32, #tpu.memory_space<vmem>>, %arg26: memref<32x96xbf16, #tpu.memory_space<vmem>>, %arg27: memref<1x96xf32, #tpu.memory_space<vmem>>, %arg28: memref<32x96xbf16, #tpu.memory_space<vmem>>, %arg29: memref<1x96xf32, #tpu.memory_space<vmem>>, %arg30: memref<32x128xbf16, #tpu.memory_space<vmem>>, %arg31: memref<1x128xf32, #tpu.memory_space<vmem>>, %arg32: memref<1x8x128xf32, #tpu.memory_space<vmem>>, %arg33: memref<1x8x32xf32, #tpu.memory_space<vmem>>, %arg34: memref<1x8x128xf32, #tpu.memory_space<vmem>>) attributes {dimension_semantics = [#tpu.dimension_semantics<parallel>], iteration_bounds = array<i64: 2>, scalar_prefetch = 0 : i64, scratch_operands = 0 : i64, tpu.core_type = #tpu.core_type<tc>, window_params = [{transform_indices = @transform_0, window_bounds = array<i64: 1, 8, 24>}, {transform_indices = @transform_1, window_bounds = array<i64: 1, 8, 24>}, {transform_indices = @transform_2, window_bounds = array<i64: 1, 1, 32>}, {pipeline_mode = #tpu.pipeline_mode<synchronous>, transform_indices = @transform_3, window_bounds = array<i64: 24, 32>}, {pipeline_mode = #tpu.pipeline_mode<synchronous>, transform_indices = @transform_4, window_bounds = array<i64: 1, 32>}, {pipeline_mode = #tpu.pipeline_mode<synchronous>, transform_indices = @transform_5, window_bounds = array<i64: 1, 32>}, {pipeline_mode = #tpu.pipeline_mode<synchronous>, transform_indices = @transform_6, window_bounds = array<i64: 1, 32>}, {pipeline_mode = #tpu.pipeline_mode<synchronous>, transform_indices = @transform_7, window_bounds = array<i64: 32, 32>}, {pipeline_mode = #tpu.pipeline_mode<synchronous>, transform_indices = @transform_8, window_bounds = array<i64: 1, 32>}, {pipeline_mode = #tpu.pipeline_mode<synchronous>, transform_indices = @transform_9, window_bounds = array<i64: 1, 32>}, {pipeline_mode = #tpu.pipeline_mode<synchronous>, transform_indices = @transform_10, window_bounds = array<i64: 1, 32>}, {pipeline_mode = #tpu.pipeline_mode<synchronous>, transform_indices = @transform_11, window_bounds = array<i64: 32, 32>}, {pipeline_mode = #tpu.pipeline_mode<synchronous>, transform_indices = @transform_12, window_bounds = array<i64: 1, 32>}, {pipeline_mode = #tpu.pipeline_mode<synchronous>, transform_indices = @transform_13, window_bounds = array<i64: 24, 32>}, {pipeline_mode = #tpu.pipeline_mode<synchronous>, transform_indices = @transform_14, window_bounds = array<i64: 1, 32>}, {pipeline_mode = #tpu.pipeline_mode<synchronous>, transform_indices = @transform_15, window_bounds = array<i64: 8, 32, 4>}, {pipeline_mode = #tpu.pipeline_mode<synchronous>, transform_indices = @transform_16, window_bounds = array<i64: 8, 1, 4>}, {pipeline_mode = #tpu.pipeline_mode<synchronous>, transform_indices = @transform_17, window_bounds = array<i64: 8, 32, 4>}, {pipeline_mode = #tpu.pipeline_mode<synchronous>, transform_indices = @transform_18, window_bounds = array<i64: 8, 1, 4>}, {pipeline_mode = #tpu.pipeline_mode<synchronous>, transform_indices = @transform_19, window_bounds = array<i64: 8, 32, 4>}, {pipeline_mode = #tpu.pipeline_mode<synchronous>, transform_indices = @transform_20, window_bounds = array<i64: 8, 1, 4>}, {pipeline_mode = #tpu.pipeline_mode<synchronous>, transform_indices = @transform_21, window_bounds = array<i64: 8, 4, 32>}, {pipeline_mode = #tpu.pipeline_mode<synchronous>, transform_indices = @transform_22, window_bounds = array<i64: 1, 32>}, {pipeline_mode = #tpu.pipeline_mode<synchronous>, transform_indices = @transform_23, window_bounds = array<i64: 32, 128>}, {pipeline_mode = #tpu.pipeline_mode<synchronous>, transform_indices = @transform_24, window_bounds = array<i64: 1, 128>}, {pipeline_mode = #tpu.pipeline_mode<synchronous>, transform_indices = @transform_25, window_bounds = array<i64: 32, 96>}, {pipeline_mode = #tpu.pipeline_mode<synchronous>, transform_indices = @transform_26, window_bounds = array<i64: 1, 96>}, {pipeline_mode = #tpu.pipeline_mode<synchronous>, transform_indices = @transform_27, window_bounds = array<i64: 32, 96>}, {pipeline_mode = #tpu.pipeline_mode<synchronous>, transform_indices = @transform_28, window_bounds = array<i64: 1, 96>}, {pipeline_mode = #tpu.pipeline_mode<synchronous>, transform_indices = @transform_29, window_bounds = array<i64: 32, 128>}, {pipeline_mode = #tpu.pipeline_mode<synchronous>, transform_indices = @transform_30, window_bounds = array<i64: 1, 128>}, {transform_indices = @transform_31, window_bounds = array<i64: 1, 8, 128>}, {transform_indices = @transform_32, window_bounds = array<i64: 1, 8, 32>}, {transform_indices = @transform_33, window_bounds = array<i64: 1, 8, 128>}]} {
    %c0 = arith.constant 0 : index
    %c0_0 = arith.constant 0 : index
    %c0_1 = arith.constant 0 : index
    %0 = vector.load %arg1[%c0, %c0_0, %c0_1] : memref<1x8x24xf32, #tpu.memory_space<vmem>>, vector<1x8x24xf32>
    %1 = vector.shape_cast %0 : vector<1x8x24xf32> to vector<8x24xf32>
    %c0_2 = arith.constant 0 : index
    %c0_3 = arith.constant 0 : index
    %2 = vector.load %arg4[%c0_2, %c0_3] : memref<24x32xbf16, #tpu.memory_space<vmem>>, vector<24x32xbf16>
    %3 = arith.truncf %1 : vector<8x24xf32> to vector<8x24xbf16>
    %cst = arith.constant dense<0.000000e+00> : vector<8x32xf32>
    %4 = tpu.matmul %3, %2, %cst {dimension_numbers = #tpu.dot_dimension_numbers<[1], [0], [0], [1], [0, 0, 1, 1], [], []>} : vector<8x24xbf16>, vector<24x32xbf16>, vector<8x32xf32> -> vector<8x32xf32>
    %c0_4 = arith.constant 0 : index
    %c0_5 = arith.constant 0 : index
    %5 = vector.load %arg5[%c0_4, %c0_5] : memref<1x32xf32, #tpu.memory_space<vmem>>, vector<1x32xf32>
    %6 = vector.broadcast %5 : vector<1x32xf32> to vector<8x32xf32>
    %7 = arith.addf %4, %6 : vector<8x32xf32>
    %c0_6 = arith.constant 0 : index
    %c0_7 = arith.constant 0 : index
    %8 = vector.load %arg6[%c0_6, %c0_7] : memref<1x32xf32, #tpu.memory_space<vmem>>, vector<1x32xf32>
    %c0_8 = arith.constant 0 : index
    %c0_9 = arith.constant 0 : index
    %9 = vector.load %arg7[%c0_8, %c0_9] : memref<1x32xf32, #tpu.memory_space<vmem>>, vector<1x32xf32>
    %cst_10 = arith.constant dense<0.000000e+00> : vector<8xf32>
    %10 = vector.multi_reduction <add>, %7, %cst_10 [1] : vector<8x32xf32> to vector<8xf32>
    %11 = vector.shape_cast %10 : vector<8xf32> to vector<8x1xf32>
    %cst_11 = arith.constant 3.200000e+01 : f32
    %12 = vector.broadcast %cst_11 : f32 to vector<8x1xf32>
    %13 = arith.divf %11, %12 : vector<8x1xf32>
    %14 = vector.broadcast %13 : vector<8x1xf32> to vector<8x32xf32>
    %15 = arith.subf %7, %14 : vector<8x32xf32>
    %16 = arith.mulf %15, %15 : vector<8x32xf32>
    %cst_12 = arith.constant dense<0.000000e+00> : vector<8xf32>
    %17 = vector.multi_reduction <add>, %16, %cst_12 [1] : vector<8x32xf32> to vector<8xf32>
    %18 = vector.shape_cast %17 : vector<8xf32> to vector<8x1xf32>
    %cst_13 = arith.constant 3.200000e+01 : f32
    %19 = vector.broadcast %cst_13 : f32 to vector<8x1xf32>
    %20 = arith.divf %18, %19 : vector<8x1xf32>
    %21 = vector.broadcast %13 : vector<8x1xf32> to vector<8x32xf32>
    %22 = arith.subf %7, %21 : vector<8x32xf32>
    %cst_14 = arith.constant 9.99999974E-6 : f32
    %23 = vector.broadcast %cst_14 : f32 to vector<8x1xf32>
    %24 = arith.addf %20, %23 : vector<8x1xf32>
    %25 = math.rsqrt %24 : vector<8x1xf32>
    %26 = vector.broadcast %25 : vector<8x1xf32> to vector<8x32xf32>
    %27 = arith.mulf %22, %26 : vector<8x32xf32>
    %28 = vector.broadcast %8 : vector<1x32xf32> to vector<8x32xf32>
    %29 = arith.mulf %27, %28 : vector<8x32xf32>
    %30 = vector.broadcast %9 : vector<1x32xf32> to vector<8x32xf32>
    %31 = arith.addf %29, %30 : vector<8x32xf32>
    %cst_15 = arith.constant 5.000000e-01 : f32
    %32 = vector.broadcast %cst_15 : f32 to vector<8x32xf32>
    %33 = arith.mulf %32, %31 : vector<8x32xf32>
    %cst_16 = arith.constant 0.707106769 : f32
    %34 = vector.broadcast %cst_16 : f32 to vector<8x32xf32>
    %35 = arith.mulf %31, %34 : vector<8x32xf32>
    %36 = math.erf %35 : vector<8x32xf32>
    %cst_17 = arith.constant 1.000000e+00 : f32
    %37 = vector.broadcast %cst_17 : f32 to vector<8x32xf32>
    %38 = arith.addf %37, %36 : vector<8x32xf32>
    %39 = arith.mulf %33, %38 : vector<8x32xf32>
    %c0_18 = arith.constant 0 : index
    %c0_19 = arith.constant 0 : index
    %40 = vector.load %arg8[%c0_18, %c0_19] : memref<32x32xbf16, #tpu.memory_space<vmem>>, vector<32x32xbf16>
    %41 = arith.truncf %39 : vector<8x32xf32> to vector<8x32xbf16>
    %cst_20 = arith.constant dense<0.000000e+00> : vector<8x32xf32>
    %42 = tpu.matmul %41, %40, %cst_20 {dimension_numbers = #tpu.dot_dimension_numbers<[1], [0], [0], [1], [0, 0, 1, 1], [], []>} : vector<8x32xbf16>, vector<32x32xbf16>, vector<8x32xf32> -> vector<8x32xf32>
    %c0_21 = arith.constant 0 : index
    %c0_22 = arith.constant 0 : index
    %43 = vector.load %arg9[%c0_21, %c0_22] : memref<1x32xf32, #tpu.memory_space<vmem>>, vector<1x32xf32>
    %44 = vector.broadcast %43 : vector<1x32xf32> to vector<8x32xf32>
    %45 = arith.addf %42, %44 : vector<8x32xf32>
    %c0_23 = arith.constant 0 : index
    %c0_24 = arith.constant 0 : index
    %46 = vector.load %arg10[%c0_23, %c0_24] : memref<1x32xf32, #tpu.memory_space<vmem>>, vector<1x32xf32>
    %c0_25 = arith.constant 0 : index
    %c0_26 = arith.constant 0 : index
    %47 = vector.load %arg11[%c0_25, %c0_26] : memref<1x32xf32, #tpu.memory_space<vmem>>, vector<1x32xf32>
    %cst_27 = arith.constant dense<0.000000e+00> : vector<8xf32>
    %48 = vector.multi_reduction <add>, %45, %cst_27 [1] : vector<8x32xf32> to vector<8xf32>
    %49 = vector.shape_cast %48 : vector<8xf32> to vector<8x1xf32>
    %cst_28 = arith.constant 3.200000e+01 : f32
    %50 = vector.broadcast %cst_28 : f32 to vector<8x1xf32>
    %51 = arith.divf %49, %50 : vector<8x1xf32>
    %52 = vector.broadcast %51 : vector<8x1xf32> to vector<8x32xf32>
    %53 = arith.subf %45, %52 : vector<8x32xf32>
    %54 = arith.mulf %53, %53 : vector<8x32xf32>
    %cst_29 = arith.constant dense<0.000000e+00> : vector<8xf32>
    %55 = vector.multi_reduction <add>, %54, %cst_29 [1] : vector<8x32xf32> to vector<8xf32>
    %56 = vector.shape_cast %55 : vector<8xf32> to vector<8x1xf32>
    %cst_30 = arith.constant 3.200000e+01 : f32
    %57 = vector.broadcast %cst_30 : f32 to vector<8x1xf32>
    %58 = arith.divf %56, %57 : vector<8x1xf32>
    %59 = vector.broadcast %51 : vector<8x1xf32> to vector<8x32xf32>
    %60 = arith.subf %45, %59 : vector<8x32xf32>
    %cst_31 = arith.constant 9.99999974E-6 : f32
    %61 = vector.broadcast %cst_31 : f32 to vector<8x1xf32>
    %62 = arith.addf %58, %61 : vector<8x1xf32>
    %63 = math.rsqrt %62 : vector<8x1xf32>
    %64 = vector.broadcast %63 : vector<8x1xf32> to vector<8x32xf32>
    %65 = arith.mulf %60, %64 : vector<8x32xf32>
    %66 = vector.broadcast %46 : vector<1x32xf32> to vector<8x32xf32>
    %67 = arith.mulf %65, %66 : vector<8x32xf32>
    %68 = vector.broadcast %47 : vector<1x32xf32> to vector<8x32xf32>
    %69 = arith.addf %67, %68 : vector<8x32xf32>
    %cst_32 = arith.constant 5.000000e-01 : f32
    %70 = vector.broadcast %cst_32 : f32 to vector<8x32xf32>
    %71 = arith.mulf %70, %69 : vector<8x32xf32>
    %cst_33 = arith.constant 0.707106769 : f32
    %72 = vector.broadcast %cst_33 : f32 to vector<8x32xf32>
    %73 = arith.mulf %69, %72 : vector<8x32xf32>
    %74 = math.erf %73 : vector<8x32xf32>
    %cst_34 = arith.constant 1.000000e+00 : f32
    %75 = vector.broadcast %cst_34 : f32 to vector<8x32xf32>
    %76 = arith.addf %75, %74 : vector<8x32xf32>
    %77 = arith.mulf %71, %76 : vector<8x32xf32>
    %c0_35 = arith.constant 0 : index
    %c0_36 = arith.constant 0 : index
    %78 = vector.load %arg12[%c0_35, %c0_36] : memref<32x32xbf16, #tpu.memory_space<vmem>>, vector<32x32xbf16>
    %79 = arith.truncf %77 : vector<8x32xf32> to vector<8x32xbf16>
    %cst_37 = arith.constant dense<0.000000e+00> : vector<8x32xf32>
    %80 = tpu.matmul %79, %78, %cst_37 {dimension_numbers = #tpu.dot_dimension_numbers<[1], [0], [0], [1], [0, 0, 1, 1], [], []>} : vector<8x32xbf16>, vector<32x32xbf16>, vector<8x32xf32> -> vector<8x32xf32>
    %c0_38 = arith.constant 0 : index
    %c0_39 = arith.constant 0 : index
    %81 = vector.load %arg13[%c0_38, %c0_39] : memref<1x32xf32, #tpu.memory_space<vmem>>, vector<1x32xf32>
    %82 = vector.broadcast %81 : vector<1x32xf32> to vector<8x32xf32>
    %83 = arith.addf %80, %82 : vector<8x32xf32>
    %c0_40 = arith.constant 0 : index
    %c0_41 = arith.constant 0 : index
    %c0_42 = arith.constant 0 : index
    %84 = vector.load %arg2[%c0_40, %c0_41, %c0_42] : memref<1x8x24xf32, #tpu.memory_space<vmem>>, vector<1x8x24xf32>
    %85 = vector.shape_cast %84 : vector<1x8x24xf32> to vector<8x24xf32>
    %c0_43 = arith.constant 0 : index
    %c0_44 = arith.constant 0 : index
    %86 = vector.load %arg14[%c0_43, %c0_44] : memref<24x32xbf16, #tpu.memory_space<vmem>>, vector<24x32xbf16>
    %87 = arith.truncf %85 : vector<8x24xf32> to vector<8x24xbf16>
    %cst_45 = arith.constant dense<0.000000e+00> : vector<8x32xf32>
    %88 = tpu.matmul %87, %86, %cst_45 {dimension_numbers = #tpu.dot_dimension_numbers<[1], [0], [0], [1], [0, 0, 1, 1], [], []>} : vector<8x24xbf16>, vector<24x32xbf16>, vector<8x32xf32> -> vector<8x32xf32>
    %c0_46 = arith.constant 0 : index
    %c0_47 = arith.constant 0 : index
    %89 = vector.load %arg15[%c0_46, %c0_47] : memref<1x32xf32, #tpu.memory_space<vmem>>, vector<1x32xf32>
    %90 = vector.broadcast %89 : vector<1x32xf32> to vector<8x32xf32>
    %91 = arith.addf %88, %90 : vector<8x32xf32>
    %c0_48 = arith.constant 0 : index
    %c0_49 = arith.constant 0 : index
    %c0_50 = arith.constant 0 : index
    %92 = vector.load %arg16[%c0_48, %c0_49, %c0_50] : memref<8x32x4xbf16, #tpu.memory_space<vmem>>, vector<8x32x4xbf16>
    %93 = vector.shape_cast %83 : vector<8x32xf32> to vector<1x8x32xf32>
    %94 = vector.broadcast %93 : vector<1x8x32xf32> to vector<8x8x32xf32>
    %95 = arith.truncf %94 : vector<8x8x32xf32> to vector<8x8x32xbf16>
    "tpu.trace_start"() <{level = 10 : i32, message = "nte,ned->ntd"}> : () -> ()
    %cst_51 = arith.constant dense<0.000000e+00> : vector<8x8x4xf32>
    %96 = tpu.matmul %95, %92, %cst_51 {dimension_numbers = #tpu.dot_dimension_numbers<[2], [1], [1], [2], [0, 0, 0, 1, 1, 2], [0], [0]>} : vector<8x8x32xbf16>, vector<8x32x4xbf16>, vector<8x8x4xf32> -> vector<8x8x4xf32>
    "tpu.trace_stop"() : () -> ()
    %c0_52 = arith.constant 0 : index
    %c0_53 = arith.constant 0 : index
    %c0_54 = arith.constant 0 : index
    %97 = vector.load %arg17[%c0_52, %c0_53, %c0_54] : memref<8x1x4xf32, #tpu.memory_space<vmem>>, vector<8x1x4xf32>
    %98 = vector.broadcast %97 : vector<8x1x4xf32> to vector<8x8x4xf32>
    %99 = arith.addf %96, %98 : vector<8x8x4xf32>
    %c0_55 = arith.constant 0 : index
    %c0_56 = arith.constant 0 : index
    %c0_57 = arith.constant 0 : index
    %100 = vector.load %arg18[%c0_55, %c0_56, %c0_57] : memref<8x32x4xbf16, #tpu.memory_space<vmem>>, vector<8x32x4xbf16>
    %101 = vector.shape_cast %91 : vector<8x32xf32> to vector<1x8x32xf32>
    %102 = vector.broadcast %101 : vector<1x8x32xf32> to vector<8x8x32xf32>
    %103 = arith.truncf %102 : vector<8x8x32xf32> to vector<8x8x32xbf16>
    "tpu.trace_start"() <{level = 10 : i32, message = "nte,ned->ntd"}> : () -> ()
    %cst_58 = arith.constant dense<0.000000e+00> : vector<8x8x4xf32>
    %104 = tpu.matmul %103, %100, %cst_58 {dimension_numbers = #tpu.dot_dimension_numbers<[2], [1], [1], [2], [0, 0, 0, 1, 1, 2], [0], [0]>} : vector<8x8x32xbf16>, vector<8x32x4xbf16>, vector<8x8x4xf32> -> vector<8x8x4xf32>
    "tpu.trace_stop"() : () -> ()
    %c0_59 = arith.constant 0 : index
    %c0_60 = arith.constant 0 : index
    %c0_61 = arith.constant 0 : index
    %105 = vector.load %arg19[%c0_59, %c0_60, %c0_61] : memref<8x1x4xf32, #tpu.memory_space<vmem>>, vector<8x1x4xf32>
    %106 = vector.broadcast %105 : vector<8x1x4xf32> to vector<8x8x4xf32>
    %107 = arith.addf %104, %106 : vector<8x8x4xf32>
    %c0_62 = arith.constant 0 : index
    %c0_63 = arith.constant 0 : index
    %c0_64 = arith.constant 0 : index
    %108 = vector.load %arg20[%c0_62, %c0_63, %c0_64] : memref<8x32x4xbf16, #tpu.memory_space<vmem>>, vector<8x32x4xbf16>
    %109 = vector.shape_cast %91 : vector<8x32xf32> to vector<1x8x32xf32>
    %110 = vector.broadcast %109 : vector<1x8x32xf32> to vector<8x8x32xf32>
    %111 = arith.truncf %110 : vector<8x8x32xf32> to vector<8x8x32xbf16>
    "tpu.trace_start"() <{level = 10 : i32, message = "nte,ned->ntd"}> : () -> ()
    %cst_65 = arith.constant dense<0.000000e+00> : vector<8x8x4xf32>
    %112 = tpu.matmul %111, %108, %cst_65 {dimension_numbers = #tpu.dot_dimension_numbers<[2], [1], [1], [2], [0, 0, 0, 1, 1, 2], [0], [0]>} : vector<8x8x32xbf16>, vector<8x32x4xbf16>, vector<8x8x4xf32> -> vector<8x8x4xf32>
    "tpu.trace_stop"() : () -> ()
    %c0_66 = arith.constant 0 : index
    %c0_67 = arith.constant 0 : index
    %c0_68 = arith.constant 0 : index
    %113 = vector.load %arg21[%c0_66, %c0_67, %c0_68] : memref<8x1x4xf32, #tpu.memory_space<vmem>>, vector<8x1x4xf32>
    %114 = vector.broadcast %113 : vector<8x1x4xf32> to vector<8x8x4xf32>
    %115 = arith.addf %112, %114 : vector<8x8x4xf32>
    "tpu.trace_start"() <{level = 10 : i32, message = "nqd,nkd->nqk"}> : () -> ()
    %cst_69 = arith.constant dense<0.000000e+00> : vector<8x8x8xf32>
    %116 = tpu.matmul %99, %107, %cst_69 {dimension_numbers = #tpu.dot_dimension_numbers<[2], [2], [1], [1], [0, 0, 0, 1, 1, 1], [0], [0]>} : vector<8x8x4xf32>, vector<8x8x4xf32>, vector<8x8x8xf32> -> vector<8x8x8xf32>
    "tpu.trace_stop"() : () -> ()
    %cst_70 = arith.constant 5.000000e-01 : f32
    %117 = vector.broadcast %cst_70 : f32 to vector<8x8x8xf32>
    %118 = arith.mulf %116, %117 : vector<8x8x8xf32>
    %cst_71 = arith.constant dense<0xFF800000> : vector<8x8xf32>
    %119 = vector.multi_reduction <maximumf>, %118, %cst_71 [2] : vector<8x8x8xf32> to vector<8x8xf32>
    %120 = vector.shape_cast %119 : vector<8x8xf32> to vector<8x8x1xf32>
    %121 = vector.broadcast %120 : vector<8x8x1xf32> to vector<8x8x8xf32>
    %122 = arith.subf %118, %121 : vector<8x8x8xf32>
    %123 = math.exp %122 : vector<8x8x8xf32>
    %cst_72 = arith.constant dense<0.000000e+00> : vector<8x8xf32>
    %124 = vector.multi_reduction <add>, %123, %cst_72 [2] : vector<8x8x8xf32> to vector<8x8xf32>
    %125 = vector.shape_cast %124 : vector<8x8xf32> to vector<8x8x1xf32>
    %126 = tpu.reciprocal %125 {approx = true} : vector<8x8x1xf32> -> vector<8x8x1xf32>
    %127 = vector.broadcast %126 : vector<8x8x1xf32> to vector<8x8x8xf32>
    %128 = arith.mulf %123, %127 : vector<8x8x8xf32>
    "tpu.trace_start"() <{level = 10 : i32, message = "nqk,nkd->nqd"}> : () -> ()
    %cst_73 = arith.constant dense<0.000000e+00> : vector<8x8x4xf32>
    %129 = tpu.matmul %128, %115, %cst_73 {dimension_numbers = #tpu.dot_dimension_numbers<[2], [1], [1], [2], [0, 0, 0, 1, 1, 2], [0], [0]>} : vector<8x8x8xf32>, vector<8x8x4xf32>, vector<8x8x4xf32> -> vector<8x8x4xf32>
    "tpu.trace_stop"() : () -> ()
    %c0_74 = arith.constant 0 : index
    %c0_75 = arith.constant 0 : index
    %c0_76 = arith.constant 0 : index
    %130 = vector.load %arg22[%c0_74, %c0_75, %c0_76] : memref<8x4x32xbf16, #tpu.memory_space<vmem>>, vector<8x4x32xbf16>
    %131 = arith.truncf %129 : vector<8x8x4xf32> to vector<8x8x4xbf16>
    "tpu.trace_start"() <{level = 10 : i32, message = "nqd,nde->nqe"}> : () -> ()
    %cst_77 = arith.constant dense<0.000000e+00> : vector<8x8x32xf32>
    %132 = tpu.matmul %131, %130, %cst_77 {dimension_numbers = #tpu.dot_dimension_numbers<[2], [1], [1], [2], [0, 0, 0, 1, 1, 2], [0], [0]>} : vector<8x8x4xbf16>, vector<8x4x32xbf16>, vector<8x8x32xf32> -> vector<8x8x32xf32>
    "tpu.trace_stop"() : () -> ()
    %cst_78 = arith.constant dense<0.000000e+00> : vector<8x32xf32>
    %133 = vector.multi_reduction <add>, %132, %cst_78 [0] : vector<8x8x32xf32> to vector<8x32xf32>
    %134 = arith.addf %83, %133 : vector<8x32xf32>
    %c0_79 = arith.constant 0 : index
    %c0_80 = arith.constant 0 : index
    %135 = vector.load %arg23[%c0_79, %c0_80] : memref<1x32xf32, #tpu.memory_space<vmem>>, vector<1x32xf32>
    %136 = vector.broadcast %135 : vector<1x32xf32> to vector<8x32xf32>
    %137 = arith.addf %134, %136 : vector<8x32xf32>
    %c0_81 = arith.constant 0 : index
    %c0_82 = arith.constant 0 : index
    %138 = vector.load %arg24[%c0_81, %c0_82] : memref<32x128xbf16, #tpu.memory_space<vmem>>, vector<32x128xbf16>
    %139 = arith.truncf %137 : vector<8x32xf32> to vector<8x32xbf16>
    %cst_83 = arith.constant dense<0.000000e+00> : vector<8x128xf32>
    %140 = tpu.matmul %139, %138, %cst_83 {dimension_numbers = #tpu.dot_dimension_numbers<[1], [0], [0], [1], [0, 0, 1, 1], [], []>} : vector<8x32xbf16>, vector<32x128xbf16>, vector<8x128xf32> -> vector<8x128xf32>
    %c0_84 = arith.constant 0 : index
    %c0_85 = arith.constant 0 : index
    %141 = vector.load %arg25[%c0_84, %c0_85] : memref<1x128xf32, #tpu.memory_space<vmem>>, vector<1x128xf32>
    %142 = vector.broadcast %141 : vector<1x128xf32> to vector<8x128xf32>
    %143 = arith.addf %140, %142 : vector<8x128xf32>
    %c0_86 = arith.constant 0 : index
    %c0_87 = arith.constant 0 : index
    %c0_88 = arith.constant 0 : index
    %144 = vector.load %arg32[%c0_86, %c0_87, %c0_88] : memref<1x8x128xf32, #tpu.memory_space<vmem>>, vector<1x8x128xf32>
    %145 = vector.shape_cast %144 : vector<1x8x128xf32> to vector<8x128xf32>
    %146 = vector.shape_cast %143 : vector<8x128xf32> to vector<1x8x128xf32>
    tpu.vector_store %arg32[%c0_86, %c0_87, %c0_88], %146 {strides = array<i32>} : memref<1x8x128xf32, #tpu.memory_space<vmem>>, vector<1x8x128xf32>,
    %c0_89 = arith.constant 0 : index
    %c0_90 = arith.constant 0 : index
    %147 = vector.load %arg26[%c0_89, %c0_90] : memref<32x96xbf16, #tpu.memory_space<vmem>>, vector<32x96xbf16>
    %148 = arith.truncf %137 : vector<8x32xf32> to vector<8x32xbf16>
    %cst_91 = arith.constant dense<0.000000e+00> : vector<8x96xf32>
    %149 = tpu.matmul %148, %147, %cst_91 {dimension_numbers = #tpu.dot_dimension_numbers<[1], [0], [0], [1], [0, 0, 1, 1], [], []>} : vector<8x32xbf16>, vector<32x96xbf16>, vector<8x96xf32> -> vector<8x96xf32>
    %c0_92 = arith.constant 0 : index
    %c0_93 = arith.constant 0 : index
    %150 = vector.load %arg27[%c0_92, %c0_93] : memref<1x96xf32, #tpu.memory_space<vmem>>, vector<1x96xf32>
    %151 = vector.broadcast %150 : vector<1x96xf32> to vector<8x96xf32>
    %152 = arith.addf %149, %151 : vector<8x96xf32>
    %c0_94 = arith.constant 0 : index
    %c0_95 = arith.constant 0 : index
    %153 = vector.load %arg28[%c0_94, %c0_95] : memref<32x96xbf16, #tpu.memory_space<vmem>>, vector<32x96xbf16>
    %c0_96 = arith.constant 0 : index
    %c0_97 = arith.constant 0 : index
    %154 = vector.load %arg29[%c0_96, %c0_97] : memref<1x96xf32, #tpu.memory_space<vmem>>, vector<1x96xf32>
    %c0_98 = arith.constant 0 : index
    %c0_99 = arith.constant 0 : index
    %c0_100 = arith.constant 0 : index
    %155 = vector.load %arg3[%c0_98, %c0_99, %c0_100] : memref<1x1x32xf32, #tpu.memory_space<vmem>>, vector<1x1x32xf32>
    %156 = vector.shape_cast %155 : vector<1x1x32xf32> to vector<1x32xf32>
    %157 = arith.truncf %156 : vector<1x32xf32> to vector<1x32xbf16>
    %cst_101 = arith.constant dense<0.000000e+00> : vector<1x96xf32>
    %158 = tpu.matmul %157, %153, %cst_101 {dimension_numbers = #tpu.dot_dimension_numbers<[1], [0], [0], [1], [0, 0, 1, 1], [], []>} : vector<1x32xbf16>, vector<32x96xbf16>, vector<1x96xf32> -> vector<1x96xf32>
    %159 = arith.addf %158, %154 : vector<1x96xf32>
    %160 = vector.extract_strided_slice %152 {offsets = [0, 0], sizes = [1, 96], strides = [1, 1]} : vector<8x96xf32> to vector<1x96xf32>
    %161 = vector.extract_strided_slice %160 {offsets = [0, 0], sizes = [1, 32], strides = [1, 1]} : vector<1x96xf32> to vector<1x32xf32>
    %162 = vector.extract_strided_slice %159 {offsets = [0, 0], sizes = [1, 32], strides = [1, 1]} : vector<1x96xf32> to vector<1x32xf32>
    %163 = arith.addf %161, %162 : vector<1x32xf32>
    %164 = arith.negf %163 : vector<1x32xf32>
    %165 = math.exp %164 : vector<1x32xf32>
    %cst_102 = arith.constant 1.000000e+00 : f32
    %166 = vector.broadcast %cst_102 : f32 to vector<1x32xf32>
    %167 = arith.addf %166, %165 : vector<1x32xf32>
    %168 = arith.divf %166, %167 : vector<1x32xf32>
    %169 = vector.extract_strided_slice %160 {offsets = [0, 32], sizes = [1, 32], strides = [1, 1]} : vector<1x96xf32> to vector<1x32xf32>
    %170 = vector.extract_strided_slice %159 {offsets = [0, 32], sizes = [1, 32], strides = [1, 1]} : vector<1x96xf32> to vector<1x32xf32>
    %171 = arith.addf %169, %170 : vector<1x32xf32>
    %172 = arith.negf %171 : vector<1x32xf32>
    %173 = math.exp %172 : vector<1x32xf32>
    %cst_103 = arith.constant 1.000000e+00 : f32
    %174 = vector.broadcast %cst_103 : f32 to vector<1x32xf32>
    %175 = arith.addf %174, %173 : vector<1x32xf32>
    %176 = arith.divf %174, %175 : vector<1x32xf32>
    %177 = vector.extract_strided_slice %160 {offsets = [0, 64], sizes = [1, 32], strides = [1, 1]} : vector<1x96xf32> to vector<1x32xf32>
    %178 = vector.extract_strided_slice %159 {offsets = [0, 64], sizes = [1, 32], strides = [1, 1]} : vector<1x96xf32> to vector<1x32xf32>
    %179 = arith.mulf %168, %178 : vector<1x32xf32>
    %180 = arith.addf %177, %179 : vector<1x32xf32>
    %181 = math.tanh %180 : vector<1x32xf32>
    %cst_104 = arith.constant 1.000000e+00 : f32
    %182 = vector.broadcast %cst_104 : f32 to vector<1x32xf32>
    %183 = arith.subf %182, %176 : vector<1x32xf32>
    %184 = arith.mulf %183, %181 : vector<1x32xf32>
    %185 = arith.mulf %176, %156 : vector<1x32xf32>
    %186 = arith.addf %184, %185 : vector<1x32xf32>
    %187 = arith.truncf %186 : vector<1x32xf32> to vector<1x32xbf16>
    %cst_105 = arith.constant dense<0.000000e+00> : vector<1x96xf32>
    %188 = tpu.matmul %187, %153, %cst_105 {dimension_numbers = #tpu.dot_dimension_numbers<[1], [0], [0], [1], [0, 0, 1, 1], [], []>} : vector<1x32xbf16>, vector<32x96xbf16>, vector<1x96xf32> -> vector<1x96xf32>
    %189 = arith.addf %188, %154 : vector<1x96xf32>
    %190 = vector.extract_strided_slice %152 {offsets = [1, 0], sizes = [1, 96], strides = [1, 1]} : vector<8x96xf32> to vector<1x96xf32>
    %191 = vector.extract_strided_slice %190 {offsets = [0, 0], sizes = [1, 32], strides = [1, 1]} : vector<1x96xf32> to vector<1x32xf32>
    %192 = vector.extract_strided_slice %189 {offsets = [0, 0], sizes = [1, 32], strides = [1, 1]} : vector<1x96xf32> to vector<1x32xf32>
    %193 = arith.addf %191, %192 : vector<1x32xf32>
    %194 = arith.negf %193 : vector<1x32xf32>
    %195 = math.exp %194 : vector<1x32xf32>
    %cst_106 = arith.constant 1.000000e+00 : f32
    %196 = vector.broadcast %cst_106 : f32 to vector<1x32xf32>
    %197 = arith.addf %196, %195 : vector<1x32xf32>
    %198 = arith.divf %196, %197 : vector<1x32xf32>
    %199 = vector.extract_strided_slice %190 {offsets = [0, 32], sizes = [1, 32], strides = [1, 1]} : vector<1x96xf32> to vector<1x32xf32>
    %200 = vector.extract_strided_slice %189 {offsets = [0, 32], sizes = [1, 32], strides = [1, 1]} : vector<1x96xf32> to vector<1x32xf32>
    %201 = arith.addf %199, %200 : vector<1x32xf32>
    %202 = arith.negf %201 : vector<1x32xf32>
    %203 = math.exp %202 : vector<1x32xf32>
    %cst_107 = arith.constant 1.000000e+00 : f32
    %204 = vector.broadcast %cst_107 : f32 to vector<1x32xf32>
    %205 = arith.addf %204, %203 : vector<1x32xf32>
    %206 = arith.divf %204, %205 : vector<1x32xf32>
    %207 = vector.extract_strided_slice %190 {offsets = [0, 64], sizes = [1, 32], strides = [1, 1]} : vector<1x96xf32> to vector<1x32xf32>
    %208 = vector.extract_strided_slice %189 {offsets = [0, 64], sizes = [1, 32], strides = [1, 1]} : vector<1x96xf32> to vector<1x32xf32>
    %209 = arith.mulf %198, %208 : vector<1x32xf32>
    %210 = arith.addf %207, %209 : vector<1x32xf32>
    %211 = math.tanh %210 : vector<1x32xf32>
    %cst_108 = arith.constant 1.000000e+00 : f32
    %212 = vector.broadcast %cst_108 : f32 to vector<1x32xf32>
    %213 = arith.subf %212, %206 : vector<1x32xf32>
    %214 = arith.mulf %213, %211 : vector<1x32xf32>
    %215 = arith.mulf %206, %186 : vector<1x32xf32>
    %216 = arith.addf %214, %215 : vector<1x32xf32>
    %217 = arith.truncf %216 : vector<1x32xf32> to vector<1x32xbf16>
    %cst_109 = arith.constant dense<0.000000e+00> : vector<1x96xf32>
    %218 = tpu.matmul %217, %153, %cst_109 {dimension_numbers = #tpu.dot_dimension_numbers<[1], [0], [0], [1], [0, 0, 1, 1], [], []>} : vector<1x32xbf16>, vector<32x96xbf16>, vector<1x96xf32> -> vector<1x96xf32>
    %219 = arith.addf %218, %154 : vector<1x96xf32>
    %220 = vector.extract_strided_slice %152 {offsets = [2, 0], sizes = [1, 96], strides = [1, 1]} : vector<8x96xf32> to vector<1x96xf32>
    %221 = vector.extract_strided_slice %220 {offsets = [0, 0], sizes = [1, 32], strides = [1, 1]} : vector<1x96xf32> to vector<1x32xf32>
    %222 = vector.extract_strided_slice %219 {offsets = [0, 0], sizes = [1, 32], strides = [1, 1]} : vector<1x96xf32> to vector<1x32xf32>
    %223 = arith.addf %221, %222 : vector<1x32xf32>
    %224 = arith.negf %223 : vector<1x32xf32>
    %225 = math.exp %224 : vector<1x32xf32>
    %cst_110 = arith.constant 1.000000e+00 : f32
    %226 = vector.broadcast %cst_110 : f32 to vector<1x32xf32>
    %227 = arith.addf %226, %225 : vector<1x32xf32>
    %228 = arith.divf %226, %227 : vector<1x32xf32>
    %229 = vector.extract_strided_slice %220 {offsets = [0, 32], sizes = [1, 32], strides = [1, 1]} : vector<1x96xf32> to vector<1x32xf32>
    %230 = vector.extract_strided_slice %219 {offsets = [0, 32], sizes = [1, 32], strides = [1, 1]} : vector<1x96xf32> to vector<1x32xf32>
    %231 = arith.addf %229, %230 : vector<1x32xf32>
    %232 = arith.negf %231 : vector<1x32xf32>
    %233 = math.exp %232 : vector<1x32xf32>
    %cst_111 = arith.constant 1.000000e+00 : f32
    %234 = vector.broadcast %cst_111 : f32 to vector<1x32xf32>
    %235 = arith.addf %234, %233 : vector<1x32xf32>
    %236 = arith.divf %234, %235 : vector<1x32xf32>
    %237 = vector.extract_strided_slice %220 {offsets = [0, 64], sizes = [1, 32], strides = [1, 1]} : vector<1x96xf32> to vector<1x32xf32>
    %238 = vector.extract_strided_slice %219 {offsets = [0, 64], sizes = [1, 32], strides = [1, 1]} : vector<1x96xf32> to vector<1x32xf32>
    %239 = arith.mulf %228, %238 : vector<1x32xf32>
    %240 = arith.addf %237, %239 : vector<1x32xf32>
    %241 = math.tanh %240 : vector<1x32xf32>
    %cst_112 = arith.constant 1.000000e+00 : f32
    %242 = vector.broadcast %cst_112 : f32 to vector<1x32xf32>
    %243 = arith.subf %242, %236 : vector<1x32xf32>
    %244 = arith.mulf %243, %241 : vector<1x32xf32>
    %245 = arith.mulf %236, %216 : vector<1x32xf32>
    %246 = arith.addf %244, %245 : vector<1x32xf32>
    %247 = arith.truncf %246 : vector<1x32xf32> to vector<1x32xbf16>
    %cst_113 = arith.constant dense<0.000000e+00> : vector<1x96xf32>
    %248 = tpu.matmul %247, %153, %cst_113 {dimension_numbers = #tpu.dot_dimension_numbers<[1], [0], [0], [1], [0, 0, 1, 1], [], []>} : vector<1x32xbf16>, vector<32x96xbf16>, vector<1x96xf32> -> vector<1x96xf32>
    %249 = arith.addf %248, %154 : vector<1x96xf32>
    %250 = vector.extract_strided_slice %152 {offsets = [3, 0], sizes = [1, 96], strides = [1, 1]} : vector<8x96xf32> to vector<1x96xf32>
    %251 = vector.extract_strided_slice %250 {offsets = [0, 0], sizes = [1, 32], strides = [1, 1]} : vector<1x96xf32> to vector<1x32xf32>
    %252 = vector.extract_strided_slice %249 {offsets = [0, 0], sizes = [1, 32], strides = [1, 1]} : vector<1x96xf32> to vector<1x32xf32>
    %253 = arith.addf %251, %252 : vector<1x32xf32>
    %254 = arith.negf %253 : vector<1x32xf32>
    %255 = math.exp %254 : vector<1x32xf32>
    %cst_114 = arith.constant 1.000000e+00 : f32
    %256 = vector.broadcast %cst_114 : f32 to vector<1x32xf32>
    %257 = arith.addf %256, %255 : vector<1x32xf32>
    %258 = arith.divf %256, %257 : vector<1x32xf32>
    %259 = vector.extract_strided_slice %250 {offsets = [0, 32], sizes = [1, 32], strides = [1, 1]} : vector<1x96xf32> to vector<1x32xf32>
    %260 = vector.extract_strided_slice %249 {offsets = [0, 32], sizes = [1, 32], strides = [1, 1]} : vector<1x96xf32> to vector<1x32xf32>
    %261 = arith.addf %259, %260 : vector<1x32xf32>
    %262 = arith.negf %261 : vector<1x32xf32>
    %263 = math.exp %262 : vector<1x32xf32>
    %cst_115 = arith.constant 1.000000e+00 : f32
    %264 = vector.broadcast %cst_115 : f32 to vector<1x32xf32>
    %265 = arith.addf %264, %263 : vector<1x32xf32>
    %266 = arith.divf %264, %265 : vector<1x32xf32>
    %267 = vector.extract_strided_slice %250 {offsets = [0, 64], sizes = [1, 32], strides = [1, 1]} : vector<1x96xf32> to vector<1x32xf32>
    %268 = vector.extract_strided_slice %249 {offsets = [0, 64], sizes = [1, 32], strides = [1, 1]} : vector<1x96xf32> to vector<1x32xf32>
    %269 = arith.mulf %258, %268 : vector<1x32xf32>
    %270 = arith.addf %267, %269 : vector<1x32xf32>
    %271 = math.tanh %270 : vector<1x32xf32>
    %cst_116 = arith.constant 1.000000e+00 : f32
    %272 = vector.broadcast %cst_116 : f32 to vector<1x32xf32>
    %273 = arith.subf %272, %266 : vector<1x32xf32>
    %274 = arith.mulf %273, %271 : vector<1x32xf32>
    %275 = arith.mulf %266, %246 : vector<1x32xf32>
    %276 = arith.addf %274, %275 : vector<1x32xf32>
    %277 = arith.truncf %276 : vector<1x32xf32> to vector<1x32xbf16>
    %cst_117 = arith.constant dense<0.000000e+00> : vector<1x96xf32>
    %278 = tpu.matmul %277, %153, %cst_117 {dimension_numbers = #tpu.dot_dimension_numbers<[1], [0], [0], [1], [0, 0, 1, 1], [], []>} : vector<1x32xbf16>, vector<32x96xbf16>, vector<1x96xf32> -> vector<1x96xf32>
    %279 = arith.addf %278, %154 : vector<1x96xf32>
    %280 = vector.extract_strided_slice %152 {offsets = [4, 0], sizes = [1, 96], strides = [1, 1]} : vector<8x96xf32> to vector<1x96xf32>
    %281 = vector.extract_strided_slice %280 {offsets = [0, 0], sizes = [1, 32], strides = [1, 1]} : vector<1x96xf32> to vector<1x32xf32>
    %282 = vector.extract_strided_slice %279 {offsets = [0, 0], sizes = [1, 32], strides = [1, 1]} : vector<1x96xf32> to vector<1x32xf32>
    %283 = arith.addf %281, %282 : vector<1x32xf32>
    %284 = arith.negf %283 : vector<1x32xf32>
    %285 = math.exp %284 : vector<1x32xf32>
    %cst_118 = arith.constant 1.000000e+00 : f32
    %286 = vector.broadcast %cst_118 : f32 to vector<1x32xf32>
    %287 = arith.addf %286, %285 : vector<1x32xf32>
    %288 = arith.divf %286, %287 : vector<1x32xf32>
    %289 = vector.extract_strided_slice %280 {offsets = [0, 32], sizes = [1, 32], strides = [1, 1]} : vector<1x96xf32> to vector<1x32xf32>
    %290 = vector.extract_strided_slice %279 {offsets = [0, 32], sizes = [1, 32], strides = [1, 1]} : vector<1x96xf32> to vector<1x32xf32>
    %291 = arith.addf %289, %290 : vector<1x32xf32>
    %292 = arith.negf %291 : vector<1x32xf32>
    %293 = math.exp %292 : vector<1x32xf32>
    %cst_119 = arith.constant 1.000000e+00 : f32
    %294 = vector.broadcast %cst_119 : f32 to vector<1x32xf32>
    %295 = arith.addf %294, %293 : vector<1x32xf32>
    %296 = arith.divf %294, %295 : vector<1x32xf32>
    %297 = vector.extract_strided_slice %280 {offsets = [0, 64], sizes = [1, 32], strides = [1, 1]} : vector<1x96xf32> to vector<1x32xf32>
    %298 = vector.extract_strided_slice %279 {offsets = [0, 64], sizes = [1, 32], strides = [1, 1]} : vector<1x96xf32> to vector<1x32xf32>
    %299 = arith.mulf %288, %298 : vector<1x32xf32>
    %300 = arith.addf %297, %299 : vector<1x32xf32>
    %301 = math.tanh %300 : vector<1x32xf32>
    %cst_120 = arith.constant 1.000000e+00 : f32
    %302 = vector.broadcast %cst_120 : f32 to vector<1x32xf32>
    %303 = arith.subf %302, %296 : vector<1x32xf32>
    %304 = arith.mulf %303, %301 : vector<1x32xf32>
    %305 = arith.mulf %296, %276 : vector<1x32xf32>
    %306 = arith.addf %304, %305 : vector<1x32xf32>
    %307 = arith.truncf %306 : vector<1x32xf32> to vector<1x32xbf16>
    %cst_121 = arith.constant dense<0.000000e+00> : vector<1x96xf32>
    %308 = tpu.matmul %307, %153, %cst_121 {dimension_numbers = #tpu.dot_dimension_numbers<[1], [0], [0], [1], [0, 0, 1, 1], [], []>} : vector<1x32xbf16>, vector<32x96xbf16>, vector<1x96xf32> -> vector<1x96xf32>
    %309 = arith.addf %308, %154 : vector<1x96xf32>
    %310 = vector.extract_strided_slice %152 {offsets = [5, 0], sizes = [1, 96], strides = [1, 1]} : vector<8x96xf32> to vector<1x96xf32>
    %311 = vector.extract_strided_slice %310 {offsets = [0, 0], sizes = [1, 32], strides = [1, 1]} : vector<1x96xf32> to vector<1x32xf32>
    %312 = vector.extract_strided_slice %309 {offsets = [0, 0], sizes = [1, 32], strides = [1, 1]} : vector<1x96xf32> to vector<1x32xf32>
    %313 = arith.addf %311, %312 : vector<1x32xf32>
    %314 = arith.negf %313 : vector<1x32xf32>
    %315 = math.exp %314 : vector<1x32xf32>
    %cst_122 = arith.constant 1.000000e+00 : f32
    %316 = vector.broadcast %cst_122 : f32 to vector<1x32xf32>
    %317 = arith.addf %316, %315 : vector<1x32xf32>
    %318 = arith.divf %316, %317 : vector<1x32xf32>
    %319 = vector.extract_strided_slice %310 {offsets = [0, 32], sizes = [1, 32], strides = [1, 1]} : vector<1x96xf32> to vector<1x32xf32>
    %320 = vector.extract_strided_slice %309 {offsets = [0, 32], sizes = [1, 32], strides = [1, 1]} : vector<1x96xf32> to vector<1x32xf32>
    %321 = arith.addf %319, %320 : vector<1x32xf32>
    %322 = arith.negf %321 : vector<1x32xf32>
    %323 = math.exp %322 : vector<1x32xf32>
    %cst_123 = arith.constant 1.000000e+00 : f32
    %324 = vector.broadcast %cst_123 : f32 to vector<1x32xf32>
    %325 = arith.addf %324, %323 : vector<1x32xf32>
    %326 = arith.divf %324, %325 : vector<1x32xf32>
    %327 = vector.extract_strided_slice %310 {offsets = [0, 64], sizes = [1, 32], strides = [1, 1]} : vector<1x96xf32> to vector<1x32xf32>
    %328 = vector.extract_strided_slice %309 {offsets = [0, 64], sizes = [1, 32], strides = [1, 1]} : vector<1x96xf32> to vector<1x32xf32>
    %329 = arith.mulf %318, %328 : vector<1x32xf32>
    %330 = arith.addf %327, %329 : vector<1x32xf32>
    %331 = math.tanh %330 : vector<1x32xf32>
    %cst_124 = arith.constant 1.000000e+00 : f32
    %332 = vector.broadcast %cst_124 : f32 to vector<1x32xf32>
    %333 = arith.subf %332, %326 : vector<1x32xf32>
    %334 = arith.mulf %333, %331 : vector<1x32xf32>
    %335 = arith.mulf %326, %306 : vector<1x32xf32>
    %336 = arith.addf %334, %335 : vector<1x32xf32>
    %337 = arith.truncf %336 : vector<1x32xf32> to vector<1x32xbf16>
    %cst_125 = arith.constant dense<0.000000e+00> : vector<1x96xf32>
    %338 = tpu.matmul %337, %153, %cst_125 {dimension_numbers = #tpu.dot_dimension_numbers<[1], [0], [0], [1], [0, 0, 1, 1], [], []>} : vector<1x32xbf16>, vector<32x96xbf16>, vector<1x96xf32> -> vector<1x96xf32>
    %339 = arith.addf %338, %154 : vector<1x96xf32>
    %340 = vector.extract_strided_slice %152 {offsets = [6, 0], sizes = [1, 96], strides = [1, 1]} : vector<8x96xf32> to vector<1x96xf32>
    %341 = vector.extract_strided_slice %340 {offsets = [0, 0], sizes = [1, 32], strides = [1, 1]} : vector<1x96xf32> to vector<1x32xf32>
    %342 = vector.extract_strided_slice %339 {offsets = [0, 0], sizes = [1, 32], strides = [1, 1]} : vector<1x96xf32> to vector<1x32xf32>
    %343 = arith.addf %341, %342 : vector<1x32xf32>
    %344 = arith.negf %343 : vector<1x32xf32>
    %345 = math.exp %344 : vector<1x32xf32>
    %cst_126 = arith.constant 1.000000e+00 : f32
    %346 = vector.broadcast %cst_126 : f32 to vector<1x32xf32>
    %347 = arith.addf %346, %345 : vector<1x32xf32>
    %348 = arith.divf %346, %347 : vector<1x32xf32>
    %349 = vector.extract_strided_slice %340 {offsets = [0, 32], sizes = [1, 32], strides = [1, 1]} : vector<1x96xf32> to vector<1x32xf32>
    %350 = vector.extract_strided_slice %339 {offsets = [0, 32], sizes = [1, 32], strides = [1, 1]} : vector<1x96xf32> to vector<1x32xf32>
    %351 = arith.addf %349, %350 : vector<1x32xf32>
    %352 = arith.negf %351 : vector<1x32xf32>
    %353 = math.exp %352 : vector<1x32xf32>
    %cst_127 = arith.constant 1.000000e+00 : f32
    %354 = vector.broadcast %cst_127 : f32 to vector<1x32xf32>
    %355 = arith.addf %354, %353 : vector<1x32xf32>
    %356 = arith.divf %354, %355 : vector<1x32xf32>
    %357 = vector.extract_strided_slice %340 {offsets = [0, 64], sizes = [1, 32], strides = [1, 1]} : vector<1x96xf32> to vector<1x32xf32>
    %358 = vector.extract_strided_slice %339 {offsets = [0, 64], sizes = [1, 32], strides = [1, 1]} : vector<1x96xf32> to vector<1x32xf32>
    %359 = arith.mulf %348, %358 : vector<1x32xf32>
    %360 = arith.addf %357, %359 : vector<1x32xf32>
    %361 = math.tanh %360 : vector<1x32xf32>
    %cst_128 = arith.constant 1.000000e+00 : f32
    %362 = vector.broadcast %cst_128 : f32 to vector<1x32xf32>
    %363 = arith.subf %362, %356 : vector<1x32xf32>
    %364 = arith.mulf %363, %361 : vector<1x32xf32>
    %365 = arith.mulf %356, %336 : vector<1x32xf32>
    %366 = arith.addf %364, %365 : vector<1x32xf32>
    %367 = arith.truncf %366 : vector<1x32xf32> to vector<1x32xbf16>
    %cst_129 = arith.constant dense<0.000000e+00> : vector<1x96xf32>
    %368 = tpu.matmul %367, %153, %cst_129 {dimension_numbers = #tpu.dot_dimension_numbers<[1], [0], [0], [1], [0, 0, 1, 1], [], []>} : vector<1x32xbf16>, vector<32x96xbf16>, vector<1x96xf32> -> vector<1x96xf32>
    %369 = arith.addf %368, %154 : vector<1x96xf32>
    %370 = vector.extract_strided_slice %152 {offsets = [7, 0], sizes = [1, 96], strides = [1, 1]} : vector<8x96xf32> to vector<1x96xf32>
    %371 = vector.extract_strided_slice %370 {offsets = [0, 0], sizes = [1, 32], strides = [1, 1]} : vector<1x96xf32> to vector<1x32xf32>
    %372 = vector.extract_strided_slice %369 {offsets = [0, 0], sizes = [1, 32], strides = [1, 1]} : vector<1x96xf32> to vector<1x32xf32>
    %373 = arith.addf %371, %372 : vector<1x32xf32>
    %374 = arith.negf %373 : vector<1x32xf32>
    %375 = math.exp %374 : vector<1x32xf32>
    %cst_130 = arith.constant 1.000000e+00 : f32
    %376 = vector.broadcast %cst_130 : f32 to vector<1x32xf32>
    %377 = arith.addf %376, %375 : vector<1x32xf32>
    %378 = arith.divf %376, %377 : vector<1x32xf32>
    %379 = vector.extract_strided_slice %370 {offsets = [0, 32], sizes = [1, 32], strides = [1, 1]} : vector<1x96xf32> to vector<1x32xf32>
    %380 = vector.extract_strided_slice %369 {offsets = [0, 32], sizes = [1, 32], strides = [1, 1]} : vector<1x96xf32> to vector<1x32xf32>
    %381 = arith.addf %379, %380 : vector<1x32xf32>
    %382 = arith.negf %381 : vector<1x32xf32>
    %383 = math.exp %382 : vector<1x32xf32>
    %cst_131 = arith.constant 1.000000e+00 : f32
    %384 = vector.broadcast %cst_131 : f32 to vector<1x32xf32>
    %385 = arith.addf %384, %383 : vector<1x32xf32>
    %386 = arith.divf %384, %385 : vector<1x32xf32>
    %387 = vector.extract_strided_slice %370 {offsets = [0, 64], sizes = [1, 32], strides = [1, 1]} : vector<1x96xf32> to vector<1x32xf32>
    %388 = vector.extract_strided_slice %369 {offsets = [0, 64], sizes = [1, 32], strides = [1, 1]} : vector<1x96xf32> to vector<1x32xf32>
    %389 = arith.mulf %378, %388 : vector<1x32xf32>
    %390 = arith.addf %387, %389 : vector<1x32xf32>
    %391 = math.tanh %390 : vector<1x32xf32>
    %cst_132 = arith.constant 1.000000e+00 : f32
    %392 = vector.broadcast %cst_132 : f32 to vector<1x32xf32>
    %393 = arith.subf %392, %386 : vector<1x32xf32>
    %394 = arith.mulf %393, %391 : vector<1x32xf32>
    %395 = arith.mulf %386, %366 : vector<1x32xf32>
    %396 = arith.addf %394, %395 : vector<1x32xf32>
    %397 = tpu.concatenate %186, %216, %246, %276, %306, %336, %366, %396 in 0 : vector<1x32xf32>, vector<1x32xf32>, vector<1x32xf32>, vector<1x32xf32>, vector<1x32xf32>, vector<1x32xf32>, vector<1x32xf32>, vector<1x32xf32> -> vector<8x32xf32>
    %c0_133 = arith.constant 0 : index
    %c0_134 = arith.constant 0 : index
    %c0_135 = arith.constant 0 : index
    %398 = vector.load %arg33[%c0_133, %c0_134, %c0_135] : memref<1x8x32xf32, #tpu.memory_space<vmem>>, vector<1x8x32xf32>
    %399 = vector.shape_cast %398 : vector<1x8x32xf32> to vector<8x32xf32>
    %400 = vector.shape_cast %397 : vector<8x32xf32> to vector<1x8x32xf32>
    tpu.vector_store %arg33[%c0_133, %c0_134, %c0_135], %400 {strides = array<i32>} : memref<1x8x32xf32, #tpu.memory_space<vmem>>, vector<1x8x32xf32>,
    %c0_136 = arith.constant 0 : index
    %c0_137 = arith.constant 0 : index
    %401 = vector.load %arg30[%c0_136, %c0_137] : memref<32x128xbf16, #tpu.memory_space<vmem>>, vector<32x128xbf16>
    %402 = arith.truncf %397 : vector<8x32xf32> to vector<8x32xbf16>
    %cst_138 = arith.constant dense<0.000000e+00> : vector<8x128xf32>
    %403 = tpu.matmul %402, %401, %cst_138 {dimension_numbers = #tpu.dot_dimension_numbers<[1], [0], [0], [1], [0, 0, 1, 1], [], []>} : vector<8x32xbf16>, vector<32x128xbf16>, vector<8x128xf32> -> vector<8x128xf32>
    %c0_139 = arith.constant 0 : index
    %c0_140 = arith.constant 0 : index
    %404 = vector.load %arg31[%c0_139, %c0_140] : memref<1x128xf32, #tpu.memory_space<vmem>>, vector<1x128xf32>
    %405 = vector.broadcast %404 : vector<1x128xf32> to vector<8x128xf32>
    %406 = arith.addf %403, %405 : vector<8x128xf32>
    %c0_141 = arith.constant 0 : index
    %c0_142 = arith.constant 0 : index
    %c0_143 = arith.constant 0 : index
    %407 = vector.load %arg34[%c0_141, %c0_142, %c0_143] : memref<1x8x128xf32, #tpu.memory_space<vmem>>, vector<1x8x128xf32>
    %408 = vector.shape_cast %407 : vector<1x8x128xf32> to vector<8x128xf32>
    %409 = vector.shape_cast %406 : vector<8x128xf32> to vector<1x8x128xf32>
    tpu.vector_store %arg34[%c0_141, %c0_142, %c0_143], %409 {strides = array<i32>} : memref<1x8x128xf32, #tpu.memory_space<vmem>>, vector<1x8x128xf32>,
    return
  }
  func.func @transform_0(%arg0: i32) -> (i32, i32, i32) {
    %c0_i32 = arith.constant 0 : i32
    %c0_i32_0 = arith.constant 0 : i32
    %c0_i32_1 = arith.constant 0 : i32
    return %arg0, %c0_i32, %c0_i32_0 : i32, i32, i32
  }
  func.func @transform_1(%arg0: i32) -> (i32, i32, i32) {
    %c0_i32 = arith.constant 0 : i32
    %c0_i32_0 = arith.constant 0 : i32
    %c0_i32_1 = arith.constant 0 : i32
    return %arg0, %c0_i32, %c0_i32_0 : i32, i32, i32
  }
  func.func @transform_2(%arg0: i32) -> (i32, i32, i32) {
    %c0_i32 = arith.constant 0 : i32
    %c0_i32_0 = arith.constant 0 : i32
    %c0_i32_1 = arith.constant 0 : i32
    return %arg0, %c0_i32, %c0_i32_0 : i32, i32, i32
  }
  func.func @transform_3(%arg0: i32) -> (i32, i32) {
    %c0_i32 = arith.constant 0 : i32
    %c0_i32_0 = arith.constant 0 : i32
    %c0_i32_1 = arith.constant 0 : i32
    return %c0_i32, %c0_i32_0 : i32, i32
  }
  func.func @transform_4(%arg0: i32) -> (i32, i32) {
    %c0_i32 = arith.constant 0 : i32
    %c0_i32_0 = arith.constant 0 : i32
    %c0_i32_1 = arith.constant 0 : i32
    return %c0_i32, %c0_i32_0 : i32, i32
  }
  func.func @transform_5(%arg0: i32) -> (i32, i32) {
    %c0_i32 = arith.constant 0 : i32
    %c0_i32_0 = arith.constant 0 : i32
    %c0_i32_1 = arith.constant 0 : i32
    return %c0_i32, %c0_i32_0 : i32, i32
  }
  func.func @transform_6(%arg0: i32) -> (i32, i32) {
    %c0_i32 = arith.constant 0 : i32
    %c0_i32_0 = arith.constant 0 : i32
    %c0_i32_1 = arith.constant 0 : i32
    return %c0_i32, %c0_i32_0 : i32, i32
  }
  func.func @transform_7(%arg0: i32) -> (i32, i32) {
    %c0_i32 = arith.constant 0 : i32
    %c0_i32_0 = arith.constant 0 : i32
    %c0_i32_1 = arith.constant 0 : i32
    return %c0_i32, %c0_i32_0 : i32, i32
  }
  func.func @transform_8(%arg0: i32) -> (i32, i32) {
    %c0_i32 = arith.constant 0 : i32
    %c0_i32_0 = arith.constant 0 : i32
    %c0_i32_1 = arith.constant 0 : i32
    return %c0_i32, %c0_i32_0 : i32, i32
  }
  func.func @transform_9(%arg0: i32) -> (i32, i32) {
    %c0_i32 = arith.constant 0 : i32
    %c0_i32_0 = arith.constant 0 : i32
    %c0_i32_1 = arith.constant 0 : i32
    return %c0_i32, %c0_i32_0 : i32, i32
  }
  func.func @transform_10(%arg0: i32) -> (i32, i32) {
    %c0_i32 = arith.constant 0 : i32
    %c0_i32_0 = arith.constant 0 : i32
    %c0_i32_1 = arith.constant 0 : i32
    return %c0_i32, %c0_i32_0 : i32, i32
  }
  func.func @transform_11(%arg0: i32) -> (i32, i32) {
    %c0_i32 = arith.constant 0 : i32
    %c0_i32_0 = arith.constant 0 : i32
    %c0_i32_1 = arith.constant 0 : i32
    return %c0_i32, %c0_i32_0 : i32, i32
  }
  func.func @transform_12(%arg0: i32) -> (i32, i32) {
    %c0_i32 = arith.constant 0 : i32
    %c0_i32_0 = arith.constant 0 : i32
    %c0_i32_1 = arith.constant 0 : i32
    return %c0_i32, %c0_i32_0 : i32, i32
  }
  func.func @transform_13(%arg0: i32) -> (i32, i32) {
    %c0_i32 = arith.constant 0 : i32
    %c0_i32_0 = arith.constant 0 : i32
    %c0_i32_1 = arith.constant 0 : i32
    return %c0_i32, %c0_i32_0 : i32, i32
  }
  func.func @transform_14(%arg0: i32) -> (i32, i32) {
    %c0_i32 = arith.constant 0 : i32
    %c0_i32_0 = arith.constant 0 : i32
    %c0_i32_1 = arith.constant 0 : i32
    return %c0_i32, %c0_i32_0 : i32, i32
  }
  func.func @transform_15(%arg0: i32) -> (i32, i32, i32) {
    %c0_i32 = arith.constant 0 : i32
    %c0_i32_0 = arith.constant 0 : i32
    %c0_i32_1 = arith.constant 0 : i32
    %c0_i32_2 = arith.constant 0 : i32
    return %c0_i32, %c0_i32_0, %c0_i32_1 : i32, i32, i32
  }
  func.func @transform_16(%arg0: i32) -> (i32, i32, i32) {
    %c0_i32 = arith.constant 0 : i32
    %c0_i32_0 = arith.constant 0 : i32
    %c0_i32_1 = arith.constant 0 : i32
    %c0_i32_2 = arith.constant 0 : i32
    return %c0_i32, %c0_i32_0, %c0_i32_1 : i32, i32, i32
  }
  func.func @transform_17(%arg0: i32) -> (i32, i32, i32) {
    %c0_i32 = arith.constant 0 : i32
    %c0_i32_0 = arith.constant 0 : i32
    %c0_i32_1 = arith.constant 0 : i32
    %c0_i32_2 = arith.constant 0 : i32
    return %c0_i32, %c0_i32_0, %c0_i32_1 : i32, i32, i32
  }
  func.func @transform_18(%arg0: i32) -> (i32, i32, i32) {
    %c0_i32 = arith.constant 0 : i32
    %c0_i32_0 = arith.constant 0 : i32
    %c0_i32_1 = arith.constant 0 : i32
    %c0_i32_2 = arith.constant 0 : i32
    return %c0_i32, %c0_i32_0, %c0_i32_1 : i32, i32, i32
  }
  func.func @transform_19(%arg0: i32) -> (i32, i32, i32) {
    %c0_i32 = arith.constant 0 : i32
    %c0_i32_0 = arith.constant 0 : i32
    %c0_i32_1 = arith.constant 0 : i32
    %c0_i32_2 = arith.constant 0 : i32
    return %c0_i32, %c0_i32_0, %c0_i32_1 : i32, i32, i32
  }
  func.func @transform_20(%arg0: i32) -> (i32, i32, i32) {
    %c0_i32 = arith.constant 0 : i32
    %c0_i32_0 = arith.constant 0 : i32
    %c0_i32_1 = arith.constant 0 : i32
    %c0_i32_2 = arith.constant 0 : i32
    return %c0_i32, %c0_i32_0, %c0_i32_1 : i32, i32, i32
  }
  func.func @transform_21(%arg0: i32) -> (i32, i32, i32) {
    %c0_i32 = arith.constant 0 : i32
    %c0_i32_0 = arith.constant 0 : i32
    %c0_i32_1 = arith.constant 0 : i32
    %c0_i32_2 = arith.constant 0 : i32
    return %c0_i32, %c0_i32_0, %c0_i32_1 : i32, i32, i32
  }
  func.func @transform_22(%arg0: i32) -> (i32, i32) {
    %c0_i32 = arith.constant 0 : i32
    %c0_i32_0 = arith.constant 0 : i32
    %c0_i32_1 = arith.constant 0 : i32
    return %c0_i32, %c0_i32_0 : i32, i32
  }
  func.func @transform_23(%arg0: i32) -> (i32, i32) {
    %c0_i32 = arith.constant 0 : i32
    %c0_i32_0 = arith.constant 0 : i32
    %c0_i32_1 = arith.constant 0 : i32
    return %c0_i32, %c0_i32_0 : i32, i32
  }
  func.func @transform_24(%arg0: i32) -> (i32, i32) {
    %c0_i32 = arith.constant 0 : i32
    %c0_i32_0 = arith.constant 0 : i32
    %c0_i32_1 = arith.constant 0 : i32
    return %c0_i32, %c0_i32_0 : i32, i32
  }
  func.func @transform_25(%arg0: i32) -> (i32, i32) {
    %c0_i32 = arith.constant 0 : i32
    %c0_i32_0 = arith.constant 0 : i32
    %c0_i32_1 = arith.constant 0 : i32
    return %c0_i32, %c0_i32_0 : i32, i32
  }
  func.func @transform_26(%arg0: i32) -> (i32, i32) {
    %c0_i32 = arith.constant 0 : i32
    %c0_i32_0 = arith.constant 0 : i32
    %c0_i32_1 = arith.constant 0 : i32
    return %c0_i32, %c0_i32_0 : i32, i32
  }
  func.func @transform_27(%arg0: i32) -> (i32, i32) {
    %c0_i32 = arith.constant 0 : i32
    %c0_i32_0 = arith.constant 0 : i32
    %c0_i32_1 = arith.constant 0 : i32
    return %c0_i32, %c0_i32_0 : i32, i32
  }
  func.func @transform_28(%arg0: i32) -> (i32, i32) {
    %c0_i32 = arith.constant 0 : i32
    %c0_i32_0 = arith.constant 0 : i32
    %c0_i32_1 = arith.constant 0 : i32
    return %c0_i32, %c0_i32_0 : i32, i32
  }
  func.func @transform_29(%arg0: i32) -> (i32, i32) {
    %c0_i32 = arith.constant 0 : i32
    %c0_i32_0 = arith.constant 0 : i32
    %c0_i32_1 = arith.constant 0 : i32
    return %c0_i32, %c0_i32_0 : i32, i32
  }
  func.func @transform_30(%arg0: i32) -> (i32, i32) {
    %c0_i32 = arith.constant 0 : i32
    %c0_i32_0 = arith.constant 0 : i32
    %c0_i32_1 = arith.constant 0 : i32
    return %c0_i32, %c0_i32_0 : i32, i32
  }
  func.func @transform_31(%arg0: i32) -> (i32, i32, i32) {
    %c0_i32 = arith.constant 0 : i32
    %c0_i32_0 = arith.constant 0 : i32
    %c0_i32_1 = arith.constant 0 : i32
    return %arg0, %c0_i32, %c0_i32_0 : i32, i32, i32
  }
  func.func @transform_32(%arg0: i32) -> (i32, i32, i32) {
    %c0_i32 = arith.constant 0 : i32
    %c0_i32_0 = arith.constant 0 : i32
    %c0_i32_1 = arith.constant 0 : i32
    return %arg0, %c0_i32, %c0_i32_0 : i32, i32, i32
  }
  func.func @transform_33(%arg0: i32) -> (i32, i32, i32) {
    %c0_i32 = arith.constant 0 : i32
    %c0_i32_0 = arith.constant 0 : i32
    %c0_i32_1 = arith.constant 0 : i32
    return %arg0, %c0_i32, %c0_i32_0 : i32, i32, i32
  }
}

</mosaic_0001>

<bundles_post_ra>
// kernel: enhanced_phoneme_mapper_forward.1
= control target key start
LH: loop header
LB: loop body
LE: loop exit
PB: predicated region body
PF: predicated region fallthrough
CT: control target
= control target key end

     0   :  { %s6827_s6 = smov 1   ;;  %s6828_s10 = smov 2   ;;  %s7776_s0 = inlined_call_operand.smem [shape: u32[34], index: -1, kind: input, shape index: {}] }
   0x1   :  { %s6875_s5 = sld [smem:[%s7776_s0]]   ;;  %s6829_s14 = smov 3  }
   0x2   :  { %s6880_s9 = sld [smem:[%s7776_s0 + %s6827_s6]]   ;;  %s6830_s18 = smov 4  }
   0x3   :  { %s6885_s13 = sld [smem:[%s7776_s0 + %s6828_s10]]   ;;  %s6831_s22 = smov 5  }
   0x4   :  { %s6890_s17 = sld [smem:[%s7776_s0 + %s6829_s14]]   ;;  %s6832_s26 = smov 6  }
   0x5   :  { %s6895_s21 = sld [smem:[%s7776_s0 + %s6830_s18]]   ;;  %s6833_s30 = smov 7  }
   0x6   :  { %s6900_s25 = sld [smem:[%s7776_s0 + %s6831_s22]]   ;;  %s6834_s4 = smov 8  }
   0x7   :  { %7800 = sst [smem:[#allocation8_spill]] %s6875_s5  ;;  %s6835_s10 = smov 9  }
   0x8   :  { %7801 = sst [smem:[#allocation9_spill]] %s6880_s9  ;;  %s6836_s15 = smov 10  }
   0x9   :  { %7802 = sst [smem:[#allocation10_spill]] %s6885_s13  ;;  %s6837_s20 = smov 11  }
   0xa   :  { %7803 = sst [smem:[#allocation11_spill]] %s6890_s17  ;;  %s6839_s1 = smov 13  }
   0xb   :  { %s6905_s29 = sld [smem:[%s7776_s0 + %s6832_s26]]   ;;  %s6838_s26 = smov 12  }
   0xc   :  { %s6910_s3 = sld [smem:[%s7776_s0 + %s6833_s30]]   ;;  %s6840_s7 = smov 14  }
   0xd   :  { %s6915_s8 = sld [smem:[%s7776_s0 + %s6834_s4]]   ;;  %s6842_s22 = smov 16  }
   0xe   :  { %s6920_s14 = sld [smem:[%s7776_s0 + %s6835_s10]]   ;;  %s6843_s28 = smov 17  }
   0xf   :  { %s6925_s19 = sld [smem:[%s7776_s0 + %s6836_s15]]   ;;  %s6841_s15 = smov 15  }
  0x10   :  { %s6930_s24 = sld [smem:[%s7776_s0 + %s6837_s20]]  }
  0x11   :  { %s6935_s30 = sld [smem:[%s7776_s0 + %s6838_s26]]  }
  0x12   :  { %7804 = sst [smem:[#allocation12_spill]] %s6910_s3 }
  0x13   :  { %7805 = sst [smem:[#allocation13_spill]] %s6915_s8 }
  0x14   :  { %7806 = sst [smem:[#allocation14_spill]] %s6920_s14 }
  0x15   :  { %7807 = sst [smem:[#allocation15_spill]] %s6925_s19 }
  0x16   :  { %s6940_s6 = sld [smem:[%s7776_s0 + %s6839_s1]]  }
  0x17   :  { %s6945_s12 = sld [smem:[%s7776_s0 + %s6840_s7]]   ;;  %s6844_s7 = smov 18  }
  0x18   :  { %s6950_s20 = sld [smem:[%s7776_s0 + %s6841_s15]]   ;;  %s6845_s15 = smov 19  }
  0x19   :  { %s6955_s27 = sld [smem:[%s7776_s0 + %s6842_s22]]   ;;  %s6846_s22 = smov 20  }
  0x1a   :  { %s6960_s4 = sld [smem:[%s7776_s0 + %s6843_s28]]   ;;  %s6847_s28 = smov 21  }
  0x1b   :  { %s6965_s13 = sld [smem:[%s7776_s0 + %s6844_s7]]   ;;  %s6848_s7 = smov 22  }
  0x1c   :  { %7808 = sst [smem:[#allocation16_spill]] %s6940_s6 }
  0x1d   :  { %7809 = sst [smem:[#allocation17_spill]] %s6945_s12 }
  0x1e   :  { %7810 = sst [smem:[#allocation18_spill]] %s6950_s20 }
  0x1f   :  { %7811 = sst [smem:[#allocation19_spill]] %s6955_s27 }
  0x20   :  { %7812 = sst [smem:[#allocation20_spill]] %s6960_s4 }
  0x21   :  { %7813 = sst [smem:[#allocation21_spill]] %s6965_s13 }
  0x22   :  { %s6970_s12 = sld [smem:[%s7776_s0 + %s6845_s15]]   ;;  %s6849_s15 = smov 23  }
  0x23   :  { %s6975_s27 = sld [smem:[%s7776_s0 + %s6846_s22]]   ;;  %s6850_s22 = smov 24  }
  0x24   :  { %s6980_s4 = sld [smem:[%s7776_s0 + %s6847_s28]]   ;;  %s6851_s28 = smov 25  }
  0x25   :  { %s6985_s13 = sld [smem:[%s7776_s0 + %s6848_s7]]   ;;  %s6852_s7 = smov 26  }
  0x28   :  { %7814 = sst [smem:[#allocation22_spill]] %s6970_s12 }
  0x29   :  { %7815 = sst [smem:[#allocation23_spill]] %s6975_s27 }
  0x2a   :  { %7816 = sst [smem:[#allocation24_spill]] %s6980_s4 }
  0x2b   :  { %7817 = sst [smem:[#allocation25_spill]] %s6985_s13 }
  0x2c   :  { %s6990_s12 = sld [smem:[%s7776_s0 + %s6849_s15]]   ;;  %s6853_s15 = smov 27  }
  0x2d   :  { %s6995_s27 = sld [smem:[%s7776_s0 + %s6850_s22]]   ;;  %s6854_s22 = smov 28  }
  0x2e   :  { %s7000_s4 = sld [smem:[%s7776_s0 + %s6851_s28]]   ;;  %s6855_s28 = smov 29  }
  0x2f   :  { %s7005_s13 = sld [smem:[%s7776_s0 + %s6852_s7]]   ;;  %s6856_s7 = smov 30  }
  0x32   :  { %7818 = sst [smem:[#allocation26_spill]] %s6990_s12 }
  0x33   :  { %7819 = sst [smem:[#allocation27_spill]] %s6995_s27 }
  0x34   :  { %7820 = sst [smem:[#allocation28_spill]] %s7000_s4 }
  0x35   :  { %7821 = sst [smem:[#allocation29_spill]] %s7005_s13 }
  0x36   :  { %s7010_s12 = sld [smem:[%s7776_s0 + %s6853_s15]]   ;;  %s6857_s15 = smov 31  }
  0x37   :  { %s7015_s27 = sld [smem:[%s7776_s0 + %s6854_s22]]   ;;  %s6858_s22 = smov 32  }
  0x38   :  { %s7020_s4 = sld [smem:[%s7776_s0 + %s6855_s28]]   ;;  %s6859_s28 = smov 33  }
  0x39   :  { %s7025_s13 = sld [smem:[%s7776_s0 + %s6856_s7]]  }
  0x3c   :  { %7822 = sst [smem:[#allocation30_spill]] %s7010_s12 }
  0x3d   :  { %7823 = sst [smem:[#allocation31_spill]] %s7015_s27 }
  0x3e   :  { %7824 = sst [smem:[#allocation32_spill]] %s7020_s4 }
  0x3f   :  { %s7030_s12 = sld [smem:[%s7776_s0 + %s6857_s15]]  }
  0x40   :  { %s7035_s27 = sld [smem:[%s7776_s0 + %s6858_s22]]  }
  0x41   :  { %s7040_s4 = sld [smem:[%s7776_s0 + %s6859_s28]]  }
  0x42   :  { %73 = vsyncpa [#allocation3], 0 }
  0x43   :  { %75 = vsyncpa [#allocation3 + $0x1], 0 }
  0x44   :  { %76 = vsyncpa [#allocation5], 0 }
  0x45   :  { %78 = vsyncpa [#allocation5 + $0x1], 0  ;;  %s7042_s7 = smov 0   ;;  %s7044_s10 = smov 0  }
  0x46   :  { %s7046_s11 = smov 0   ;;  %s7048_s15 = smov 0  }
  0x47 LB: > { %s7825_s20 = sld [smem:[#allocation18_spill]]  ;;  %s7063_s0 = sadd.s32 4294967295, %s6825_s15   ;;  %s6825_s15 = sphi %s7048_s15, %s7856_s15   ;;  %s6821_s11 = sphi %s7046_s11, %s7855_s11   ;;  %s6817_s10 = sphi %s7044_s10, %s7854_s10   ;;  %s6813_s7 = sphi %s7042_s7, %s7853_s7  }
  0x48   : > { %s7826_s17 = sld [smem:[#allocation11_spill]]  ;;  %s5702_s16 = sadd.s32 4294967294, %s6825_s15  }
  0x49   : > { %s7827_s6 = sld [smem:[#allocation16_spill]]  ;;  %s7067_s18 = sadd.s32 1, %s6825_s15  }
  0x4a   : > { %s7828_s3 = sld [smem:[#allocation12_spill]]  ;;  %s757_s22 = sadd.s32 1, %s6821_s11 }
  0x4b   : > { %s754_s23 = ssub.s32 %s6825_s15, %s7067_s18  ;;  %p767_p0 = scmp.ne.s32.totalorder %s6821_s11, %s6817_s10 }
  0x4c   : > { %p755_p1 = scmp.eq.s32.totalorder %s754_s23, 0  ;;  %p768_p2 = scmp.eq.s32.totalorder %s7063_s0, 1 }
  0x4d   : > { %p773_p3 = scmp.ne.s32.totalorder %s6817_s10, %s6813_s7  ;;  %p774_p4 = scmp.eq.s32.totalorder %s5702_s16, 1 }
  0x4e   : > { %s7078_s26 = scalar_select %p755_p1, %s6821_s11, %s757_s22  }
  0x4f   : > { %p7080_p5 = por %p768_p2, %p767_p0  ;;  %p7084_p6 = por %p774_p4, %p773_p3 }
  0x50   : > { %p5705_p7 = scmp.ge.s32.totalorder %s6825_s15, 1  ;;  %p948_p8 = scmp.lt.s32.totalorder %s6825_s15, 3 }
  0x52   : > { %p949_p9 = pnand %p5705_p7, %p948_p8 }
  0x53   : > { %s7831_s5 = sld [smem:[#allocation8_spill]] (!%p949_p9)  ;;  %p1047_p10 = scmp.lt.s32.totalorder (!%p949_p9), %s7063_s0, 1 }
  0x54   : > { %952 = sbr.rel (%p949_p9) target bundleno = 8192 (0x2000), region = 144  ;;  %s7832_s8 = sld [smem:[#allocation13_spill]] (!%p949_p9) }
  0x55   : > { %s7833_s9 = sld [smem:[#allocation9_spill]] (!%p949_p9) }
  0x56   : > { %s7834_s14 = sld [smem:[#allocation14_spill]] (!%p949_p9) }
  0x57   : > { %s7835_s19 = sld [smem:[#allocation15_spill]] (!%p949_p9) }
  0x59   : > { %v6583_v0 = vld [vmem:[%s7826_s17 + $0x8] ss:$0 sps:$4 sm:$0xff]   ;;  %vm1088_vm0 = vcmask 1043456   ;;  %v6860_v1 = vmov 0.0   ;;  %v6584_v3 = vld [vmem:[%s7826_s17] sm:$0xff]   ;;  %vm6861_vm1 = vmmov 0  }
  0x5a   : > { %6061 = vmatprep.subr.bf16.mxu0 %v6860_v1  ;;  %6069 = vmatprep.subr.bf16.mxu1 %v6860_v1  ;;  %v1090_v2 = vsel %vm1088_vm0, %v6583_v0, 0  ;;  %s7102_s2 = scalar_select %p1047_p10, %s7063_s0, 1  ;;  %vm1084_vm2 = vcmask 195584   ;;  %v5711_v6 = vld [vmem:[%s6895_s21] ss:$0 sm:$0xff]  ;;  %vm1134_vm3 = vcmask 261120  }
  0x5b   : > { %6065 = vmatprep.mubr.msk.bf16.mxu0 %vm6861_vm1, %v6860_v1  ;;  %6073 = vmatprep.mubr.msk.bf16.mxu1 %vm6861_vm1, %v6860_v1  ;;  %v6585_v18 = vld [vmem:[%s7828_s3 + $0x8] sm:$0xff]   ;;  %v6586_v19 = vld [vmem:[%s7828_s3] sm:$0xff]   ;;  %v6592_v54 = vld [vmem:[%s7825_s20 + $0x18] sm:$0xff]   ;;  %s7839_s3 = sld [smem:[#allocation21_spill]]  ;;  %vm2923_vm4 = vcmask 31744   ;;  %vm3540_vm5 = vcmask 64512  }
  0x5c   : > { %6062 = vmatpush3.bf16.msra.mxu0 %v1090_v2  ;;  %s7105_s16 = sshll.u32 %s7102_s2, 3  ;;  %6070 = vmatpush3.bf16.msra.mxu1 %v6585_v18  ;;  %v5715_v24 = vld [vmem:[%s6900_s25] ss:$0 sm:$0xff]  ;;  %v6587_v47 = vld [vmem:[%s6930_s24 + $0x8] sm:$0xff]   ;;  %vm4232_vm6 = vcmask 1041408   ;;  %vm5406_vm7 = vcmask 1040384  }
  0x5d   : > { %6063 = vmatprep.subr.bf16.mxu0 %v6860_v1  ;;  %s1050_s22 = scalar_lea.vmem %s7831_s5, %s7105_s16  ;;  %6071 = vmatprep.subr.bf16.mxu1 %v6860_v1  ;;  %v5716_v26 = vld [vmem:[%s6905_s29] ss:$0 sm:$0xff]  ;;  %v6589_v49 = vld [vmem:[%s7827_s6 + $0x8] ss:$0 sps:$4 sm:$0xff]   ;;  %s1054_s23 = scalar_lea.vmem %s7833_s9, %s7105_s16  ;;  %vm5409_vm8 = vcmask 1042432   ;;  %vm5412_vm9 = vcmask 1044480  }
  0x5e   : > { %v1063_v4 = vld [vmem:[%s1050_s22] sm:$0xff]  ;;  %v1361_v50 = vsel %vm1088_vm0, %v6589_v49, 0  ;;  %v6595_v18 = vld [vmem:[%s7825_s20 + $0x28] sm:$0xff]   ;;  %s7836_s22 = sld [smem:[#allocation17_spill]]  ;;  %vm5414_vm10 = vcmask 1045504   ;;  %vm5416_vm11 = vcmask 1046528  }
  0x5f   : > { %v1067_v5 = vpack.c.bf16 %v1063_v4, %v1063_v4  ;;  %v5717_v35 = vld [vmem:[%s7832_s8] ss:$0 sm:$0xff]  ;;  %s7840_s5 = sld [smem:[#allocation19_spill]] }
  0x60   : > { %6064 = vmatpush3.bf16.msra.mxu0 %v6584_v3  ;;  %6072 = vmatpush3.bf16.msra.mxu1 %v6586_v19  ;;  %v6588_v48 = vld [vmem:[%s6930_s24] sm:$0xff]   ;;  %v6596_v19 = vld [vmem:[%s7825_s20 + $0x38] sm:$0xff]  }
  0x61   : > { %6077 = vmatprep.subr.bf16.mxu0 %v6860_v1  ;;  %6085 = vmatprep.subr.bf16.mxu1 %v6860_v1  ;;  %v6590_v51 = vld [vmem:[%s7827_s6] sm:$0xff]   ;;  %s7841_s6 = sld [smem:[#allocation23_spill]] }
  0x62   : > { %v1336_v52 = vld [vmem:[%s1054_s23] sm:$0xff]  ;;  %s7837_s23 = sld [smem:[#allocation20_spill]] }
  0x63   : > { %6066 = vmatmul.mubr.msk.bf16.vlgmr.msra.gmra.mxu0 %vm1084_vm2, %v1067_v5  ;;  %v1340_v53 = vpack.c.bf16 %v1336_v52, %v1336_v52  ;;  %v5721_v59 = vld [vmem:[%s7834_s14] ss:$0 sm:$0xff] }
  0x64   : > { %6081 = vmatprep.mubr.msk.bf16.mxu0 %vm6861_vm1, %v6860_v1  ;;  %6078 = vmatpush3.bf16.msra.mxu0 %v6587_v47  ;;  %v5722_v61 = vld [vmem:[%s7835_s19] ss:$0 sm:$0xff] }
  0x65   : > { %6079 = vmatprep.subr.bf16.mxu0 %v6860_v1 }
  0x68   : > { %6080 = vmatpush3.bf16.msra.mxu0 %v6588_v48  ;;  %v6618_v47 = vld [vmem:[%s7837_s23 + $0x50] sm:$0xff]   ;;  %v6619_v48 = vld [vmem:[%s7837_s23 + $0x68] sm:$0xff]   ;;  %v6620_v49 = vld [vmem:[%s7837_s23 + $0x78] sm:$0xff]  }
  0x69   : > { %6093 = vmatprep.subr.bf16.mxu0 %v6860_v1 }
 0x123   : > { %v1126_v7 = vpop.f32.mrf.mxu0 }
 0x124   : > { %v1127_v8 = vadd.f32 %v5711_v6, %v1126_v7  ;;  %v6591_v6 = vld [vmem:[%s7825_s20 + $0x8] sm:$0xff]  }
 0x125   : > { %v6067_v9 = vpop.f32.mrf.mxu0 }
 0x126   : > { %v1135_v10 = vsel %vm1134_vm3, %v1127_v8, 0.0  ;;  %v6594_v9 = vld [vmem:[%s7825_s20 + $0x10] sm:$0xff]  }
 0x127   : > { %1136 = vadd.xlane.f32.xlu0 %v1135_v10  ;;  %v1129_v11 = vpop.f32.mrf.mxu0 }
 0x129   : > { %v6068_v12 = vpop.f32.mrf.mxu0 }
 0x1b0   : > { %v1137_v13 = vpop.xlane.xlu0 %1136 }
 0x1b1   : > { %v1139_v14 = vmul.f32 0.03125, %v1137_v13 }
 0x1b3   : > { %v1140_v15 = vsub.f32 %v1127_v8, %v1139_v14  ;;  %v6593_v8 = vld [vmem:[%s7825_s20] sm:$0xff]  }
 0x1b4   : > { %v5723_v14 = vld [vmem:[%s6935_s30] ss:$0 sm:$0xff] }
 0x1b5   : > { %v1141_v16 = vmul.f32 %v1140_v15, %v1140_v15 }
 0x1b7   : > { %v1142_v17 = vsel %vm1134_vm3, %v1141_v16, 0.0 }
 0x1b8   : > { %1143 = vadd.xlane.f32.xlu0 %v1142_v17 }
 0x241   : > { %v1144_v20 = vpop.xlane.xlu0 %1143 }
 0x242   : > { %v1145_v21 = vmul.f32 0.03125, %v1144_v20 }
 0x244   : > { %v1146_v22 = vadd.f32 1e-05, %v1145_v21 }
 0x246   : > { %6647 = vrsqrt.f32 %v1146_v22 }
 0x253   : > { %v6648_v23 = vpop.eup %6647 }
 0x254   : > { %v1148_v25 = vmul.f32 %v6648_v23, %v1140_v15  ;;  %v6597_v23 = vld [vmem:[%s7825_s20 + $0x20] sm:$0xff]  }
 0x256   : > { %v1155_v27 = vmul.f32 %v5715_v24, %v1148_v25  ;;  %v6598_v24 = vld [vmem:[%s7825_s20 + $0x30] sm:$0xff]   ;;  %v6599_v25 = vld [vmem:[%s7825_s20 + $0x48] sm:$0xff]  }
 0x258   : > { %v1162_v28 = vadd.f32 %v5716_v26, %v1155_v27  ;;  %v6600_v26 = vld [vmem:[%s7825_s20 + $0x58] sm:$0xff]   ;;  %v6601_v27 = vld [vmem:[%s7825_s20 + $0x40] sm:$0xff]  }
 0x25a   : > { %v1164_v29 = vmul.f32 0.70710677, %v1162_v28  ;;  %v1163_v31 = vmul.f32 0.5, %v1162_v28  ;;  %v6602_v28 = vld [vmem:[%s7825_s20 + $0x50] sm:$0xff]  }
 0x25c   : > { %6649 = verf.f32 %v1164_v29  ;;  %v6603_v29 = vld [vmem:[%s7825_s20 + $0x68] sm:$0xff]  }
 0x269   : > { %v6650_v30 = vpop.eup %6649 }
 0x26a   : > { %v1166_v32 = vadd.f32 1.0, %v6650_v30  ;;  %v6604_v30 = vld [vmem:[%s7825_s20 + $0x78] sm:$0xff]  }
 0x26c   : > { %v1167_v33 = vmul.f32 %v1166_v32, %v1163_v31  ;;  %v6605_v31 = vld [vmem:[%s7825_s20 + $0x60] sm:$0xff]   ;;  %v6606_v32 = vld [vmem:[%s7825_s20 + $0x70] sm:$0xff]   ;;  %s6865_s20 = smov [#allocation2]  }
 0x26e   : > { %v1172_v34 = vpack.c.bf16 %v1167_v33, %v1167_v33  ;;  %v5727_v33 = vld [vmem:[%s7836_s22] ss:$0 sm:$0xff]  ;;  %s7838_s22 = sld [smem:[#allocation22_spill]] }
 0x270   : > { %6074 = vmatmul.mubr.msk.bf16.vlgmr.msra.gmra.mxu1 %vm1134_vm3, %v1172_v34  ;;  %v6607_v34 = vld [vmem:[%s7837_s23 + $0x8] sm:$0xff]  }
 0x271   : > { %6089 = vmatprep.mubr.msk.bf16.mxu1 %vm6861_vm1, %v6860_v1  ;;  %6086 = vmatpush3.bf16.msra.mxu1 %v1361_v50  ;;  %v6621_v50 = vld [vmem:[%s7837_s23 + $0x60] sm:$0xff]  }
 0x272   : > { %6087 = vmatprep.subr.bf16.mxu1 %v6860_v1 }
 0x274   : > { %v6623_v52 = vld [vmem:[%s7838_s22 + $0x8] sm:$0xff]  }
 0x275   : > { %6088 = vmatpush3.bf16.msra.mxu1 %v6590_v51  ;;  %v6622_v51 = vld [vmem:[%s7837_s23 + $0x70] sm:$0xff]  }
 0x276   : > { %6101 = vmatprep.subr.bf16.mxu1 %v6860_v1 }
 0x278   : > { %6090 = vmatmul.mubr.msk.bf16.vlgmr.msra.gmra.mxu1 %vm1084_vm2, %v1340_v53  ;;  %v6624_v53 = vld [vmem:[%s7838_s22 + $0x18] sm:$0xff]  }
 0x279   : > { %6102 = vmatpush3.bf16.msra.mxu1 %v6592_v54  ;;  %6105 = vmatprep.mubr.msk.bf16.mxu1 %vm6861_vm1, %v6860_v1  ;;  %v6625_v54 = vld [vmem:[%s7838_s22] sm:$0xff]  }
 0x27a   : > { %6103 = vmatprep.subr.bf16.mxu1 %v6860_v1 }
 0x27d   : > { %6104 = vmatpush3.bf16.msra.mxu1 %v6594_v9 }
 0x27e   : > { %6117 = vmatprep.subr.bf16.mxu1 %v6860_v1 }
 0x330   : > { %v1229_v36 = vpop.f32.mrf.mxu1 }
 0x331   : > { %v1230_v37 = vadd.f32 %v5717_v35, %v1229_v36  ;;  %v6608_v35 = vld [vmem:[%s7837_s23 + $0x18] sm:$0xff]  }
 0x332   : > { %v6075_v38 = vpop.f32.mrf.mxu1 }
 0x333   : > { %v1237_v39 = vsel %vm1134_vm3, %v1230_v37, 0.0  ;;  %v6610_v38 = vld [vmem:[%s7837_s23 + $0x10] sm:$0xff]  }
 0x334   : > { %1238 = vadd.xlane.f32.xlu1 %v1237_v39  ;;  %v1232_v40 = vpop.f32.mrf.mxu1 }
 0x335   : > { %v6611_v40 = vld [vmem:[%s7837_s23 + $0x28] sm:$0xff]  }
 0x336   : > { %v6076_v41 = vpop.f32.mrf.mxu1 }
 0x337   : > { %v6612_v41 = vld [vmem:[%s7837_s23 + $0x38] sm:$0xff]  }
 0x338   : > { %v1397_v10 = vpop.f32.mrf.mxu1 }
 0x339   : > { %v1398_v36 = vadd.f32 %v5727_v33, %v1397_v10 }
 0x33a   : > { %v6091_v11 = vpop.f32.mrf.mxu1 }
 0x33b   : > { %v7215_v39 = vpack.c.bf16 %v1398_v36, %v1398_v36 }
 0x33c   : > { %v1400_v12 = vpop.f32.mrf.mxu1 }
 0x33e   : > { %v6092_v13 = vpop.f32.mrf.mxu1 }
 0x3bd   : > { %v1239_v42 = vpop.xlane.xlu1 %1238 }
 0x3be   : > { %v1240_v43 = vmul.f32 0.03125, %v1239_v42  ;;  %v6613_v42 = vld [vmem:[%s7837_s23 + $0x20] sm:$0xff]  }
 0x3c0   : > { %v1241_v44 = vsub.f32 %v1230_v37, %v1240_v43  ;;  %v6609_v37 = vld [vmem:[%s7837_s23] sm:$0xff]   ;;  %v6614_v43 = vld [vmem:[%s7837_s23 + $0x30] sm:$0xff]  }
 0x3c2   : > { %v1242_v45 = vmul.f32 %v1241_v44, %v1241_v44 }
 0x3c4   : > { %v1243_v46 = vsel %vm1134_vm3, %v1242_v45, 0.0  ;;  %v6616_v45 = vld [vmem:[%s7837_s23 + $0x58] sm:$0xff]  }
 0x3c5   : > { %1244 = vadd.xlane.f32.xlu1 %v1243_v46  ;;  %v6617_v46 = vld [vmem:[%s7837_s23 + $0x40] sm:$0xff]  }
 0x44e   : > { %v1245_v55 = vpop.xlane.xlu1 %1244 }
 0x44f   : > { %v1246_v56 = vmul.f32 0.03125, %v1245_v55  ;;  %v6626_v55 = vld [vmem:[%s7838_s22 + $0x10] sm:$0xff]  }
 0x451   : > { %v1247_v57 = vadd.f32 1e-05, %v1246_v56  ;;  %v6627_v56 = vld [vmem:[%s7838_s22 + $0x28] sm:$0xff]  }
 0x453   : > { %6651 = vrsqrt.f32 %v1247_v57  ;;  %v6628_v57 = vld [vmem:[%s7838_s22 + $0x38] sm:$0xff]  }
 0x460   : > { %v6652_v58 = vpop.eup %6651 }
 0x461   : > { %v1249_v60 = vmul.f32 %v6652_v58, %v1241_v44  ;;  %v6615_v44 = vld [vmem:[%s7837_s23 + $0x48] sm:$0xff]   ;;  %v6629_v58 = vld [vmem:[%s7838_s22 + $0x20] sm:$0xff]  }
 0x463   : > { %v1256_v62 = vmul.f32 %v5721_v59, %v1249_v60  ;;  %v6630_v59 = vld [vmem:[%s7838_s22 + $0x30] sm:$0xff]   ;;  %v6631_v60 = vld [vmem:[%s7838_s22 + $0x48] sm:$0xff]  }
 0x465   : > { %v1263_v63 = vadd.f32 %v5722_v61, %v1256_v62  ;;  %v6632_v61 = vld [vmem:[%s7838_s22 + $0x58] sm:$0xff]   ;;  %v6633_v62 = vld [vmem:[%s7838_s22 + $0x40] sm:$0xff]  }
 0x467   : > { %v1265_v0 = vmul.f32 0.70710677, %v1263_v63  ;;  %v1264_v3 = vmul.f32 0.5, %v1263_v63  ;;  %v6634_v63 = vld [vmem:[%s7838_s22 + $0x50] sm:$0xff]  }
 0x469   : > { %6653 = verf.f32 %v1265_v0  ;;  %v6635_v0 = vld [vmem:[%s7838_s22 + $0x68] sm:$0xff]  }
 0x476   : > { %v6654_v2 = vpop.eup %6653 }
 0x477   : > { %v1267_v4 = vadd.f32 1.0, %v6654_v2  ;;  %v6636_v2 = vld [vmem:[%s7838_s22 + $0x78] sm:$0xff]  }
 0x479   : > { %v1268_v5 = vmul.f32 %v1267_v4, %v1264_v3  ;;  %v6637_v3 = vld [vmem:[%s7838_s22 + $0x60] sm:$0xff]   ;;  %v6638_v4 = vld [vmem:[%s7838_s22 + $0x70] sm:$0xff]  }
 0x47b   : > { %v1273_v7 = vpack.c.bf16 %v1268_v5, %v1268_v5 }
 0x47d   : > { %6082 = vmatmul.mubr.msk.bf16.vlgmr.msra.gmra.mxu0 %vm1134_vm3, %v1273_v7 }
 0x47e   : > { %6094 = vmatpush3.bf16.msra.mxu0 %v6591_v6  ;;  %6097 = vmatprep.mubr.msk.bf16.mxu0 %vm6861_vm1, %v6860_v1 }
 0x47f   : > { %6095 = vmatprep.subr.bf16.mxu0 %v6860_v1 }
 0x482   : > { %6096 = vmatpush3.bf16.msra.mxu0 %v6593_v8 }
 0x483   : > { %6109 = vmatprep.subr.bf16.mxu0 %v6860_v1 }
 0x53d   : > { %v1330_v15 = vpop.f32.mrf.mxu0 }
 0x53e   : > { %v7156_v16 = vadd.f32 %v5723_v14, %v1330_v15 }
 0x53f   : > { %v6083_v17 = vpop.f32.mrf.mxu0 }
 0x540   : > { %v1435_v20 = vpack.c.bf16 %v7156_v16, %v7156_v16 }
 0x541   : > { %v1333_v21 = vpop.f32.mrf.mxu0 }
 0x542   : > { %6098 = vmatmul.mubr.msk.bf16.vlgmr.msra.gmra.mxu0 %vm1134_vm3, %v1435_v20  ;;  %6106 = vmatmul.mubr.msk.bf16.vlgmr.msra.gmra.mxu1 %vm1134_vm3, %v1435_v20 }
 0x543   : > { %v6084_v22 = vpop.f32.mrf.mxu0  ;;  %6110 = vmatpush3.bf16.msra.mxu0 %v6595_v18  ;;  %6118 = vmatpush3.bf16.msra.mxu1 %v6596_v19 }
 0x544   : > { %6111 = vmatprep.subr.bf16.mxu0 %v6860_v1  ;;  %6119 = vmatprep.subr.bf16.mxu1 %v6860_v1 }
 0x545   : > { %6113 = vmatprep.mubr.msk.bf16.mxu0 %vm6861_vm1, %v6860_v1  ;;  %6121 = vmatprep.mubr.msk.bf16.mxu1 %vm6861_vm1, %v6860_v1 }
 0x547   : > { %6112 = vmatpush3.bf16.msra.mxu0 %v6597_v23  ;;  %6120 = vmatpush3.bf16.msra.mxu1 %v6598_v24 }
 0x548   : > { %6125 = vmatprep.subr.bf16.mxu0 %v6860_v1  ;;  %6133 = vmatprep.subr.bf16.mxu1 %v6860_v1 }
 0x54a   : > { %6114 = vmatmul.mubr.msk.bf16.vlgmr.msra.gmra.mxu0 %vm1134_vm3, %v1435_v20  ;;  %6122 = vmatmul.mubr.msk.bf16.vlgmr.msra.gmra.mxu1 %vm1134_vm3, %v1435_v20 }
 0x54b   : > { %6126 = vmatpush3.bf16.msra.mxu0 %v6599_v25  ;;  %6134 = vmatpush3.bf16.msra.mxu1 %v6600_v26 }
 0x54c   : > { %6127 = vmatprep.subr.bf16.mxu0 %v6860_v1  ;;  %6135 = vmatprep.subr.bf16.mxu1 %v6860_v1 }
 0x54d   : > { %6129 = vmatprep.mubr.msk.bf16.mxu0 %vm6861_vm1, %v6860_v1  ;;  %6137 = vmatprep.mubr.msk.bf16.mxu1 %vm6861_vm1, %v6860_v1 }
 0x54f   : > { %6128 = vmatpush3.bf16.msra.mxu0 %v6601_v27  ;;  %6136 = vmatpush3.bf16.msra.mxu1 %v6602_v28 }
 0x550   : > { %6141 = vmatprep.subr.bf16.mxu0 %v6860_v1  ;;  %6149 = vmatprep.subr.bf16.mxu1 %v6860_v1 }
 0x552   : > { %6130 = vmatmul.mubr.msk.bf16.vlgmr.msra.gmra.mxu0 %vm1134_vm3, %v1435_v20  ;;  %6138 = vmatmul.mubr.msk.bf16.vlgmr.msra.gmra.mxu1 %vm1134_vm3, %v1435_v20 }
 0x553   : > { %6142 = vmatpush3.bf16.msra.mxu0 %v6603_v29  ;;  %6150 = vmatpush3.bf16.msra.mxu1 %v6604_v30 }
 0x554   : > { %6143 = vmatprep.subr.bf16.mxu0 %v6860_v1  ;;  %6151 = vmatprep.subr.bf16.mxu1 %v6860_v1 }
 0x555   : > { %6145 = vmatprep.mubr.msk.bf16.mxu0 %vm6861_vm1, %v6860_v1  ;;  %6153 = vmatprep.mubr.msk.bf16.mxu1 %vm6861_vm1, %v6860_v1 }
 0x557   : > { %6144 = vmatpush3.bf16.msra.mxu0 %v6605_v31  ;;  %6152 = vmatpush3.bf16.msra.mxu1 %v6606_v32 }
 0x558   : > { %6157 = vmatprep.subr.bf16.mxu0 %v6860_v1  ;;  %6165 = vmatprep.subr.bf16.mxu1 %v6860_v1 }
 0x55a   : > { %6146 = vmatmul.mubr.msk.bf16.vlgmr.msra.gmra.mxu0 %vm1134_vm3, %v1435_v20  ;;  %6154 = vmatmul.mubr.msk.bf16.vlgmr.msra.gmra.mxu1 %vm1134_vm3, %v1435_v20 }
 0x55b   : > { %6158 = vmatpush3.bf16.msra.mxu0 %v6607_v34  ;;  %6166 = vmatpush3.bf16.msra.mxu1 %v6608_v35 }
 0x55c   : > { %6159 = vmatprep.subr.bf16.mxu0 %v6860_v1  ;;  %6167 = vmatprep.subr.bf16.mxu1 %v6860_v1 }
 0x55d   : > { %6161 = vmatprep.mubr.msk.bf16.mxu0 %vm6861_vm1, %v6860_v1  ;;  %6169 = vmatprep.mubr.msk.bf16.mxu1 %vm6861_vm1, %v6860_v1 }
 0x55f   : > { %6160 = vmatpush3.bf16.msra.mxu0 %v6609_v37  ;;  %6168 = vmatpush3.bf16.msra.mxu1 %v6610_v38  ;;  %v5763_v38 = vld [vmem:[%s7839_s3] ss:$0 sm:$0xff] }
 0x560   : > { %6173 = vmatprep.subr.bf16.mxu0 %v6860_v1  ;;  %6181 = vmatprep.subr.bf16.mxu1 %v6860_v1 }
 0x562   : > { %6162 = vmatmul.mubr.msk.bf16.vlgmr.msra.gmra.mxu0 %vm1134_vm3, %v7215_v39  ;;  %6170 = vmatmul.mubr.msk.bf16.vlgmr.msra.gmra.mxu1 %vm1134_vm3, %v7215_v39 }
 0x563   : > { %6174 = vmatpush3.bf16.msra.mxu0 %v6611_v40  ;;  %6182 = vmatpush3.bf16.msra.mxu1 %v6612_v41  ;;  %v5731_v41 = vld [vmem:[%s7840_s5] ss:$0 sm:$0xff] }
 0x564   : > { %6175 = vmatprep.subr.bf16.mxu0 %v6860_v1  ;;  %6183 = vmatprep.subr.bf16.mxu1 %v6860_v1 }
 0x565   : > { %6177 = vmatprep.mubr.msk.bf16.mxu0 %vm6861_vm1, %v6860_v1  ;;  %6185 = vmatprep.mubr.msk.bf16.mxu1 %vm6861_vm1, %v6860_v1 }
 0x567   : > { %6176 = vmatpush3.bf16.msra.mxu0 %v6613_v42  ;;  %6184 = vmatpush3.bf16.msra.mxu1 %v6614_v43  ;;  %v5764_v43 = vld [vmem:[%s7839_s3 + $0x1] ss:$0 sm:$0xff] }
 0x568   : > { %6189 = vmatprep.subr.bf16.mxu0 %v6860_v1  ;;  %6197 = vmatprep.subr.bf16.mxu1 %v6860_v1 }
 0x56a   : > { %6178 = vmatmul.mubr.msk.bf16.vlgmr.msra.gmra.mxu0 %vm1134_vm3, %v7215_v39  ;;  %6186 = vmatmul.mubr.msk.bf16.vlgmr.msra.gmra.mxu1 %vm1134_vm3, %v7215_v39 }
 0x56b   : > { %6190 = vmatpush3.bf16.msra.mxu0 %v6615_v44  ;;  %6198 = vmatpush3.bf16.msra.mxu1 %v6616_v45 }
 0x56c   : > { %6191 = vmatprep.subr.bf16.mxu0 %v6860_v1  ;;  %6199 = vmatprep.subr.bf16.mxu1 %v6860_v1 }
 0x56d   : > { %6193 = vmatprep.mubr.msk.bf16.mxu0 %vm6861_vm1, %v6860_v1  ;;  %6201 = vmatprep.mubr.msk.bf16.mxu1 %vm6861_vm1, %v6860_v1 }
 0x56f   : > { %6192 = vmatpush3.bf16.msra.mxu0 %v6617_v46  ;;  %6200 = vmatpush3.bf16.msra.mxu1 %v6618_v47 }
 0x570   : > { %6205 = vmatprep.subr.bf16.mxu0 %v6860_v1  ;;  %6213 = vmatprep.subr.bf16.mxu1 %v6860_v1 }
 0x572   : > { %6194 = vmatmul.mubr.msk.bf16.vlgmr.msra.gmra.mxu0 %vm1134_vm3, %v7215_v39  ;;  %6202 = vmatmul.mubr.msk.bf16.vlgmr.msra.gmra.mxu1 %vm1134_vm3, %v7215_v39 }
 0x573   : > { %6206 = vmatpush3.bf16.msra.mxu0 %v6619_v48  ;;  %6214 = vmatpush3.bf16.msra.mxu1 %v6620_v49  ;;  %v5732_v49 = vld [vmem:[%s7840_s5 + $0x1] ss:$0 sm:$0xff] }
 0x574   : > { %6207 = vmatprep.subr.bf16.mxu0 %v6860_v1  ;;  %6215 = vmatprep.subr.bf16.mxu1 %v6860_v1 }
 0x575   : > { %6209 = vmatprep.mubr.msk.bf16.mxu0 %vm6861_vm1, %v6860_v1  ;;  %6217 = vmatprep.mubr.msk.bf16.mxu1 %vm6861_vm1, %v6860_v1 }
 0x577   : > { %6208 = vmatpush3.bf16.msra.mxu0 %v6621_v50  ;;  %6216 = vmatpush3.bf16.msra.mxu1 %v6622_v51 }
 0x578   : > { %6221 = vmatprep.subr.bf16.mxu0 %v6860_v1  ;;  %6229 = vmatprep.subr.bf16.mxu1 %v6860_v1 }
 0x57a   : > { %6210 = vmatmul.mubr.msk.bf16.vlgmr.msra.gmra.mxu0 %vm1134_vm3, %v7215_v39  ;;  %6218 = vmatmul.mubr.msk.bf16.vlgmr.msra.gmra.mxu1 %vm1134_vm3, %v7215_v39 }
 0x57b   : > { %6222 = vmatpush3.bf16.msra.mxu0 %v6623_v52  ;;  %6230 = vmatpush3.bf16.msra.mxu1 %v6624_v53  ;;  %v5765_v53 = vld [vmem:[%s7839_s3 + $0x2] ss:$0 sm:$0xff] }
 0x57c   : > { %6223 = vmatprep.subr.bf16.mxu0 %v6860_v1  ;;  %6231 = vmatprep.subr.bf16.mxu1 %v6860_v1 }
 0x57d   : > { %6225 = vmatprep.mubr.msk.bf16.mxu0 %vm6861_vm1, %v6860_v1  ;;  %6233 = vmatprep.mubr.msk.bf16.mxu1 %vm6861_vm1, %v6860_v1 }
 0x57f   : > { %6224 = vmatpush3.bf16.msra.mxu0 %v6625_v54  ;;  %6232 = vmatpush3.bf16.msra.mxu1 %v6626_v55  ;;  %v5766_v54 = vld [vmem:[%s7839_s3 + $0x3] ss:$0 sm:$0xff] }
 0x580   : > { %6237 = vmatprep.subr.bf16.mxu0 %v6860_v1  ;;  %6245 = vmatprep.subr.bf16.mxu1 %v6860_v1 }
 0x582   : > { %6226 = vmatmul.mubr.msk.bf16.vlgmr.msra.gmra.mxu0 %vm1134_vm3, %v7215_v39  ;;  %6234 = vmatmul.mubr.msk.bf16.vlgmr.msra.gmra.mxu1 %vm1134_vm3, %v7215_v39 }
 0x583   : > { %6238 = vmatpush3.bf16.msra.mxu0 %v6627_v56  ;;  %6246 = vmatpush3.bf16.msra.mxu1 %v6628_v57 }
 0x584   : > { %6239 = vmatprep.subr.bf16.mxu0 %v6860_v1  ;;  %6247 = vmatprep.subr.bf16.mxu1 %v6860_v1 }
 0x585   : > { %6241 = vmatprep.mubr.msk.bf16.mxu0 %vm6861_vm1, %v6860_v1  ;;  %6249 = vmatprep.mubr.msk.bf16.mxu1 %vm6861_vm1, %v6860_v1 }
 0x587   : > { %6240 = vmatpush3.bf16.msra.mxu0 %v6629_v58  ;;  %6248 = vmatpush3.bf16.msra.mxu1 %v6630_v59  ;;  %v5733_v58 = vld [vmem:[%s7840_s5 + $0x2] ss:$0 sm:$0xff]  ;;  %v5734_v59 = vld [vmem:[%s7840_s5 + $0x3] ss:$0 sm:$0xff] }
 0x588   : > { %6253 = vmatprep.subr.bf16.mxu0 %v6860_v1  ;;  %6261 = vmatprep.subr.bf16.mxu1 %v6860_v1 }
 0x58a   : > { %6242 = vmatmul.mubr.msk.bf16.vlgmr.msra.gmra.mxu0 %vm1134_vm3, %v7215_v39  ;;  %6250 = vmatmul.mubr.msk.bf16.vlgmr.msra.gmra.mxu1 %vm1134_vm3, %v7215_v39 }
 0x58b   : > { %6254 = vmatpush3.bf16.msra.mxu0 %v6631_v60  ;;  %6262 = vmatpush3.bf16.msra.mxu1 %v6632_v61 }
 0x58c   : > { %6255 = vmatprep.subr.bf16.mxu0 %v6860_v1  ;;  %6263 = vmatprep.subr.bf16.mxu1 %v6860_v1 }
 0x58d   : > { %6257 = vmatprep.mubr.msk.bf16.mxu0 %vm6861_vm1, %v6860_v1  ;;  %6265 = vmatprep.mubr.msk.bf16.mxu1 %vm6861_vm1, %v6860_v1 }
 0x58f   : > { %6256 = vmatpush3.bf16.msra.mxu0 %v6633_v62  ;;  %6264 = vmatpush3.bf16.msra.mxu1 %v6634_v63 }
 0x590   : > { %6269 = vmatprep.subr.bf16.mxu0 %v6860_v1  ;;  %6277 = vmatprep.subr.bf16.mxu1 %v6860_v1 }
 0x592   : > { %6258 = vmatmul.mubr.msk.bf16.vlgmr.msra.gmra.mxu0 %vm1134_vm3, %v7215_v39  ;;  %6266 = vmatmul.mubr.msk.bf16.vlgmr.msra.gmra.mxu1 %vm1134_vm3, %v7215_v39 }
 0x593   : > { %6270 = vmatpush3.bf16.msra.mxu0 %v6635_v0  ;;  %6278 = vmatpush3.bf16.msra.mxu1 %v6636_v2 }
 0x594   : > { %6271 = vmatprep.subr.bf16.mxu0 %v6860_v1  ;;  %6279 = vmatprep.subr.bf16.mxu1 %v6860_v1 }
 0x595   : > { %6273 = vmatprep.mubr.msk.bf16.mxu0 %vm6861_vm1, %v6860_v1  ;;  %6281 = vmatprep.mubr.msk.bf16.mxu1 %vm6861_vm1, %v6860_v1 }
 0x597   : > { %6272 = vmatpush3.bf16.msra.mxu0 %v6637_v3  ;;  %6280 = vmatpush3.bf16.msra.mxu1 %v6638_v4 }
 0x598   : > { %6285 = vmatprep.subr.mxu1 %v6860_v1  ;;  %6295 = vmatprep.subr.mxu0 %v6860_v1 }
 0x59a   : > { %6274 = vmatmul.mubr.msk.bf16.vlgmr.msra.gmra.mxu0 %vm1134_vm3, %v7215_v39  ;;  %6282 = vmatmul.mubr.msk.bf16.vlgmr.msra.gmra.mxu1 %vm1134_vm3, %v7215_v39 }
 0x59b   : > { %6287 = vmatprep.mubr.msk.f32.mxu1 %vm6861_vm1, %v6860_v1  ;;  %6297 = vmatprep.mubr.msk.f32.mxu0 %vm6861_vm1, %v6860_v1 }
 0x602   : > { %v1541_v5 = vpop.f32.mrf.mxu0  ;;  %v1593_v6 = vpop.f32.mrf.mxu1 }
 0x603   : > { %v1542_v46 = vadd.f32 %v5731_v41, %v1541_v5  ;;  %v1594_v55 = vadd.f32 %v5732_v49, %v1593_v6 }
 0x604   : > { %v6099_v7 = vpop.f32.mrf.mxu0  ;;  %v6107_v8 = vpop.f32.mrf.mxu1 }
 0x605   : > { %v5767_v7 = vld [vmem:[%s7839_s3 + $0x4] ss:$0 sm:$0xff]  ;;  %v5768_v8 = vld [vmem:[%s7839_s3 + $0x5] ss:$0 sm:$0xff] }
 0x606   : > { %v1544_v9 = vpop.f32.mrf.mxu0  ;;  %v1596_v10 = vpop.f32.mrf.mxu1 }
 0x608   : > { %v6100_v11 = vpop.f32.mrf.mxu0  ;;  %v6108_v12 = vpop.f32.mrf.mxu1 }
 0x609   : > { %v5735_v11 = vld [vmem:[%s7840_s5 + $0x4] ss:$0 sm:$0xff]  ;;  %v5736_v12 = vld [vmem:[%s7840_s5 + $0x5] ss:$0 sm:$0xff] }
 0x60a   : > { %v1645_v13 = vpop.f32.mrf.mxu0  ;;  %v1697_v14 = vpop.f32.mrf.mxu1 }
 0x60b   : > { %v1646_v0 = vadd.f32 %v5733_v58, %v1645_v13  ;;  %v1698_v2 = vadd.f32 %v5734_v59, %v1697_v14 }
 0x60c   : > { %v6115_v15 = vpop.f32.mrf.mxu0  ;;  %v6123_v17 = vpop.f32.mrf.mxu1 }
 0x60e   : > { %v1648_v18 = vpop.f32.mrf.mxu0  ;;  %v1700_v19 = vpop.f32.mrf.mxu1 }
 0x610   : > { %v6116_v20 = vpop.f32.mrf.mxu0  ;;  %v6124_v21 = vpop.f32.mrf.mxu1 }
 0x612   : > { %v7339_v22 = vpop.f32.mrf.mxu0  ;;  %v7341_v23 = vpop.f32.mrf.mxu1 }
 0x613   : > { %v1750_v18 = vadd.f32 %v5735_v11, %v7339_v22  ;;  %v1802_v19 = vadd.f32 %v5736_v12, %v7341_v23 }
 0x614   : > { %v6131_v24 = vpop.f32.mrf.mxu0  ;;  %v6139_v25 = vpop.f32.mrf.mxu1 }
 0x616   : > { %v1752_v26 = vpop.f32.mrf.mxu0  ;;  %v1804_v27 = vpop.f32.mrf.mxu1 }
 0x617   : > { %v5769_v26 = vld [vmem:[%s7839_s3 + $0x6] ss:$0 sm:$0xff]  ;;  %v5770_v27 = vld [vmem:[%s7839_s3 + $0x7] ss:$0 sm:$0xff]  ;;  %s7842_s3 = sld [smem:[#allocation24_spill]] }
 0x618   : > { %v6132_v28 = vpop.f32.mrf.mxu0  ;;  %v6140_v29 = vpop.f32.mrf.mxu1 }
 0x619   : > { %v5737_v28 = vld [vmem:[%s7840_s5 + $0x6] ss:$0 sm:$0xff]  ;;  %v5738_v29 = vld [vmem:[%s7840_s5 + $0x7] ss:$0 sm:$0xff]  ;;  %s7843_s5 = sld [smem:[#allocation26_spill]] }
 0x61a   : > { %v7343_v30 = vpop.f32.mrf.mxu0  ;;  %v7345_v31 = vpop.f32.mrf.mxu1 }
 0x61c   : > { %v6147_v32 = vpop.f32.mrf.mxu0  ;;  %v6155_v33 = vpop.f32.mrf.mxu1 }
 0x61e   : > { %v1856_v34 = vpop.f32.mrf.mxu0  ;;  %v1908_v35 = vpop.f32.mrf.mxu1 }
 0x620   : > { %v6148_v36 = vpop.f32.mrf.mxu0  ;;  %v6156_v37 = vpop.f32.mrf.mxu1 }
 0x621   : > { %v1854_v36 = vadd.f32 %v5737_v28, %v7343_v30  ;;  %v1906_v37 = vadd.f32 %v5738_v29, %v7345_v31 }
 0x622   : > { %v2049_v39 = vpop.f32.mrf.mxu0  ;;  %v2101_v40 = vpop.f32.mrf.mxu1 }
 0x623   : > { %v2050_v42 = vadd.f32 %v5763_v38, %v2049_v39  ;;  %v2102_v50 = vadd.f32 %v5764_v43, %v2101_v40  ;;  %v5796_v43 = vld [vmem:[%s7841_s6 + $0x1] ss:$0 sm:$0xff] }
 0x624   : > { %v6163_v44 = vpop.f32.mrf.mxu0  ;;  %v6171_v45 = vpop.f32.mrf.mxu1 }
 0x625   : > { %6286 = vmatpush3.xpose.msk.msra.mxu1 %vm2923_vm4, %v2050_v42  ;;  %v5795_v42 = vld [vmem:[%s7841_s6] ss:$0 sm:$0xff] }
 0x626   : > { %v2052_v47 = vpop.f32.mrf.mxu0  ;;  %v2104_v48 = vpop.f32.mrf.mxu1  ;;  %6290 = vmatprep.subr.mxu1 %v6860_v1 }
 0x628   : > { %v6164_v51 = vpop.f32.mrf.mxu0  ;;  %v6172_v52 = vpop.f32.mrf.mxu1  ;;  %6288 = vmatmul.mubr.msk.f32.vlgmr.msra.gmra.mxu1 %vm2923_vm4, %v1542_v46 }
 0x629   : > { %6291 = vmatpush3.xpose.msk.msra.mxu1 %vm2923_vm4, %v2102_v50  ;;  %6292 = vmatprep.mubr.msk.f32.mxu1 %vm6861_vm1, %v6860_v1 }
 0x62a   : > { %v2153_v56 = vpop.f32.mrf.mxu0  ;;  %v2205_v57 = vpop.f32.mrf.mxu1  ;;  %6300 = vmatprep.subr.mxu1 %v6860_v1 }
 0x62b   : > { %v2154_v60 = vadd.f32 %v5765_v53, %v2153_v56  ;;  %v2206_v61 = vadd.f32 %v5766_v54, %v2205_v57 }
 0x62c   : > { %v6179_v62 = vpop.f32.mrf.mxu0  ;;  %v6187_v63 = vpop.f32.mrf.mxu1  ;;  %6293 = vmatmul.mubr.msk.f32.vlgmr.msra.gmra.mxu1 %vm2923_vm4, %v1594_v55 }
 0x62d   : > { %6296 = vmatpush3.xpose.msk.msra.mxu0 %vm2923_vm4, %v2154_v60  ;;  %6301 = vmatpush3.xpose.msk.msra.mxu1 %vm2923_vm4, %v2206_v61 }
 0x62e   : > { %v2156_v3 = vpop.f32.mrf.mxu0  ;;  %v2208_v4 = vpop.f32.mrf.mxu1  ;;  %6302 = vmatprep.mubr.msk.f32.mxu1 %vm6861_vm1, %v6860_v1  ;;  %6305 = vmatprep.subr.mxu0 %v6860_v1 }
 0x62f   : > { %6310 = vmatprep.subr.mxu1 %v6860_v1 }
 0x630   : > { %v6180_v5 = vpop.f32.mrf.mxu0  ;;  %v6188_v6 = vpop.f32.mrf.mxu1  ;;  %6298 = vmatmul.mubr.msk.f32.vlgmr.msra.gmra.mxu0 %vm2923_vm4, %v1646_v0  ;;  %6303 = vmatmul.mubr.msk.f32.vlgmr.msra.gmra.mxu1 %vm2923_vm4, %v1698_v2 }
 0x631   : > { %6307 = vmatprep.mubr.msk.f32.mxu0 %vm6861_vm1, %v6860_v1  ;;  %6312 = vmatprep.mubr.msk.f32.mxu1 %vm6861_vm1, %v6860_v1 }
 0x632   : > { %v2257_v9 = vpop.f32.mrf.mxu0  ;;  %v2309_v10 = vpop.f32.mrf.mxu1 }
 0x633   : > { %v2258_v13 = vadd.f32 %v5767_v7, %v2257_v9  ;;  %v2310_v14 = vadd.f32 %v5768_v8, %v2309_v10 }
 0x634   : > { %v6195_v15 = vpop.f32.mrf.mxu0  ;;  %v6203_v17 = vpop.f32.mrf.mxu1 }
 0x635   : > { %6306 = vmatpush3.xpose.msk.msra.mxu0 %vm2923_vm4, %v2258_v13  ;;  %6311 = vmatpush3.xpose.msk.msra.mxu1 %vm2923_vm4, %v2310_v14 }
 0x636   : > { %v2260_v20 = vpop.f32.mrf.mxu0  ;;  %v2312_v21 = vpop.f32.mrf.mxu1  ;;  %6315 = vmatprep.subr.mxu0 %v6860_v1  ;;  %6320 = vmatprep.subr.mxu1 %v6860_v1 }
 0x638   : > { %v6196_v24 = vpop.f32.mrf.mxu0  ;;  %v6204_v25 = vpop.f32.mrf.mxu1  ;;  %6308 = vmatmul.mubr.msk.f32.vlgmr.msra.gmra.mxu0 %vm2923_vm4, %v1750_v18  ;;  %6313 = vmatmul.mubr.msk.f32.vlgmr.msra.gmra.mxu1 %vm2923_vm4, %v1802_v19 }
 0x639   : > { %6317 = vmatprep.mubr.msk.f32.mxu0 %vm6861_vm1, %v6860_v1  ;;  %6322 = vmatprep.mubr.msk.f32.mxu1 %vm6861_vm1, %v6860_v1 }
 0x63a   : > { %v2361_v22 = vpop.f32.mrf.mxu0  ;;  %v2413_v23 = vpop.f32.mrf.mxu1 }
 0x63b   : > { %v2362_v32 = vadd.f32 %v5769_v26, %v2361_v22  ;;  %v2414_v33 = vadd.f32 %v5770_v27, %v2413_v23 }
 0x63c   : > { %v6211_v34 = vpop.f32.mrf.mxu0  ;;  %v6219_v35 = vpop.f32.mrf.mxu1 }
 0x63d   : > { %6316 = vmatpush3.xpose.msk.msra.mxu0 %vm2923_vm4, %v2362_v32  ;;  %6321 = vmatpush3.xpose.msk.msra.mxu1 %vm2923_vm4, %v2414_v33 }
 0x63e   : > { %v2364_v38 = vpop.f32.mrf.mxu0  ;;  %v2416_v39 = vpop.f32.mrf.mxu1  ;;  %6325 = vmatprep.subr.mxu0 %v6860_v1  ;;  %6330 = vmatprep.subr.mxu1 %v6860_v1 }
 0x640   : > { %v6212_v40 = vpop.f32.mrf.mxu0  ;;  %v6220_v41 = vpop.f32.mrf.mxu1  ;;  %6318 = vmatmul.mubr.msk.f32.vlgmr.msra.gmra.mxu0 %vm2923_vm4, %v1854_v36  ;;  %6323 = vmatmul.mubr.msk.f32.vlgmr.msra.gmra.mxu1 %vm2923_vm4, %v1906_v37 }
 0x641   : > { %6327 = vmatprep.mubr.msk.f32.mxu0 %vm6861_vm1, %v6860_v1  ;;  %6332 = vmatprep.mubr.msk.f32.mxu1 %vm6861_vm1, %v6860_v1 }
 0x642   : > { %v2553_v30 = vpop.f32.mrf.mxu0  ;;  %v2605_v31 = vpop.f32.mrf.mxu1 }
 0x643   : > { %v2554_v44 = vadd.f32 %v5795_v42, %v2553_v30  ;;  %v2606_v45 = vadd.f32 %v5796_v43, %v2605_v31 }
 0x644   : > { %v6227_v46 = vpop.f32.mrf.mxu0  ;;  %v6235_v47 = vpop.f32.mrf.mxu1 }
 0x645   : > { %6326 = vmatpush3.msra.mxu0 %v2554_v44  ;;  %6331 = vmatpush3.msra.mxu1 %v2606_v45 }
 0x646   : > { %v2556_v48 = vpop.f32.mrf.mxu0  ;;  %v2608_v49 = vpop.f32.mrf.mxu1  ;;  %6335 = vmatprep.subr.mxu0 %v6860_v1  ;;  %6340 = vmatprep.subr.mxu1 %v6860_v1 }
 0x648   : > { %v6228_v50 = vpop.f32.mrf.mxu0  ;;  %v6236_v51 = vpop.f32.mrf.mxu1 }
 0x64a   : > { %v7411_v52 = vpop.f32.mrf.mxu0  ;;  %v7413_v53 = vpop.f32.mrf.mxu1 }
 0x64c   : > { %v6243_v54 = vpop.f32.mrf.mxu0  ;;  %v6251_v55 = vpop.f32.mrf.mxu1 }
 0x64e   : > { %v2660_v56 = vpop.f32.mrf.mxu0  ;;  %v2712_v57 = vpop.f32.mrf.mxu1 }
 0x650   : > { %v6244_v58 = vpop.f32.mrf.mxu0  ;;  %v6252_v59 = vpop.f32.mrf.mxu1 }
 0x652   : > { %v7415_v60 = vpop.f32.mrf.mxu0  ;;  %v7417_v61 = vpop.f32.mrf.mxu1 }
 0x654   : > { %v6259_v62 = vpop.f32.mrf.mxu0  ;;  %v6267_v63 = vpop.f32.mrf.mxu1 }
 0x656   : > { %v2764_v0 = vpop.f32.mrf.mxu0  ;;  %v2816_v2 = vpop.f32.mrf.mxu1 }
 0x658   : > { %v6260_v3 = vpop.f32.mrf.mxu0  ;;  %v6268_v4 = vpop.f32.mrf.mxu1 }
 0x65a   : > { %v7419_v5 = vpop.f32.mrf.mxu0  ;;  %v7421_v6 = vpop.f32.mrf.mxu1 }
 0x65c   : > { %v6275_v7 = vpop.f32.mrf.mxu0  ;;  %v6283_v8 = vpop.f32.mrf.mxu1 }
 0x65e   : > { %v2868_v9 = vpop.f32.mrf.mxu0  ;;  %v2920_v10 = vpop.f32.mrf.mxu1 }
 0x660   : > { %v6276_v11 = vpop.f32.mrf.mxu0  ;;  %v6284_v12 = vpop.f32.mrf.mxu1 }
 0x6e8   : > { %v2996_v13 = vpop.f32.mrf.mxu1 }
 0x6e9   : > { %v3532_v14 = vmul.f32 0.5, %v2996_v13 }
 0x6ea   : > { %v6289_v15 = vpop.f32.mrf.mxu1 }
 0x6eb   : > { %v3541_v17 = vsel %vm3540_vm5, %v3532_v14, -inf }
 0x6ec   : > { %3542 = vmax.xlane.f32.xlu0 %v3541_v17  ;;  %v3072_v18 = vpop.f32.mrf.mxu1 }
 0x6ed   : > { %v3533_v19 = vmul.f32 0.5, %v3072_v18 }
 0x6ee   : > { %v6294_v20 = vpop.f32.mrf.mxu1 }
 0x6ef   : > { %v3544_v21 = vsel %vm3540_vm5, %v3533_v19, -inf }
 0x6f0   : > { %3545 = vmax.xlane.f32.xlu1 %v3544_v21  ;;  %v3148_v24 = vpop.f32.mrf.mxu0  ;;  %v3224_v25 = vpop.f32.mrf.mxu1 }
 0x6f1   : > { %v3534_v26 = vmul.f32 0.5, %v3148_v24  ;;  %v3535_v27 = vmul.f32 0.5, %v3224_v25 }
 0x6f2   : > { %v6299_v22 = vpop.f32.mrf.mxu0  ;;  %v6304_v23 = vpop.f32.mrf.mxu1 }
 0x6f3   : > { %v3550_v28 = vsel %vm3540_vm5, %v3535_v27, -inf  ;;  %v3547_v29 = vsel %vm3540_vm5, %v3534_v26, -inf }
 0x6f4   : > { %3551 = vmax.xlane.f32.xlu1 %v3550_v28  ;;  %3548 = vmax.xlane.f32.xlu0 %v3547_v29 }
 0x6f8   : > { %v3300_v32 = vpop.f32.mrf.mxu0  ;;  %v3376_v33 = vpop.f32.mrf.mxu1 }
 0x6f9   : > { %v3536_v34 = vmul.f32 0.5, %v3300_v32  ;;  %v3537_v35 = vmul.f32 0.5, %v3376_v33 }
 0x6fa   : > { %v6309_v36 = vpop.f32.mrf.mxu0  ;;  %v6314_v37 = vpop.f32.mrf.mxu1 }
 0x6fb   : > { %v3556_v38 = vsel %vm3540_vm5, %v3537_v35, -inf  ;;  %v3553_v39 = vsel %vm3540_vm5, %v3536_v34, -inf  ;;  %v5797_v36 = vld [vmem:[%s7841_s6 + $0x2] ss:$0 sm:$0xff] }
 0x6fc   : > { %3557 = vmax.xlane.f32.xlu1 %v3556_v38  ;;  %3554 = vmax.xlane.f32.xlu0 %v3553_v39  ;;  %v2658_v39 = vadd.f32 %v5797_v36, %v7411_v52  ;;  %v4220_v36 = vld [vmem:[%s7842_s3 + $0xe] sm:$0x3] }
 0x700   : > { %v3452_v40 = vpop.f32.mrf.mxu0  ;;  %v3528_v41 = vpop.f32.mrf.mxu1 }
 0x701   : > { %v3538_v42 = vmul.f32 0.5, %v3452_v40  ;;  %v3539_v43 = vmul.f32 0.5, %v3528_v41  ;;  %v5798_v41 = vld [vmem:[%s7841_s6 + $0x3] ss:$0 sm:$0xff] }
 0x702   : > { %v6319_v30 = vpop.f32.mrf.mxu0  ;;  %v6324_v31 = vpop.f32.mrf.mxu1 }
 0x703   : > { %v3562_v44 = vsel %vm3540_vm5, %v3539_v43, -inf  ;;  %v3559_v45 = vsel %vm3540_vm5, %v3538_v42, -inf  ;;  %v2710_v31 = vadd.f32 %v5798_v41, %v7413_v53 }
 0x704   : > { %3563 = vmax.xlane.f32.xlu1 %v3562_v44  ;;  %3560 = vmax.xlane.f32.xlu0 %v3559_v45  ;;  %v5800_v44 = vld [vmem:[%s7841_s6 + $0x5] ss:$0 sm:$0xff]  ;;  %v5799_v45 = vld [vmem:[%s7841_s6 + $0x4] ss:$0 sm:$0xff] }
 0x705   : > { %v2762_v53 = vadd.f32 %v5799_v45, %v7415_v60  ;;  %v6641_v45 = vld [vmem:[%s7843_s5] sm:$0xff]  }
 0x775   : > { %v3543_v46 = vpop.xlane.xlu0 %3542 }
 0x776   : > { %v3565_v47 = vsub.f32 %v3532_v14, %v3543_v46 }
 0x778   : > { %v3573_v48 = vmul.f32 1.442695, %v3565_v47 }
 0x779   : > { %v3546_v49 = vpop.xlane.xlu1 %3545 }
 0x77a   : > { %6655 = vpow2.f32 %v3573_v48  ;;  %v3566_v50 = vsub.f32 %v3533_v19, %v3546_v49  ;;  %v2814_v48 = vadd.f32 %v5800_v44, %v7417_v61  ;;  %v5802_v61 = vld [vmem:[%s7841_s6 + $0x7] ss:$0 sm:$0xff]  ;;  %v6639_v44 = vld [vmem:[%s7843_s5 + $0x8] sm:$0xff]   ;;  %s7846_s5 = sld [smem:[#allocation30_spill]] }
 0x77c   : > { %v3575_v51 = vmul.f32 1.442695, %v3566_v50 }
 0x77d   : > { %v3552_v54 = vpop.xlane.xlu1 %3551  ;;  %v3549_v55 = vpop.xlane.xlu0 %3548 }
 0x77e   : > { %6657 = vpow2.f32 %v3575_v51  ;;  %v3568_v56 = vsub.f32 %v3535_v27, %v3552_v54  ;;  %v3567_v57 = vsub.f32 %v3534_v26, %v3549_v55  ;;  %v5801_v54 = vld [vmem:[%s7841_s6 + $0x6] ss:$0 sm:$0xff]  ;;  %s7844_s6 = sld [smem:[#allocation28_spill]] }
 0x780   : > { %v3579_v58 = vmul.f32 1.442695, %v3568_v56  ;;  %v3577_v59 = vmul.f32 1.442695, %v3567_v57  ;;  %v2918_v57 = vadd.f32 %v5802_v61, %v7421_v6 }
 0x782   : > { %6659 = vpow2.f32 %v3579_v58 }
 0x783   : > { %6661 = vpow2.f32 %v3577_v59  ;;  %v2866_v59 = vadd.f32 %v5801_v54, %v7419_v5 }
 0x785   : > { %v3558_v62 = vpop.xlane.xlu1 %3557  ;;  %v3555_v63 = vpop.xlane.xlu0 %3554 }
 0x786   : > { %v3570_v0 = vsub.f32 %v3537_v35, %v3558_v62  ;;  %v3569_v2 = vsub.f32 %v3536_v34, %v3555_v63 }
 0x787   : > { %v6656_v3 = vpop.eup %6655 }
 0x788   : > { %v3583_v4 = vmul.f32 1.442695, %v3570_v0  ;;  %v3581_v7 = vmul.f32 1.442695, %v3569_v2  ;;  %v3589_v8 = vsel %vm3540_vm5, %v6656_v3, 0.0 }
 0x789   : > { %3590 = vadd.xlane.f32.xlu0 %v3589_v8  ;;  %v4213_v0 = vld [vmem:[%s7842_s3] sm:$0x3] }
 0x78a   : > { %6663 = vpow2.f32 %v3583_v4  ;;  %v4234_v2 = vsel %vm4232_vm6, %v4213_v0, 0 }
 0x78b   : > { %v6658_v9 = vpop.eup %6657  ;;  %6665 = vpow2.f32 %v3581_v7  ;;  %v4215_v7 = vld [vmem:[%s7842_s3 + $0x4] sm:$0x3] }
 0x78c   : > { %v3592_v10 = vsel %vm3540_vm5, %v6658_v9, 0.0 }
 0x78d   : > { %3593 = vadd.xlane.f32.xlu1 %v3592_v10  ;;  %v3564_v11 = vpop.xlane.xlu1 %3563  ;;  %v3561_v12 = vpop.xlane.xlu0 %3560  ;;  %v4326_v10 = vsel %vm4232_vm6, %v4215_v7, 0 }
 0x78e   : > { %v3572_v13 = vsub.f32 %v3539_v43, %v3564_v11  ;;  %v3571_v14 = vsub.f32 %v3538_v42, %v3561_v12  ;;  %v4216_v12 = vld [vmem:[%s7842_s3 + $0x6] sm:$0x3] }
 0x78f   : > { %v6660_v15 = vpop.eup %6659 }
 0x790   : > { %v6662_v17 = vpop.eup %6661  ;;  %v3587_v18 = vmul.f32 1.442695, %v3572_v13  ;;  %v3585_v19 = vmul.f32 1.442695, %v3571_v14  ;;  %v3598_v20 = vsel %vm3540_vm5, %v6660_v15, 0.0 }
 0x791   : > { %3599 = vadd.xlane.f32.xlu1 %v3598_v20  ;;  %v3595_v21 = vsel %vm3540_vm5, %v6662_v17, 0.0 }
 0x792   : > { %6667 = vpow2.f32 %v3587_v18  ;;  %3596 = vadd.xlane.f32.xlu0 %v3595_v21  ;;  %v4217_v18 = vld [vmem:[%s7842_s3 + $0x8] sm:$0x3] }
 0x793   : > { %6669 = vpow2.f32 %v3585_v19 }
 0x797   : > { %v7435_v24 = vpop.eup %6663 }
 0x798   : > { %v7437_v25 = vpop.eup %6665  ;;  %v3604_v26 = vsel %vm3540_vm5, %v7435_v24, 0.0 }
 0x799   : > { %3605 = vadd.xlane.f32.xlu1 %v3604_v26  ;;  %v3601_v27 = vsel %vm3540_vm5, %v7437_v25, 0.0  ;;  %v4218_v26 = vld [vmem:[%s7842_s3 + $0xa] sm:$0x3] }
 0x79a   : > { %3602 = vadd.xlane.f32.xlu0 %v3601_v27 }
 0x79f   : > { %v7443_v22 = vpop.eup %6667 }
 0x7a0   : > { %v7445_v23 = vpop.eup %6669  ;;  %v3610_v28 = vsel %vm3540_vm5, %v7443_v22, 0.0 }
 0x7a1   : > { %3611 = vadd.xlane.f32.xlu1 %v3610_v28  ;;  %v3607_v29 = vsel %vm3540_vm5, %v7445_v23, 0.0  ;;  %v4219_v28 = vld [vmem:[%s7842_s3 + $0xc] sm:$0x3] }
 0x7a2   : > { %3608 = vadd.xlane.f32.xlu0 %v3607_v29 }
 0x812   : > { %v3591_v32 = vpop.xlane.xlu0 %3590 }
 0x813   : > { %6671 = vrcp.f32 %v3591_v32 }
 0x816   : > { %v3594_v33 = vpop.xlane.xlu1 %3593 }
 0x817   : > { %6673 = vrcp.f32 %v3594_v33 }
 0x81a   : > { %v3600_v34 = vpop.xlane.xlu1 %3599 }
 0x81b   : > { %6675 = vrcp.f32 %v3600_v34  ;;  %v3597_v35 = vpop.xlane.xlu0 %3596 }
 0x81c   : > { %6677 = vrcp.f32 %v3597_v35  ;;  %v4510_v35 = vsel %vm4232_vm6, %v4219_v28, 0 }
 0x820   : > { %v6672_v37 = vpop.eup %6671 }
 0x821   : > { %v3621_v38 = vmul.f32 %v6672_v37, %v6656_v3  ;;  %v4214_v3 = vld [vmem:[%s7842_s3 + $0x2] sm:$0x3]  ;;  %s7845_s3 = sld [smem:[#allocation25_spill]] }
 0x822   : > { %v3606_v40 = vpop.xlane.xlu1 %3605  ;;  %v4280_v4 = vsel %vm4232_vm6, %v4214_v3, 0 }
 0x823   : > { %6679 = vrcp.f32 %v3606_v40  ;;  %v3603_v42 = vpop.xlane.xlu0 %3602  ;;  %6328 = vmatmul.mubr.msk.f32.vlgmr.msra.gmra.mxu0 %vm3540_vm5, %v3621_v38 }
 0x824   : > { %v6674_v43 = vpop.eup %6673  ;;  %6681 = vrcp.f32 %v3603_v42  ;;  %6336 = vmatpush3.msra.mxu0 %v2658_v39  ;;  %6337 = vmatprep.mubr.msk.f32.mxu0 %vm6861_vm1, %v6860_v1  ;;  %v4556_v39 = vsel %vm4232_vm6, %v4220_v36, 0 }
 0x825   : > { %v3622_v30 = vmul.f32 %v6674_v43, %v6658_v9  ;;  %6345 = vmatprep.subr.mxu0 %v6860_v1 }
 0x827   : > { %6333 = vmatmul.mubr.msk.f32.vlgmr.msra.gmra.mxu1 %vm3540_vm5, %v3622_v30 }
 0x828   : > { %v6676_v52 = vpop.eup %6675  ;;  %6341 = vmatpush3.msra.mxu1 %v2710_v31  ;;  %6342 = vmatprep.mubr.msk.f32.mxu1 %vm6861_vm1, %v6860_v1 }
 0x829   : > { %v6678_v46 = vpop.eup %6677  ;;  %6350 = vmatprep.subr.mxu1 %v6860_v1  ;;  %v3624_v47 = vmul.f32 %v6676_v52, %v6660_v15  ;;  %v4372_v15 = vsel %vm4232_vm6, %v4216_v12, 0  ;;  %v6640_v52 = vld [vmem:[%s7844_s6 + $0x8] sm:$0xff]  }
 0x82a   : > { %v3612_v49 = vpop.xlane.xlu1 %3611  ;;  %v3623_v50 = vmul.f32 %v6678_v46, %v6662_v17  ;;  %v6642_v46 = vld [vmem:[%s7844_s6] sm:$0xff]   ;;  %s7847_s6 = sld [smem:[#allocation10_spill]] }
 0x82b   : > { %6683 = vrcp.f32 %v3612_v49  ;;  %v3609_v51 = vpop.xlane.xlu0 %3608  ;;  %6343 = vmatmul.mubr.msk.f32.vlgmr.msra.gmra.mxu1 %vm3540_vm5, %v3624_v47 }
 0x82c   : > { %6685 = vrcp.f32 %v3609_v51  ;;  %6338 = vmatmul.mubr.msk.f32.vlgmr.msra.gmra.mxu0 %vm3540_vm5, %v3623_v50  ;;  %6351 = vmatpush3.msra.mxu1 %v2814_v48 }
 0x82d   : > { %6346 = vmatpush3.msra.mxu0 %v2762_v53  ;;  %6347 = vmatprep.mubr.msk.f32.mxu0 %vm6861_vm1, %v6860_v1 }
 0x82e   : > { %6352 = vmatprep.mubr.msk.f32.mxu1 %vm6861_vm1, %v6860_v1  ;;  %6355 = vmatprep.subr.mxu0 %v6860_v1 }
 0x82f   : > { %6360 = vmatprep.subr.mxu1 %v6860_v1 }
 0x830   : > { %v6680_v60 = vpop.eup %6679  ;;  %s1057_s8 = scalar_lea.vmem %s7847_s6, %s7102_s2  ;;  %s7593_s6 = sand.u32 1, %s6817_s10  }
 0x831   : > { %v6682_v55 = vpop.eup %6681  ;;  %v3626_v56 = vmul.f32 %v6680_v60, %v7435_v24  ;;  %s7796_s2 = sshll.u32 %s7593_s6, 3  ;;  %s5495_s17 = scalar_lea.sflag [#allocation3], %s7593_s6 }
 0x832   : > { %v3625_v58 = vmul.f32 %v6682_v55, %v7437_v25  ;;  %v4418_v25 = vsel %vm4232_vm6, %v4217_v18, 0  ;;  %s7599_s9 = scalar_lea.vmem [#allocation2], %s7796_s2  ;;  %s5892_s2 = sshll.u32 %s7063_s0, 7 }
 0x833   : > { %6353 = vmatmul.mubr.msk.f32.vlgmr.msra.gmra.mxu1 %vm3540_vm5, %v3626_v56  ;;  %s5517_s14 = sshll.u32 %s7599_s9, 4  ;;  %s5518_s14 = int_to_ptr.vmem [resolvable:$true] %s5517_s14 }
 0x834   : > { %6348 = vmatmul.mubr.msk.f32.vlgmr.msra.gmra.mxu0 %vm3540_vm5, %v3625_v58  ;;  %6361 = vmatpush3.msra.mxu1 %v2918_v57  ;;  %s6735_s19 = scalar_lea.vmem %s5518_s14, 128 }
 0x835   : > { %6356 = vmatpush3.msra.mxu0 %v2866_v59  ;;  %6357 = vmatprep.mubr.msk.f32.mxu0 %vm6861_vm1, %v6860_v1  ;;  %p6736_p11 = scmp.ne.s32.totalorder %s5518_s14, %s6735_s19 }
 0x836   : > { %6362 = vmatprep.mubr.msk.f32.mxu1 %vm6861_vm1, %v6860_v1  ;;  %6365 = vmatprep.subr.bf16.mxu0 %v6860_v1 }
 0x837   : > { %6371 = vmatprep.subr.bf16.mxu1 %v6860_v1  ;;  %p6737_p12 = pnand %p6736_p11, %p7080_p5 }
 0x838   : > { %v6684_v6 = vpop.eup %6683 }
 0x839   : > { %v6686_v5 = vpop.eup %6685  ;;  %v3628_v62 = vmul.f32 %v6684_v6, %v7443_v22  ;;  %p6738_p13 = pneg %p6737_p12 }
 0x83a   : > { %v3627_v63 = vmul.f32 %v6686_v5, %v7445_v23  ;;  %v4464_v23 = vsel %vm4232_vm6, %v4218_v26, 0 }
 0x83b   : > { %6363 = vmatmul.mubr.msk.f32.vlgmr.msra.gmra.mxu1 %vm3540_vm5, %v3628_v62 }
 0x83c   : > { %6358 = vmatmul.mubr.msk.f32.vlgmr.msra.gmra.mxu0 %vm3540_vm5, %v3627_v63  ;;  %6373 = vmatprep.mubr.msk.bf16.mxu1 %vm6861_vm1, %v6860_v1 }
 0x83d   : > { %6367 = vmatprep.mubr.msk.bf16.mxu0 %vm6861_vm1, %v6860_v1  ;;  %6366 = vmatpush3.bf16.msra.mxu0 %v4234_v2 }
 0x83e   : > { %6377 = vmatprep.subr.bf16.mxu0 %v6860_v1  ;;  %6372 = vmatpush3.bf16.msra.mxu1 %v4280_v4 }
 0x83f   : > { %6383 = vmatprep.subr.bf16.mxu1 %v6860_v1 }
 0x8e3   : > { %v3698_v8 = vpop.f32.mrf.mxu0 }
 0x8e4   : > { %v4221_v9 = vpack.c.bf16 %v3698_v8, %v3698_v8 }
 0x8e5   : > { %v6329_v11 = vpop.f32.mrf.mxu0 }
 0x8e6   : > { %6368 = vmatmul.mubr.msk.bf16.vlgmr.msra.gmra.mxu0 %vm2923_vm4, %v4221_v9 }
 0x8e7   : > { %v3771_v13 = vpop.f32.mrf.mxu1  ;;  %6378 = vmatpush3.bf16.msra.mxu0 %v4326_v10  ;;  %6379 = vmatprep.mubr.msk.bf16.mxu0 %vm6861_vm1, %v6860_v1 }
 0x8e8   : > { %v4222_v14 = vpack.c.bf16 %v3771_v13, %v3771_v13  ;;  %6389 = vmatprep.subr.bf16.mxu0 %v6860_v1 }
 0x8e9   : > { %v6334_v17 = vpop.f32.mrf.mxu1 }
 0x8ea   : > { %6374 = vmatmul.mubr.msk.bf16.vlgmr.msra.gmra.mxu1 %vm2923_vm4, %v4222_v14 }
 0x8eb   : > { %v3917_v19 = vpop.f32.mrf.mxu1  ;;  %6384 = vmatpush3.bf16.msra.mxu1 %v4372_v15  ;;  %6385 = vmatprep.mubr.msk.bf16.mxu1 %vm6861_vm1, %v6860_v1 }
 0x8ec   : > { %v3844_v20 = vpop.f32.mrf.mxu0  ;;  %6395 = vmatprep.subr.bf16.mxu1 %v6860_v1  ;;  %v4224_v22 = vpack.c.bf16 %v3917_v19, %v3917_v19 }
 0x8ed   : > { %v4223_v21 = vpack.c.bf16 %v3844_v20, %v3844_v20  ;;  %v6344_v24 = vpop.f32.mrf.mxu1 }
 0x8ee   : > { %v6339_v27 = vpop.f32.mrf.mxu0 }
 0x8ef   : > { %6380 = vmatmul.mubr.msk.bf16.vlgmr.msra.gmra.mxu0 %vm2923_vm4, %v4223_v21 }
 0x8f0   : > { %6390 = vmatpush3.bf16.msra.mxu0 %v4418_v25  ;;  %6391 = vmatprep.mubr.msk.bf16.mxu0 %vm6861_vm1, %v6860_v1 }
 0x8f1   : > { %6401 = vmatprep.subr.bf16.mxu0 %v6860_v1 }
 0x8f2   : > { %6386 = vmatmul.mubr.msk.bf16.vlgmr.msra.gmra.mxu1 %vm2923_vm4, %v4224_v22 }
 0x8f3   : > { %v4063_v29 = vpop.f32.mrf.mxu1  ;;  %6396 = vmatpush3.bf16.msra.mxu1 %v4464_v23  ;;  %6397 = vmatprep.mubr.msk.bf16.mxu1 %vm6861_vm1, %v6860_v1 }
 0x8f4   : > { %v3990_v32 = vpop.f32.mrf.mxu0  ;;  %6407 = vmatprep.subr.bf16.mxu1 %v6860_v1  ;;  %v4226_v38 = vpack.c.bf16 %v4063_v29, %v4063_v29 }
 0x8f5   : > { %v4225_v33 = vpack.c.bf16 %v3990_v32, %v3990_v32  ;;  %v6354_v34 = vpop.f32.mrf.mxu1  ;;  %v5859_v32 = vld [vmem:[%s7845_s3] ss:$0 sm:$0xff]  ;;  %s7848_s3 = sld [smem:[#allocation27_spill]] }
 0x8f6   : > { %v6349_v37 = vpop.f32.mrf.mxu0 }
 0x8f7   : > { %6392 = vmatmul.mubr.msk.bf16.vlgmr.msra.gmra.mxu0 %vm2923_vm4, %v4225_v33 }
 0x8f8   : > { %6402 = vmatpush3.bf16.msra.mxu0 %v4510_v35  ;;  %6403 = vmatprep.mubr.msk.bf16.mxu0 %vm6861_vm1, %v6860_v1 }
 0x8f9   : > { %6413 = vmatprep.subr.bf16.mxu0 %v6860_v1 }
 0x8fa   : > { %6398 = vmatmul.mubr.msk.bf16.vlgmr.msra.gmra.mxu1 %vm2923_vm4, %v4226_v38  ;;  %v7564_v38 = vld [vmem:[%s7846_s5 + $0x8] sm:$0xff]  }
 0x8fb   : > { %v4209_v40 = vpop.f32.mrf.mxu1  ;;  %6408 = vmatpush3.bf16.msra.mxu1 %v4556_v39  ;;  %6409 = vmatprep.mubr.msk.bf16.mxu1 %vm6861_vm1, %v6860_v1 }
 0x8fc   : > { %v4136_v41 = vpop.f32.mrf.mxu0  ;;  %6421 = vmatprep.subr.bf16.mxu1 %v6860_v1  ;;  %v4228_v31 = vpack.c.bf16 %v4209_v40, %v4209_v40  ;;  %v7572_v40 = vld [vmem:[%s7846_s5] sm:$0xff]   ;;  %s7850_s5 = sld [smem:[#allocation29_spill]] }
 0x8fd   : > { %v4227_v42 = vpack.c.bf16 %v4136_v41, %v4136_v41  ;;  %v6364_v43 = vpop.f32.mrf.mxu1  ;;  %v4758_v41 = vld [vmem:[%s1057_s8] sm:$0x1]  ;;  %s7849_s8 = sld [smem:[#allocation31_spill]] }
 0x8fe   : > { %v6359_v30 = vpop.f32.mrf.mxu0 }
 0x8ff   : > { %6404 = vmatmul.mubr.msk.bf16.vlgmr.msra.gmra.mxu0 %vm2923_vm4, %v4227_v42  ;;  %v5860_v42 = vld [vmem:[%s7848_s3] ss:$0 sm:$0xff]  ;;  %s6862_s3 = smov 64  }
 0x900   : > { %6417 = vmatprep.mubr.msk.bf16.mxu0 %vm6861_vm1, %v6860_v1  ;;  %6414 = vmatpush3.bf16.msra.mxu0 %v6639_v44 }
 0x901   : > { %6415 = vmatprep.subr.bf16.mxu0 %v6860_v1 }
 0x902   : > { %6410 = vmatmul.mubr.msk.bf16.vlgmr.msra.gmra.mxu1 %vm2923_vm4, %v4228_v31 }
 0x903   : > { %6425 = vmatprep.mubr.msk.bf16.mxu1 %vm6861_vm1, %v6860_v1  ;;  %6422 = vmatpush3.bf16.msra.mxu1 %v6640_v52 }
 0x904   : > { %6423 = vmatprep.subr.bf16.mxu1 %v6860_v1  ;;  %6416 = vmatpush3.bf16.msra.mxu0 %v6641_v45 }
 0x905   : > { %6429 = vmatprep.subr.bf16.mxu0 %v6860_v1 }
 0x907   : > { %6424 = vmatpush3.bf16.msra.mxu1 %v6642_v46 }
 0x908   : > { %6437 = vmatprep.subr.bf16.mxu1 %v6860_v1 }
 0x9a6   : > { %v4270_v47 = vpop.f32.mrf.mxu0 }
 0x9a7   : > { %v4598_v62 = vsel %vm1134_vm3, %v4270_v47, 0.0 }
 0x9a8   : > { %v6369_v48 = vpop.f32.mrf.mxu0 }
 0x9aa   : > { %v4273_v49 = vpop.f32.mrf.mxu0  ;;  %v4316_v50 = vpop.f32.mrf.mxu1 }
 0x9ab   : > { %v4599_v59 = vsel %vm1134_vm3, %v4316_v50, 0.0  ;;  %v7603_v49 = vld [vmem:[%s7849_s8] sm:$0x1]  ;;  %s6864_s8 = smov 32  }
 0x9ac   : > { %v6370_v53 = vpop.f32.mrf.mxu0  ;;  %v6375_v51 = vpop.f32.mrf.mxu1  ;;  %v4600_v2 = vadd.f32 %v4599_v59, %v4598_v62 }
 0x9ae   : > { %v4319_v61 = vpop.f32.mrf.mxu1 }
 0x9af   : > { %v4362_v60 = vpop.f32.mrf.mxu0 }
 0x9b0   : > { %v6376_v54 = vpop.f32.mrf.mxu1  ;;  %v4601_v63 = vsel %vm1134_vm3, %v4362_v60, 0.0 }
 0x9b1   : > { %v6381_v55 = vpop.f32.mrf.mxu0  ;;  %v4602_v8 = vadd.f32 %v4601_v63, %v4600_v2  ;;  %v5864_v54 = vld [vmem:[%s7850_s5] ss:$0 sm:$0xff]  ;;  %v4840_v2 = vlaneseq  ;;  %s6863_s5 = smov 96  }
 0x9b2   : > { %v4408_v56 = vpop.f32.mrf.mxu1 }
 0x9b3   : > { %v4365_v57 = vpop.f32.mrf.mxu0  ;;  %v4603_v4 = vsel %vm1134_vm3, %v4408_v56, 0.0 }
 0x9b4   : > { %v6387_v58 = vpop.f32.mrf.mxu1  ;;  %v4604_v12 = vadd.f32 %v4603_v4, %v4602_v8 }
 0x9b5   : > { %v6382_v6 = vpop.f32.mrf.mxu0 }
 0x9b6   : > { %v4411_v5 = vpop.f32.mrf.mxu1 }
 0x9b7   : > { %v4454_v0 = vpop.f32.mrf.mxu0 }
 0x9b8   : > { %v6388_v3 = vpop.f32.mrf.mxu1  ;;  %v4605_v10 = vsel %vm1134_vm3, %v4454_v0, 0.0 }
 0x9b9   : > { %v6393_v7 = vpop.f32.mrf.mxu0  ;;  %v4606_v17 = vadd.f32 %v4605_v10, %v4604_v12  ;;  %v4841_v3 = vshrl.u32 %v4840_v2, 7 }
 0x9ba   : > { %v4500_v9 = vpop.f32.mrf.mxu1 }
 0x9bb   : > { %v4457_v11 = vpop.f32.mrf.mxu0  ;;  %v4607_v14 = vsel %vm1134_vm3, %v4500_v9, 0.0  ;;  %v4842_v4 = vsub.s32 0, %v4841_v3 }
 0x9bc   : > { %v6399_v13 = vpop.f32.mrf.mxu1  ;;  %v4608_v20 = vadd.f32 %v4607_v14, %v4606_v17 }
 0x9bd   : > { %v6394_v15 = vpop.f32.mrf.mxu0  ;;  %v4843_v8 = vrot.slane %v4758_v41, %v4842_v4 }
 0x9be   : > { %v4503_v18 = vpop.f32.mrf.mxu1 }
 0x9bf   : > { %v4546_v19 = vpop.f32.mrf.mxu0 }
 0x9c0   : > { %v4609_v21 = vsel %vm1134_vm3, %v4546_v19, 0.0  ;;  %v6400_v24 = vpop.f32.mrf.mxu1 }
 0x9c1   : > { %v6405_v25 = vpop.f32.mrf.mxu0  ;;  %v4610_v26 = vadd.f32 %v4609_v21, %v4608_v20 }
 0x9c2   : > { %v4592_v27 = vpop.f32.mrf.mxu1 }
 0x9c3   : > { %v4549_v22 = vpop.f32.mrf.mxu0  ;;  %v4611_v23 = vsel %vm1134_vm3, %v4592_v27, 0.0 }
 0x9c4   : > { %v4612_v28 = vadd.f32 %v4611_v23, %v4610_v26  ;;  %v6411_v29 = vpop.f32.mrf.mxu1 }
 0x9c5   : > { %v6406_v33 = vpop.f32.mrf.mxu0 }
 0x9c6   : > { %v4613_v34 = vadd.f32 %v4612_v28, %v7156_v16  ;;  %v4595_v35 = vpop.f32.mrf.mxu1  ;;  %v4759_v16 = vpack.c.bf16 %v4758_v41, %v4758_v41 }
 0x9c8   : > { %v4621_v36 = vadd.f32 %v5859_v32, %v4613_v34  ;;  %v6412_v37 = vpop.f32.mrf.mxu1 }
 0x9ca   : > { %v4626_v39 = vpack.c.bf16 %v4621_v36, %v4621_v36 }
 0x9cc   : > { %6418 = vmatmul.mubr.msk.bf16.vlgmr.msra.gmra.mxu0 %vm1134_vm3, %v4626_v39  ;;  %6426 = vmatmul.mubr.msk.bf16.vlgmr.msra.gmra.mxu1 %vm1134_vm3, %v4626_v39 }
 0x9cd   : > { %6430 = vmatpush3.bf16.msra.mxu0 %v7564_v38  ;;  %6433 = vmatprep.mubr.msk.bf16.mxu0 %vm6861_vm1, %v6860_v1 }
 0x9ce   : > { %6431 = vmatprep.subr.bf16.mxu0 %v6860_v1  ;;  %6438 = vmatpush3.bf16.msra.mxu1 %v7564_v38 }
 0x9cf   : > { %6439 = vmatprep.subr.bf16.mxu1 %v6860_v1  ;;  %6441 = vmatprep.mubr.msk.bf16.mxu1 %vm6861_vm1, %v6860_v1 }
 0x9d1   : > { %6432 = vmatpush3.bf16.msra.mxu0 %v7572_v40 }
 0x9d2   : > { %6440 = vmatpush3.bf16.msra.mxu1 %v7572_v40  ;;  %6445 = vmatprep.subr.bf16.mxu0 %v6860_v1 }
 0x9d3   : > { %6453 = vmatprep.subr.bf16.mxu1 %v6860_v1 }
 0x9d4   : > { %6434 = vmatmul.mubr.msk.bf16.vlgmr.msra.gmra.mxu0 %vm1134_vm3, %v4759_v16 }
 0x9d5   : > { %6446 = vmatpush3.bf16.msra.mxu0 %v7564_v38  ;;  %6449 = vmatprep.mubr.msk.bf16.mxu0 %vm6861_vm1, %v6860_v1 }
 0x9d6   : > { %6447 = vmatprep.subr.bf16.mxu0 %v6860_v1 }
 0x9d9   : > { %6448 = vmatpush3.bf16.msra.mxu0 %v7572_v40 }
 0x9da   : > { %6461 = vmatprep.subr.bf16.mxu0 %v6860_v1 }
 0xa8c   : > { %v4683_v43 = vpop.f32.mrf.mxu0  ;;  %v4747_v30 = vpop.f32.mrf.mxu1 }
 0xa8d   : > { %v4684_v31 = vadd.f32 %v5860_v42, %v4683_v43  ;;  %v7608_v55 = vadd.f32 %v5864_v54, %v4747_v30 }
 0xa8e   : > { %v6419_v44 = vpop.f32.mrf.mxu0  ;;  %v6427_v52 = vpop.f32.mrf.mxu1 }
 0xa8f   : > { %4689 = vst [vmem:[%s7599_s9] sm:$0xff] %v4684_v31 }
 0xa90   : > { %v4686_v45 = vpop.f32.mrf.mxu0  ;;  %v4750_v46 = vpop.f32.mrf.mxu1 }
 0xa92   : > { %v6420_v47 = vpop.f32.mrf.mxu0  ;;  %v6428_v48 = vpop.f32.mrf.mxu1 }
 0xa94   : > { %v4809_v50 = vpop.f32.mrf.mxu0 }
 0xa95   : > { %v4810_v53 = vadd.f32 %v4809_v50, %v7603_v49 }
 0xa96   : > { %v6435_v51 = vpop.f32.mrf.mxu0 }
 0xa97   : > { %4823 = vrot.lane.b32.xlu0 %v4810_v53, %s6862_s3  ;;  %v4815_v56 = vadd.f32 %v4810_v53, %v7608_v55 }
 0xa98   : > { %v4812_v61 = vpop.f32.mrf.mxu0 }
 0xa99   : > { %v5871_v57 = vmul.f32 -1.442695, %v4815_v56 }
 0xa9a   : > { %v6436_v60 = vpop.f32.mrf.mxu0 }
 0xa9b   : > { %6687 = vpow2.f32 %v5871_v57 }
 0xaa8   : > { %v6688_v58 = vpop.eup %6687 }
 0xaa9   : > { %v4819_v59 = vadd.f32 1.0, %v6688_v58 }
 0xaab   : > { %6689 = vrcp.f32 %v4819_v59 }
 0xab8   : > { %v6690_v6 = vpop.eup %6689 }
 0xab9   : > { %v4833_v10 = vsub.f32 1.0, %v6690_v6 }
 0xb09   : > { %v4824_v5 = vpop.permute.xlu0 %4823 }
 0xb0a   : > { %v4826_v62 = vmul.f32 %v6690_v6, %v4824_v5 }
 0xb0c   : > { %4828 = vrot.lane.b32.xlu1 %v4826_v62, %s6862_s3 }
 0xb7e   : > { %v4829_v63 = vpop.permute.xlu1 %4828 }
 0xb7f   : > { %v4831_v0 = vadd.f32 %v4829_v63, %v7608_v55 }
 0xb81   : > { %6691 = vtanh.f32 %v4831_v0 }
 0xb8e   : > { %v6692_v7 = vpop.eup %6691 }
 0xb8f   : > { %4835 = vrot.lane.b32.xlu1 %v6692_v7, %s6863_s5 }
 0xb93   : > { %4844 = vrot.lane.b32.xlu1 %v4843_v8, %s6864_s8  ;;  %s7851_s8 = sld [smem:[#allocation32_spill]] }
 0xc01   : > { %v4836_v9 = vpop.permute.xlu1 %4835 }
 0xc02   : > { %v4838_v12 = vmul.f32 %v4836_v9, %v4833_v10 }
 0xc05   : > { %v4845_v11 = vpop.permute.xlu1 %4844 }
 0xc06   : > { %v4847_v13 = vmul.f32 %v6690_v6, %v4845_v11 }
 0xc08   : > { %v7614_v14 = vadd.f32 %v4847_v13, %v4838_v12 }
 0xc0a   : > { %v4849_v15 = vpack.c.bf16 %v7614_v14, %v7614_v14  ;;  %v4923_v37 = vrot.slane %v7614_v14, 7 }
 0xc0c   : > { %4851 = vrot.lane.b32.xlu0 %v4849_v15, %s6863_s5 }
 0xc7e   : > { %v4852_v17 = vpop.permute.xlu0 %4851 }
 0xc7f   : > { %6442 = vmatmul.mubr.msk.bf16.vlgmr.msra.gmra.mxu1 %vm1134_vm3, %v4852_v17 }
 0xc80   : > { %6454 = vmatpush3.bf16.msra.mxu1 %v7564_v38  ;;  %6457 = vmatprep.mubr.msk.bf16.mxu1 %vm6861_vm1, %v6860_v1 }
 0xc81   : > { %6455 = vmatprep.subr.bf16.mxu1 %v6860_v1 }
 0xc84   : > { %6456 = vmatpush3.bf16.msra.mxu1 %v7572_v40 }
 0xc85   : > { %6469 = vmatprep.subr.bf16.mxu1 %v6860_v1 }
 0xd3f   : > { %v4890_v18 = vpop.f32.mrf.mxu1 }
 0xd40   : > { %v4891_v19 = vadd.f32 %v4890_v18, %v7603_v49 }
 0xd41   : > { %v6443_v20 = vpop.f32.mrf.mxu1 }
 0xd42   : > { %v4897_v21 = vrot.slane %v4891_v19, 7 }
 0xd43   : > { %v4893_v24 = vpop.f32.mrf.mxu1 }
 0xd44   : > { %4906 = vrot.lane.b32.xlu1 %v4897_v21, %s6862_s3  ;;  %v4899_v26 = vadd.f32 %v4897_v21, %v7608_v55 }
 0xd45   : > { %v6444_v25 = vpop.f32.mrf.mxu1 }
 0xd46   : > { %v5873_v27 = vmul.f32 -1.442695, %v4899_v26 }
 0xd48   : > { %6693 = vpow2.f32 %v5873_v27 }
 0xd55   : > { %v6694_v22 = vpop.eup %6693 }
 0xd56   : > { %v4903_v23 = vadd.f32 1.0, %v6694_v22 }
 0xd58   : > { %6695 = vrcp.f32 %v4903_v23 }
 0xd65   : > { %v6696_v28 = vpop.eup %6695 }
 0xd66   : > { %v4916_v36 = vsub.f32 1.0, %v6696_v28  ;;  %v4925_v41 = vmul.f32 %v6696_v28, %v4923_v37 }
 0xdb6   : > { %v4907_v29 = vpop.permute.xlu1 %4906 }
 0xdb7   : > { %v4909_v32 = vmul.f32 %v6696_v28, %v4907_v29 }
 0xdb9   : > { %4911 = vrot.lane.b32.xlu0 %v4909_v32, %s6862_s3 }
 0xe2b   : > { %v4912_v33 = vpop.permute.xlu0 %4911 }
 0xe2c   : > { %v4914_v34 = vadd.f32 %v4912_v33, %v7608_v55 }
 0xe2e   : > { %6697 = vtanh.f32 %v4914_v34 }
 0xe3b   : > { %v6698_v35 = vpop.eup %6697 }
 0xe3c   : > { %4918 = vrot.lane.b32.xlu1 %v6698_v35, %s6863_s5 }
 0xeae   : > { %v4919_v39 = vpop.permute.xlu1 %4918 }
 0xeaf   : > { %v4921_v16 = vmul.f32 %v4919_v39, %v4916_v36 }
 0xeb1   : > { %v4926_v42 = vadd.f32 %v4925_v41, %v4921_v16 }
 0xeb3   : > { %v4927_v43 = vpack.c.bf16 %v4926_v42, %v4926_v42  ;;  %v5003_v5 = vrot.slane %v4926_v42, 7  ;;  %v5407_v3 = vsel %vm5406_vm7, %v7614_v14, %v4926_v42 }
 0xeb5   : > { %v4929_v30 = vshrl.u32 %v4927_v43, 16 }
 0xeb7   : > { %4931 = vrot.lane.b32.xlu0 %v4929_v30, %s6863_s5 }
 0xf29   : > { %v4932_v31 = vpop.permute.xlu0 %4931 }
 0xf2a   : > { %6450 = vmatmul.mubr.msk.bf16.vlgmr.msra.gmra.mxu0 %vm1134_vm3, %v4932_v31 }
 0xf2b   : > { %6462 = vmatpush3.bf16.msra.mxu0 %v7564_v38  ;;  %6465 = vmatprep.mubr.msk.bf16.mxu0 %vm6861_vm1, %v6860_v1 }
 0xf2c   : > { %6463 = vmatprep.subr.bf16.mxu0 %v6860_v1 }
 0xf2f   : > { %6464 = vmatpush3.bf16.msra.mxu0 %v7572_v40 }
 0xf30   : > { %6477 = vmatprep.subr.bf16.mxu0 %v6860_v1 }
 0xfea   : > { %v4970_v44 = vpop.f32.mrf.mxu0 }
 0xfeb   : > { %v4971_v52 = vadd.f32 %v4970_v44, %v7603_v49 }
 0xfec   : > { %v6451_v45 = vpop.f32.mrf.mxu0 }
 0xfed   : > { %v4977_v46 = vrot.slane %v4971_v52, 6 }
 0xfee   : > { %v4973_v47 = vpop.f32.mrf.mxu0 }
 0xfef   : > { %4986 = vrot.lane.b32.xlu1 %v4977_v46, %s6862_s3  ;;  %v4979_v50 = vadd.f32 %v4977_v46, %v7608_v55 }
 0xff0   : > { %v6452_v48 = vpop.f32.mrf.mxu0 }
 0xff1   : > { %v5875_v53 = vmul.f32 -1.442695, %v4979_v50 }
 0xff3   : > { %6699 = vpow2.f32 %v5875_v53 }
0x1000   : > { %v6700_v51 = vpop.eup %6699 }
0x1001   : > { %v4983_v61 = vadd.f32 1.0, %v6700_v51 }
0x1003   : > { %6701 = vrcp.f32 %v4983_v61 }
0x1010   : > { %v6702_v60 = vpop.eup %6701 }
0x1011   : > { %v4996_v6 = vsub.f32 1.0, %v6702_v60  ;;  %v5005_v63 = vmul.f32 %v6702_v60, %v5003_v5 }
0x1061   : > { %v4987_v54 = vpop.permute.xlu1 %4986 }
0x1062   : > { %v4989_v56 = vmul.f32 %v6702_v60, %v4987_v54 }
0x1064   : > { %4991 = vrot.lane.b32.xlu0 %v4989_v56, %s6862_s3 }
0x10d6   : > { %v4992_v57 = vpop.permute.xlu0 %4991 }
0x10d7   : > { %v4994_v58 = vadd.f32 %v4992_v57, %v7608_v55 }
0x10d9   : > { %6703 = vtanh.f32 %v4994_v58 }
0x10e6   : > { %v6704_v59 = vpop.eup %6703 }
0x10e7   : > { %4998 = vrot.lane.b32.xlu1 %v6704_v59, %s6863_s5 }
0x1159   : > { %v4999_v62 = vpop.permute.xlu1 %4998 }
0x115a   : > { %v5001_v0 = vmul.f32 %v4999_v62, %v4996_v6 }
0x115c   : > { %v5006_v2 = vadd.f32 %v5005_v63, %v5001_v0 }
0x115e   : > { %v5408_v4 = vsel %vm4232_vm6, %v5407_v3, %v5006_v2  ;;  %v5007_v7 = vpack.c.bf16 %v5006_v2, %v5006_v2  ;;  %v5082_v28 = vrot.slane %v5006_v2, 7 }
0x1160   : > { %v5009_v8 = vrot.slane %v5007_v7, 1 }
0x1162   : > { %5010 = vrot.lane.b32.xlu0 %v5009_v8, %s6863_s5 }
0x11d4   : > { %v5011_v9 = vpop.permute.xlu0 %5010 }
0x11d5   : > { %6458 = vmatmul.mubr.msk.bf16.vlgmr.msra.gmra.mxu1 %vm1134_vm3, %v5011_v9 }
0x11d6   : > { %6470 = vmatpush3.bf16.msra.mxu1 %v7564_v38  ;;  %6473 = vmatprep.mubr.msk.bf16.mxu1 %vm6861_vm1, %v6860_v1 }
0x11d7   : > { %6471 = vmatprep.subr.bf16.mxu1 %v6860_v1 }
0x11da   : > { %6472 = vmatpush3.bf16.msra.mxu1 %v7572_v40 }
0x11db   : > { %6485 = vmatprep.subr.bf16.mxu1 %v6860_v1 }
0x1295   : > { %v5049_v10 = vpop.f32.mrf.mxu1 }
0x1296   : > { %v5050_v11 = vadd.f32 %v5049_v10, %v7603_v49 }
0x1297   : > { %v6459_v12 = vpop.f32.mrf.mxu1 }
0x1298   : > { %v5056_v13 = vrot.slane %v5050_v11, 5 }
0x1299   : > { %v5052_v14 = vpop.f32.mrf.mxu1 }
0x129a   : > { %5065 = vrot.lane.b32.xlu1 %v5056_v13, %s6862_s3  ;;  %v5058_v17 = vadd.f32 %v5056_v13, %v7608_v55 }
0x129b   : > { %v6460_v15 = vpop.f32.mrf.mxu1 }
0x129c   : > { %v5877_v18 = vmul.f32 -1.442695, %v5058_v17 }
0x129e   : > { %6705 = vpow2.f32 %v5877_v18 }
0x12ab   : > { %v6706_v19 = vpop.eup %6705 }
0x12ac   : > { %v5062_v20 = vadd.f32 1.0, %v6706_v19 }
0x12ae   : > { %6707 = vrcp.f32 %v5062_v20 }
0x12bb   : > { %v6708_v21 = vpop.eup %6707 }
0x12bc   : > { %v5075_v23 = vsub.f32 1.0, %v6708_v21  ;;  %v5084_v32 = vmul.f32 %v6708_v21, %v5082_v28 }
0x130c   : > { %v5066_v24 = vpop.permute.xlu1 %5065 }
0x130d   : > { %v5068_v25 = vmul.f32 %v6708_v21, %v5066_v24 }
0x130f   : > { %5070 = vrot.lane.b32.xlu0 %v5068_v25, %s6862_s3 }
0x1381   : > { %v5071_v26 = vpop.permute.xlu0 %5070 }
0x1382   : > { %v5073_v27 = vadd.f32 %v5071_v26, %v7608_v55 }
0x1384   : > { %6709 = vtanh.f32 %v5073_v27 }
0x1391   : > { %v6710_v22 = vpop.eup %6709 }
0x1392   : > { %5077 = vrot.lane.b32.xlu1 %v6710_v22, %s6863_s5 }
0x1404   : > { %v5078_v29 = vpop.permute.xlu1 %5077 }
0x1405   : > { %v5080_v33 = vmul.f32 %v5078_v29, %v5075_v23 }
0x1407   : > { %v5085_v34 = vadd.f32 %v5084_v32, %v5080_v33 }
0x1409   : > { %v5410_v35 = vsel %vm5409_vm8, %v5408_v4, %v5085_v34  ;;  %v5086_v36 = vpack.c.bf16 %v5085_v34, %v5085_v34  ;;  %v5163_v56 = vrot.slane %v5085_v34, 7 }
0x140b   : > { %v5088_v37 = vshrl.u32 %v5086_v36, 16 }
0x140d   : > { %v5090_v39 = vrot.slane %v5088_v37, 1 }
0x140f   : > { %5091 = vrot.lane.b32.xlu0 %v5090_v39, %s6863_s5 }
0x1481   : > { %v5092_v41 = vpop.permute.xlu0 %5091 }
0x1482   : > { %6466 = vmatmul.mubr.msk.bf16.vlgmr.msra.gmra.mxu0 %vm1134_vm3, %v5092_v41 }
0x1483   : > { %6478 = vmatpush3.bf16.msra.mxu0 %v7564_v38  ;;  %6481 = vmatprep.mubr.msk.bf16.mxu0 %vm6861_vm1, %v6860_v1 }
0x1484   : > { %6479 = vmatprep.subr.bf16.mxu0 %v6860_v1 }
0x1487   : > { %6480 = vmatpush3.bf16.msra.mxu0 %v7572_v40 }
0x1488   : > { %6493 = vmatprep.subr.bf16.mxu0 %v6860_v1 }
0x1542   : > { %v5130_v16 = vpop.f32.mrf.mxu0 }
0x1543   : > { %v5131_v42 = vadd.f32 %v5130_v16, %v7603_v49 }
0x1544   : > { %v6467_v43 = vpop.f32.mrf.mxu0 }
0x1545   : > { %v5137_v30 = vrot.slane %v5131_v42, 4 }
0x1546   : > { %v5133_v31 = vpop.f32.mrf.mxu0 }
0x1547   : > { %5146 = vrot.lane.b32.xlu1 %v5137_v30, %s6862_s3  ;;  %v5139_v52 = vadd.f32 %v5137_v30, %v7608_v55 }
0x1548   : > { %v6468_v44 = vpop.f32.mrf.mxu0 }
0x1549   : > { %v5879_v45 = vmul.f32 -1.442695, %v5139_v52 }
0x154b   : > { %6711 = vpow2.f32 %v5879_v45 }
0x1558   : > { %v6712_v46 = vpop.eup %6711 }
0x1559   : > { %v5143_v47 = vadd.f32 1.0, %v6712_v46 }
0x155b   : > { %6713 = vrcp.f32 %v5143_v47 }
0x1568   : > { %v6714_v48 = vpop.eup %6713 }
0x1569   : > { %v5156_v54 = vsub.f32 1.0, %v6714_v48  ;;  %v5165_v58 = vmul.f32 %v6714_v48, %v5163_v56 }
0x15b9   : > { %v5147_v50 = vpop.permute.xlu1 %5146 }
0x15ba   : > { %v5149_v53 = vmul.f32 %v6714_v48, %v5147_v50 }
0x15bc   : > { %5151 = vrot.lane.b32.xlu0 %v5149_v53, %s6862_s3 }
0x162e   : > { %v5152_v51 = vpop.permute.xlu0 %5151 }
0x162f   : > { %v5154_v61 = vadd.f32 %v5152_v51, %v7608_v55 }
0x1631   : > { %6715 = vtanh.f32 %v5154_v61 }
0x163e   : > { %v6716_v60 = vpop.eup %6715 }
0x163f   : > { %5158 = vrot.lane.b32.xlu1 %v6716_v60, %s6863_s5 }
0x16b1   : > { %v5159_v57 = vpop.permute.xlu1 %5158 }
0x16b2   : > { %v5161_v59 = vmul.f32 %v5159_v57, %v5156_v54 }
0x16b4   : > { %v5166_v6 = vadd.f32 %v5165_v58, %v5161_v59 }
0x16b6   : > { %v5411_v5 = vsel %vm1088_vm0, %v5410_v35, %v5166_v6  ;;  %v5167_v62 = vpack.c.bf16 %v5166_v6, %v5166_v6  ;;  %v5242_v20 = vrot.slane %v5166_v6, 7 }
0x16b8   : > { %v5169_v63 = vrot.slane %v5167_v62, 2 }
0x16ba   : > { %5170 = vrot.lane.b32.xlu0 %v5169_v63, %s6863_s5 }
0x172c   : > { %v5171_v0 = vpop.permute.xlu0 %5170 }
0x172d   : > { %6474 = vmatmul.mubr.msk.bf16.vlgmr.msra.gmra.mxu1 %vm1134_vm3, %v5171_v0 }
0x172e   : > { %6486 = vmatpush3.bf16.msra.mxu1 %v7564_v38  ;;  %6489 = vmatprep.mubr.msk.bf16.mxu1 %vm6861_vm1, %v6860_v1 }
0x172f   : > { %6487 = vmatprep.subr.bf16.mxu1 %v6860_v1 }
0x1732   : > { %6488 = vmatpush3.bf16.msra.mxu1 %v7572_v40 }
0x17ed   : > { %v5209_v2 = vpop.f32.mrf.mxu1 }
0x17ee   : > { %v5210_v3 = vadd.f32 %v5209_v2, %v7603_v49 }
0x17ef   : > { %v6475_v4 = vpop.f32.mrf.mxu1 }
0x17f0   : > { %v5216_v7 = vrot.slane %v5210_v3, 3 }
0x17f1   : > { %v5212_v8 = vpop.f32.mrf.mxu1 }
0x17f2   : > { %5225 = vrot.lane.b32.xlu1 %v5216_v7, %s6862_s3  ;;  %v5218_v10 = vadd.f32 %v5216_v7, %v7608_v55 }
0x17f3   : > { %v6476_v9 = vpop.f32.mrf.mxu1 }
0x17f4   : > { %v5881_v11 = vmul.f32 -1.442695, %v5218_v10  ;;  %v6645_v10 = vld [vmem:[%s7851_s8 + $0x8] sm:$0xff]  }
0x17f6   : > { %6717 = vpow2.f32 %v5881_v11  ;;  %v6646_v11 = vld [vmem:[%s7851_s8] sm:$0xff]   ;;  %s5515_s8 = scalar_lea.hbm %s7030_s12, %s5892_s2 }
0x1803   : > { %v6718_v38 = vpop.eup %6717 }
0x1804   : > { %v5222_v12 = vadd.f32 1.0, %v6718_v38 }
0x1806   : > { %6719 = vrcp.f32 %v5222_v12 }
0x1813   : > { %v6720_v13 = vpop.eup %6719 }
0x1814   : > { %v5235_v19 = vsub.f32 1.0, %v6720_v13  ;;  %v5244_v24 = vmul.f32 %v6720_v13, %v5242_v20 }
0x1864   : > { %v5226_v14 = vpop.permute.xlu1 %5225 }
0x1865   : > { %v5228_v15 = vmul.f32 %v6720_v13, %v5226_v14 }
0x1867   : > { %5230 = vrot.lane.b32.xlu0 %v5228_v15, %s6862_s3 }
0x18d9   : > { %v5231_v40 = vpop.permute.xlu0 %5230 }
0x18da   : > { %v5233_v17 = vadd.f32 %v5231_v40, %v7608_v55 }
0x18dc   : > { %6721 = vtanh.f32 %v5233_v17 }
0x18e9   : > { %v6722_v18 = vpop.eup %6721 }
0x18ea   : > { %5237 = vrot.lane.b32.xlu1 %v6722_v18, %s6863_s5 }
0x195c   : > { %v5238_v21 = vpop.permute.xlu1 %5237 }
0x195d   : > { %v5240_v25 = vmul.f32 %v5238_v21, %v5235_v19 }
0x195f   : > { %v5245_v26 = vadd.f32 %v5244_v24, %v5240_v25 }
0x1961   : > { %v5246_v27 = vpack.c.bf16 %v5245_v26, %v5245_v26  ;;  %v5413_v22 = vsel %vm5412_vm9, %v5411_v5, %v5245_v26  ;;  %v5323_v47 = vrot.slane %v5245_v26, 7 }
0x1963   : > { %v5248_v23 = vshrl.u32 %v5246_v27, 16 }
0x1965   : > { %v5250_v28 = vrot.slane %v5248_v23, 2 }
0x1967   : > { %5251 = vrot.lane.b32.xlu0 %v5250_v28, %s6863_s5 }
0x19d9   : > { %v5252_v29 = vpop.permute.xlu0 %5251 }
0x19da   : > { %6482 = vmatmul.mubr.msk.bf16.vlgmr.msra.gmra.mxu0 %vm1134_vm3, %v5252_v29 }
0x19db   : > { %6497 = vmatprep.mubr.msk.bf16.mxu0 %vm6861_vm1, %v6860_v1  ;;  %6494 = vmatpush3.bf16.msra.mxu0 %v6645_v10 }
0x19dc   : > { %6495 = vmatprep.subr.bf16.mxu0 %v6860_v1 }
0x19df   : > { %6496 = vmatpush3.bf16.msra.mxu0 %v6646_v11 }
0x1a9a   : > { %v5290_v32 = vpop.f32.mrf.mxu0 }
0x1a9b   : > { %v5291_v33 = vadd.f32 %v5290_v32, %v7603_v49 }
0x1a9c   : > { %v6483_v34 = vpop.f32.mrf.mxu0 }
0x1a9d   : > { %v5297_v35 = vrot.slane %v5291_v33, 2 }
0x1a9e   : > { %v5293_v36 = vpop.f32.mrf.mxu0 }
0x1a9f   : > { %5306 = vrot.lane.b32.xlu1 %v5297_v35, %s6862_s3  ;;  %v5299_v39 = vadd.f32 %v5297_v35, %v7608_v55 }
0x1aa0   : > { %v6484_v37 = vpop.f32.mrf.mxu0 }
0x1aa1   : > { %v5883_v41 = vmul.f32 -1.442695, %v5299_v39 }
0x1aa3   : > { %6723 = vpow2.f32 %v5883_v41 }
0x1ab0   : > { %v6724_v16 = vpop.eup %6723 }
0x1ab1   : > { %v5303_v42 = vadd.f32 1.0, %v6724_v16 }
0x1ab3   : > { %6725 = vrcp.f32 %v5303_v42 }
0x1ac0   : > { %v6726_v43 = vpop.eup %6725 }
0x1ac1   : > { %v5316_v46 = vsub.f32 1.0, %v6726_v43  ;;  %v5325_v50 = vmul.f32 %v6726_v43, %v5323_v47 }
0x1b11   : > { %v5307_v30 = vpop.permute.xlu1 %5306 }
0x1b12   : > { %v5309_v31 = vmul.f32 %v6726_v43, %v5307_v30 }
0x1b14   : > { %5311 = vrot.lane.b32.xlu0 %v5309_v31, %s6862_s3 }
0x1b86   : > { %v5312_v44 = vpop.permute.xlu0 %5311 }
0x1b87   : > { %v5314_v52 = vadd.f32 %v5312_v44, %v7608_v55 }
0x1b89   : > { %6727 = vtanh.f32 %v5314_v52 }
0x1b96   : > { %v6728_v45 = vpop.eup %6727 }
0x1b97   : > { %5318 = vrot.lane.b32.xlu1 %v6728_v45, %s6863_s5 }
0x1c09   : > { %v5319_v48 = vpop.permute.xlu1 %5318 }
0x1c0a   : > { %v5321_v53 = vmul.f32 %v5319_v48, %v5316_v46 }
0x1c0c   : > { %v5326_v51 = vadd.f32 %v5325_v50, %v5321_v53 }
0x1c0e   : > { %v5327_v61 = vpack.c.bf16 %v5326_v51, %v5326_v51  ;;  %v5415_v60 = vsel %vm5414_vm10, %v5413_v22, %v5326_v51  ;;  %v5402_v13 = vrot.slane %v5326_v51, 7 }
0x1c10   : > { %v5329_v54 = vrot.slane %v5327_v61, 3 }
0x1c12   : > { %5330 = vrot.lane.b32.xlu0 %v5329_v54, %s6863_s5 }
0x1c84   : > { %v5331_v56 = vpop.permute.xlu0 %5330 }
0x1c85   : > { %6490 = vmatmul.mubr.msk.bf16.vlgmr.msra.gmra.mxu1 %vm1134_vm3, %v5331_v56 }
0x1d45   : > { %v5369_v57 = vpop.f32.mrf.mxu1 }
0x1d46   : > { %v5370_v58 = vadd.f32 %v5369_v57, %v7603_v49 }
0x1d47   : > { %v6491_v59 = vpop.f32.mrf.mxu1 }
0x1d48   : > { %v5376_v6 = vrot.slane %v5370_v58, 1 }
0x1d49   : > { %v5372_v5 = vpop.f32.mrf.mxu1 }
0x1d4a   : > { %5385 = vrot.lane.b32.xlu1 %v5376_v6, %s6862_s3  ;;  %v5378_v63 = vadd.f32 %v5376_v6, %v7608_v55 }
0x1d4b   : > { %v6492_v62 = vpop.f32.mrf.mxu1 }
0x1d4c   : > { %v5885_v0 = vmul.f32 -1.442695, %v5378_v63 }
0x1d4e   : > { %6729 = vpow2.f32 %v5885_v0 }
0x1d5b   : > { %v6730_v2 = vpop.eup %6729 }
0x1d5c   : > { %v5382_v3 = vadd.f32 1.0, %v6730_v2 }
0x1d5e   : > { %6731 = vrcp.f32 %v5382_v3 }
0x1d6b   : > { %v6732_v4 = vpop.eup %6731 }
0x1d6c   : > { %v5395_v12 = vsub.f32 1.0, %v6732_v4 }
0x1dbc   : > { %v5386_v7 = vpop.permute.xlu1 %5385 }
0x1dbd   : > { %v5388_v8 = vmul.f32 %v6732_v4, %v5386_v7 }
0x1dbf   : > { %5390 = vrot.lane.b32.xlu0 %v5388_v8, %s6862_s3  ;;  %s1061_s3 = scalar_lea.vmem %s7035_s27, %s7105_s16 }
0x1e31   : > { %v5391_v49 = vpop.permute.xlu0 %5390 }
0x1e32   : > { %v5393_v9 = vadd.f32 %v5391_v49, %v7608_v55  ;;  %v5404_v55 = vmul.f32 %v6732_v4, %v5402_v13 }
0x1e34   : > { %6733 = vtanh.f32 %v5393_v9 }
0x1e41   : > { %v6734_v38 = vpop.eup %6733 }
0x1e42   : > { %5397 = vrot.lane.b32.xlu1 %v6734_v38, %s6863_s5 }
0x1eb4   : > { %v5398_v14 = vpop.permute.xlu1 %5397 }
0x1eb5   : > { %v5400_v15 = vmul.f32 %v5398_v14, %v5395_v12 }
0x1eb7   : > { %v5405_v40 = vadd.f32 %v5404_v55, %v5400_v15 }
0x1eb9   : > { %v5417_v17 = vsel %vm5416_vm11, %v5415_v60, %v5405_v40 }
0x1eba   : > { %5419 = vrot.lane.b32.xlu1 %v5417_v17, %s6863_s5  ;;  %v5427_v1 = vpack.c.bf16 %v5417_v17, %v5417_v17 }
0x1ebc   : > { %5436 = vrot.lane.b32.xlu0 %v5427_v1, %s6863_s5  ;;  %s6739_s5 = sshll.u32 %s6865_s20, 4  ;;  %s6740_s5 = int_to_ptr.vmem [resolvable:$false] %s6739_s5 }
0x1ebd   : > { %s6741_s16 = scalar_lea.vmem %s6740_s5, 256  ;;  %p6742_p0 = scmp.lt.s32.totalorder %s5518_s14, %s6740_s5 }
0x1ebe   : > { %p6743_p1 = scmp.lt.s32.totalorder %s6741_s16, %s6735_s19 }
0x1ec0   : > { %p6744_p2 = por %p6743_p1, %p6742_p0 }
0x1ec2   : > { %p6745_p3 = pnand %p6744_p2, %p6738_p13 }
0x1f2c   : > { %v5420_v18 = vpop.permute.xlu1 %5419 }
0x1f2d   : > { %5422 = vst.msk [vmem:[%s1061_s3] sm:$0xff] %vm1134_vm3, %v5420_v18 }
0x1f2e   : > { %v5437_v19 = vpop.permute.xlu0 %5436 }
0x1f2f   : > { %6498 = vmatmul.mubr.msk.bf16.vlgmr.msra.gmra.mxu0 %vm1134_vm3, %v5437_v19 }
0x1f30   : > { %6748 = shalt.err (!%p6745_p3)
}
0x1f31   : > { %s6749_s3 = scalar_lea.hbm %s5515_s8, 128  ;;  %s6753_s9 = scalar_lea.hbm %s7030_s12, 256 }
0x1f32   : > { %p6750_p4 = scmp.ne.s32.totalorder %s5515_s8, %s6749_s3  ;;  %p6754_p9 = scmp.lt.s32.totalorder %s5515_s8, %s7030_s12 }
0x1f33   : > { %p6755_p10 = scmp.lt.s32.totalorder %s6753_s9, %s6749_s3 }
0x1f34   : > { %p6751_p7 = pnand %p6750_p4, %p7080_p5 }
0x1f35   : > { %p6756_p11 = por %p6755_p10, %p6754_p9 }
0x1f36   : > { %p6752_p8 = pneg %p6751_p7 }
0x1f38   : > { %p6757_p12 = pnand %p6756_p11, %p6752_p8 }
0x1f3a   : > { %6760 = shalt.err (!%p6757_p12)
}
0x1f3b   : > { %6501 = dma.vmem_to_hbm [thread:$0]  (%p7080_p5), %s5518_s14, 128, %s5515_s8, %s5495_s17   ;;  %v5886_v20 = vld [vmem:[%s7025_s13] ss:$0 sm:$0xff] }
0x1f3c   : > { %s7852_s19 = sshll.u32 %s7593_s6, 3  ;;  %s7738_s16 = scalar_lea.hbm %s7040_s4, %s5892_s2 }
0x1f3d   : > { %s1046_s20 = scalar_lea.vmem [#allocation4], %s7852_s19  ;;  %s5504_s3 = scalar_lea.sflag [#allocation5], %s7593_s6 }
0x1f3e   : > { %s5533_s5 = sshll.u32 %s1046_s20, 4  ;;  %s6866_s17 = smov [#allocation4]   ;;  %s7740_s5 = int_to_ptr.vmem [resolvable:$true] %s5533_s5 }
0x1f3f   : > { %s6761_s9 = scalar_lea.vmem %s7740_s5, 128  ;;  %s6765_s14 = sshll.u32 %s6866_s17, 4  ;;  %s6766_s14 = int_to_ptr.vmem [resolvable:$false] %s6765_s14 }
0x1f40   : > { %p6762_p13 = scmp.ne.s32.totalorder %s7740_s5, %s6761_s9  ;;  %s6767_s0 = scalar_lea.vmem %s6766_s14, 256 }
0x1f41   : > { %p6768_p2 = scmp.lt.s32.totalorder %s7740_s5, %s6766_s14  ;;  %p6769_p3 = scmp.lt.s32.totalorder %s6767_s0, %s6761_s9 }
0x1f42   : > { %p6763_p0 = pnand %p6762_p13, %p7080_p5 }
0x1f43   : > { %p6770_p4 = por %p6769_p3, %p6768_p2 }
0x1f44   : > { %p6764_p1 = pneg %p6763_p0 }
0x1f46   : > { %p6771_p7 = pnand %p6770_p4, %p6764_p1 }
0x1fef   : > { %v5487_v21 = vpop.f32.mrf.mxu0 }
0x1ff0   : > { %v5488_v24 = vadd.f32 %v5886_v20, %v5487_v21 }
0x1ff1   : > { %v6499_v25 = vpop.f32.mrf.mxu0 }
0x1ff2   : > { %5493 = vst [vmem:[%s1046_s20] sm:$0xff] %v5488_v24 }
0x1ff3   : > { %v5490_v26 = vpop.f32.mrf.mxu0 }
0x1ff4   : > { %6774 = shalt.err (!%p6771_p7)
}
0x1ff5   : > { %s6775_s6 = scalar_lea.hbm %s7738_s16, 128  ;;  %s6779_s2 = scalar_lea.hbm %s7040_s4, 256 }
0x1ff6   : > { %p6776_p8 = scmp.ne.s32.totalorder %s7738_s16, %s6775_s6  ;;  %p6780_p11 = scmp.lt.s32.totalorder %s7738_s16, %s7040_s4 }
0x1ff7   : > { %p6781_p12 = scmp.lt.s32.totalorder %s6779_s2, %s6775_s6 }
0x1ff8   : > { %p6777_p9 = pnand %p6776_p8, %p7080_p5 }
0x1ff9   : > { %p6782_p13 = por %p6781_p12, %p6780_p11 }
0x1ffa   : > { %p6778_p10 = pneg %p6777_p9 }
0x1ffc   : > { %p6783_p0 = pnand %p6782_p13, %p6778_p10 }
0x1ffe   : > { %6786 = shalt.err (!%p6783_p0)
}
0x1fff   : > { %6502 = dma.vmem_to_hbm [thread:$0]  (%p7080_p5), %s7740_s5, 128, %s7738_s16, %s5504_s3   ;;  %v6500_v27 = vpop.f32.mrf.mxu0 }
0x2000 PF: > { %p6512_p1 = scmp.ge.s32.totalorder %s6825_s15, 2  ;;  %s5545_s8 = sand.u32 1, %s6813_s7  }
0x2001   : > { %s5546_s19 = scalar_lea.sflag [#allocation3], %s5545_s8 }
0x2002   : > { %p6506_p2 = pnand %p6512_p1, %p7084_p6 }
0x2004   : > { %p6507_p3 = pneg %p6506_p2 }
0x2006   : > { %6804 = dma.done.wait (%p6507_p3), %s5546_s19, 128  }
0x2007   : > { %6806 = vsyncadd (%p6507_p3), %s5546_s19, 4294967168  ;;  %s5562_s20 = scalar_lea.sflag [#allocation5], %s5545_s8 }
0x2008   : > { %6808 = dma.done.wait (%p6507_p3), %s5562_s20, 128  }
0x2009   : > { %6810 = vsyncadd (%p6507_p3), %s5562_s20, 4294967168  ;;  %p81_p5 = scmp.ge.s32.totalorder %s7067_s18, 4   ;;  %s7853_s7 = smov %s6817_s10 }
0x200a   : > { %s7854_s10 = smov %s6821_s11  ;;  %s7855_s11 = smov %s7078_s26 }
0x200b   : > { %s7856_s15 = smov %s7067_s18  ;;  %83 = sbr.rel (!%p81_p5) target bundleno = 71 (0x47), region = 247 }
0x2010   :  { %5567 = vsyncpa [#allocation3], 1 }
0x2011   :  { %5569 = vsyncpa [#allocation3 + $0x1], 1 }
0x2012   :  { %5570 = vsyncpa [#allocation5], 1 }
0x2013   :  { %5572 = vsyncpa [#allocation5 + $0x1], 1 }

</bundles_post_ra>
